<compile_context>
chip_gen: v7x
topology: tpu7x:2x2x1
jax: 0.10.0
libtpu: 0.0.40
codegen_flags: <defaults>
</compile_context>

<pallas_src>
import functools
import math

import jax
import jax.numpy as jnp
from jax.experimental import pallas as pl
from jax.experimental.pallas import tpu as pltpu


# ----------------------------------------------------------------------------
# Fused forward kernel
# ----------------------------------------------------------------------------
def make_fused_kernel(*, batch, num_pathways, num_heads, attn_dim, depth):
    P = num_pathways
    A = attn_dim
    head_dim = attn_dim // num_heads
    scale = 1.0 / math.sqrt(head_dim)

    def kernel(*refs):
        it = iter(refs)
        nxt = lambda: next(it)

        # -------- inputs (order must match `flat_inputs` in the wrapper) ----
        ffn_in_ref, drug_in_ref = nxt(), nxt()
        gw1, gb1, glg, glb, gw2, gb2 = nxt(), nxt(), nxt(), nxt(), nxt(), nxt()
        gvg, gvb = nxt(), nxt()
        dw1, db1, dlg, dlb, dw2, db2 = nxt(), nxt(), nxt(), nxt(), nxt(), nxt()
        p2d_wv, p2d_bv, p2d_wo, p2d_bo = nxt(), nxt(), nxt(), nxt()
        hsum_ref, hexp_ref = nxt(), nxt()
        d2p = [tuple(nxt() for _ in range(8)) for _ in range(depth)]
        (hw1, hb1, hbs1, hbt1, hw2, hb2, hbs2, hbt2, hw3, hb3) = (
            nxt() for _ in range(10))
        # -------- outputs ----------------------------------------------------
        out_gene, out_path, out_drug, out_attn, out_x = (
            nxt(), nxt(), nxt(), nxt(), nxt())

        def dot(u, w):
            return jnp.dot(u, w, preferred_element_type=jnp.float32)

        def ln(x, g, b, eps=1e-5):
            mu = jnp.mean(x, axis=-1, keepdims=True)
            var = jnp.mean(jnp.square(x - mu), axis=-1, keepdims=True)
            return (x - mu) * jax.lax.rsqrt(var + eps) * g + b

        # ---- gene FFN: Linear -> LayerNorm -> ReLU -> (Dropout) -> Linear ----
        xg = ffn_in_ref[...]                                   # (B*P, G*Din)
        hg = dot(xg, gw1[...]) + gb1[...]
        hg = jnp.maximum(ln(hg, glg[...], glb[...]), 0.0)
        ffn_out = dot(hg, gw2[...]) + gb2[...]                 # (B*P, Ag)
        path_emb = ln(ffn_out, gvg[...], gvb[...])             # gene_value_norm
        out_gene[...] = ffn_out.astype(out_gene.dtype)
        out_path[...] = path_emb.astype(out_path.dtype)

        # ---- drug FFN --------------------------------------------------------
        xd = drug_in_ref[...]                                  # (B, 768)
        hd = dot(xd, dw1[...]) + db1[...]
        hd = jnp.maximum(ln(hd, dlg[...], dlb[...]), 0.0)
        drug_emb = dot(hd, dw2[...]) + db2[...]                # (B, Dd)
        out_drug[...] = drug_emb.astype(out_drug.dtype)

        # ---- Path2Drug cross-attention stack: Lk == 1 ------------------------
        # Softmax over a single key is exactly 1.0 for every head/query, so
        # each layer reduces to v @ Wo + bo (independent of the query); only
        # the last layer's value/output projections influence the result, and
        # every pathway row is identical => max over pathways is the row itself.
        v_last = dot(drug_emb, p2d_wv[...]) + p2d_bv[...]      # (B, A)
        final_path = dot(v_last, p2d_wo[...]) + p2d_bo[...]    # (B, A)

        Hsum = hsum_ref[...]                                   # (A, H) selector
        Hexp = hexp_ref[...]                                   # (H, A) selector
        w1 = hw1[...]
        w1_path, w1_drug = w1[:A, :], w1[A:, :]

        # ---- Drug2Path stack (Lq == 1, Lk == P) + final MLP head -------------
        for b in range(batch):
            kv_b = path_emb[b * P:(b + 1) * P, :]              # (P, Ag)
            q_b = drug_emb[b:b + 1, :]                         # (1, Dd)
            for l, (qw, qb, kw, kb, vw, vb, ow, ob) in enumerate(d2p):
                q = dot(q_b, qw[...]) + qb[...]                # (1, A)
                k = dot(kv_b, kw[...]) + kb[...]               # (P, A)
                v = dot(kv_b, vw[...]) + vb[...]               # (P, A)
                # per-head scores (keys x heads) without per-head slicing:
                s = dot(q * k, Hsum) * scale                   # (P, H)
                s = s - jnp.max(s, axis=0, keepdims=True)
                p = jnp.exp(s)
                p = p / jnp.sum(p, axis=0, keepdims=True)      # softmax over keys
                if l == depth - 1:
                    out_attn[b * P:(b + 1) * P, :] = p.astype(out_attn.dtype)
                # concat(head outputs)[f] == sum_k p[k, head(f)] * v[k, f]
                heads = jnp.sum(dot(p, Hexp) * v, axis=0, keepdims=True)  # (1, A)
                q_b = dot(heads, ow[...]) + ob[...]            # (1, A)
            # final head: fc1 -> BN1(eval) -> ReLU -> fc2 -> BN2 -> ReLU -> fc3
            h1 = (dot(final_path[b:b + 1, :], w1_path)
                  + dot(q_b, w1_drug) + hb1[...])
            h1 = jnp.maximum(h1 * hbs1[...] + hbt1[...], 0.0)
            h2 = dot(h1, hw2[...]) + hb2[...]
            h2 = jnp.maximum(h2 * hbs2[...] + hbt2[...], 0.0)
            out_x[b:b + 1, :] = (dot(h2, hw3[...]) + hb3[...]).astype(out_x.dtype)

    return kernel


# ----------------------------------------------------------------------------
# Full forward (single fused pallas_call + cheap XLA glue)
# ----------------------------------------------------------------------------
def drug_response_forward(params, pathway_gene_indices, gene_embeddings_input,
                          drug_chembert_embeddings, *, num_heads):
    b = gene_embeddings_input.shape[0]
    num_pathways, max_slots = pathway_gene_indices.shape
    d_in = gene_embeddings_input.shape[-1]
    gene_out = params["gene_w2"].shape[1]
    drug_out = params["drug_w2"].shape[1]
    attn_dim = params["d2p_layers"][0]["wo"].shape[1]
    depth = len(params["d2p_layers"])
    head_dim = attn_dim // num_heads

    # pathway gather (XLA glue): -1 -> 0, then flatten each pathway's genes
    idx = jnp.where(pathway_gene_indices < 0, 0, pathway_gene_indices)
    pathway_genes = gene_embeddings_input[:, idx, :]           # (B, P, G, Din)
    ffn_in = pathway_genes.reshape(b * num_pathways, max_slots * d_in)

    # constant block-diagonal head selectors (A, H) / (H, A)
    feat_head = jnp.arange(attn_dim, dtype=jnp.int32) // head_dim
    hsum = (feat_head[:, None]
            == jnp.arange(num_heads, dtype=jnp.int32)[None, :]).astype(jnp.float32)
    hexp = hsum.T

    p2d_last = params["p2d_layers"][-1]
    flat_inputs = [
        ffn_in, drug_chembert_embeddings,
        params["gene_w1"], params["gene_b1"], params["gene_ln_g"],
        params["gene_ln_b"], params["gene_w2"], params["gene_b2"],
        params["gvn_g"], params["gvn_b"],
        params["drug_w1"], params["drug_b1"], params["drug_ln_g"],
        params["drug_ln_b"], params["drug_w2"], params["drug_b2"],
        p2d_last["wv"], p2d_last["bv"], p2d_last["wo"], p2d_last["bo"],
        hsum, hexp,
    ]
    for lp in params["d2p_layers"]:
        flat_inputs += [lp["wq"], lp["bq"], lp["wk"], lp["bk"],
                        lp["wv"], lp["bv"], lp["wo"], lp["bo"]]
    hd = params["head"]
    flat_inputs += [hd["w1"], hd["b1"], hd["bn1_scale"], hd["bn1_shift"],
                    hd["w2"], hd["b2"], hd["bn2_scale"], hd["bn2_shift"],
                    hd["w3"], hd["b3"]]

    kernel = make_fused_kernel(batch=b, num_pathways=num_pathways,
                               num_heads=num_heads, attn_dim=attn_dim,
                               depth=depth)
    vmem = pl.BlockSpec(memory_space=pltpu.MemorySpace.VMEM)
    gene_val_2d, path_emb_2d, drug_emb, attn_flat, x = pl.pallas_call(
        kernel,
        out_shape=(
            jax.ShapeDtypeStruct((b * num_pathways, gene_out), jnp.float32),
            jax.ShapeDtypeStruct((b * num_pathways, gene_out), jnp.float32),
            jax.ShapeDtypeStruct((b, drug_out), jnp.float32),
            jax.ShapeDtypeStruct((b * num_pathways, num_heads), jnp.float32),
            jax.ShapeDtypeStruct((b, 1), jnp.float32),
        ),
        in_specs=[vmem] * len(flat_inputs),
        out_specs=(vmem, vmem, vmem, vmem, vmem),
    )(*flat_inputs)

    gene_embedded_value = gene_val_2d.reshape(b, num_pathways, gene_out)
    pathway_embeddings = path_emb_2d.reshape(b, num_pathways, gene_out)
    # path2drug attends to a single drug token -> softmax weights exactly 1.0
    path2drug_w = jnp.ones((b, num_heads, num_pathways, 1), jnp.float32)
    drug2path_w = attn_flat.reshape(b, num_pathways, num_heads)
    drug2path_w = drug2path_w.transpose(0, 2, 1)[:, :, None, :]
    return (x, path2drug_w, drug2path_w, gene_embedded_value,
            drug_emb, pathway_embeddings)


# ----------------------------------------------------------------------------
# Pure-JAX reference (no shortcuts; validates the fused kernel numerically)
# ----------------------------------------------------------------------------
def _ref_ln(x, g, b, eps=1e-5):
    mu = jnp.mean(x, axis=-1, keepdims=True)
    var = jnp.mean(jnp.square(x - mu), axis=-1, keepdims=True)
    return (x - mu) / jnp.sqrt(var + eps) * g + b


def _ref_mha_layer(q, kv, lp, num_heads):
    hi = jax.lax.Precision.HIGHEST
    a = lp["wq"].shape[1]
    dh = a // num_heads
    bsz, lq, _ = q.shape
    lk = kv.shape[1]
    Q = jnp.einsum("bld,da->bla", q, lp["wq"], precision=hi) + lp["bq"]
    K = jnp.einsum("bld,da->bla", kv, lp["wk"], precision=hi) + lp["bk"]
    V = jnp.einsum("bld,da->bla", kv, lp["wv"], precision=hi) + lp["bv"]
    Qh = Q.reshape(bsz, lq, num_heads, dh).transpose(0, 2, 1, 3)
    Kh = K.reshape(bsz, lk, num_heads, dh).transpose(0, 2, 1, 3)
    Vh = V.reshape(bsz, lk, num_heads, dh).transpose(0, 2, 1, 3)
    s = jnp.einsum("bhqd,bhkd->bhqk", Qh, Kh, precision=hi) / math.sqrt(dh)
    p = jax.nn.softmax(s, axis=-1)
    o = jnp.einsum("bhqk,bhkd->bhqd", p, Vh, precision=hi)
    o = o.transpose(0, 2, 1, 3).reshape(bsz, lq, a)
    out = jnp.einsum("bla,ao->blo", o, lp["wo"], precision=hi) + lp["bo"]
    return out, p


def drug_response_forward_ref(params, pathway_gene_indices, gene_embeddings_input,
                              drug_chembert_embeddings, *, num_heads):
    hi = jax.lax.Precision.HIGHEST
    b = gene_embeddings_input.shape[0]
    P, G = pathway_gene_indices.shape
    din = gene_embeddings_input.shape[-1]
    idx = jnp.where(pathway_gene_indices < 0, 0, pathway_gene_indices)
    pg = gene_embeddings_input[:, idx, :].reshape(b * P, G * din)

    def ffn(x, w1, b1, g, be, w2, b2):
        h = jnp.dot(x, w1, precision=hi) + b1
        h = jnp.maximum(_ref_ln(h, g, be), 0.0)
        return jnp.dot(h, w2, precision=hi) + b2

    ffn_out = ffn(pg, params["gene_w1"], params["gene_b1"], params["gene_ln_g"],
                  params["gene_ln_b"], params["gene_w2"], params["gene_b2"])
    gene_val = ffn_out.reshape(b, P, -1)
    path_emb = _ref_ln(ffn_out, params["gvn_g"], params["gvn_b"]).reshape(b, P, -1)
    drug_emb = ffn(drug_chembert_embeddings, params["drug_w1"], params["drug_b1"],
                   params["drug_ln_g"], params["drug_ln_b"],
                   params["drug_w2"], params["drug_b2"])

    drug_tok = drug_emb[:, None, :]
    out, p2d_w = path_emb, None
    for lp in params["p2d_layers"]:
        out, p2d_w = _ref_mha_layer(out, drug_tok, lp, num_heads)
    p2d_out = out
    out, d2p_w = drug_tok, None
    for lp in params["d2p_layers"]:
        out, d2p_w = _ref_mha_layer(out, path_emb, lp, num_heads)
    d2p_out = out

    final_path = jnp.max(p2d_out, axis=1)
    final_drug = d2p_out[:, 0, :]
    comb = jnp.concatenate([final_path, final_drug], axis=-1)
    hd = params["head"]
    h = jnp.dot(comb, hd["w1"], precision=hi) + hd["b1"]
    h = jnp.maximum(h * hd["bn1_scale"] + hd["bn1_shift"], 0.0)
    h = jnp.dot(h, hd["w2"], precision=hi) + hd["b2"]
    h = jnp.maximum(h * hd["bn2_scale"] + hd["bn2_shift"], 0.0)
    x = jnp.dot(h, hd["w3"], precision=hi) + hd["b3"]
    return x, p2d_w, d2p_w, gene_val, drug_emb, path_emb


# ----------------------------------------------------------------------------
# Parameter init (deterministic, torch.nn.Linear-style uniform)
# ----------------------------------------------------------------------------
def linear_init(key, din, dout):
    kw, kb = jax.random.split(key)
    lim = 1.0 / math.sqrt(din)
    w = jax.random.uniform(kw, (din, dout), jnp.float32, -lim, lim)
    b = jax.random.uniform(kb, (1, dout), jnp.float32, -lim, lim)
    return w, b


def mha_layer_init(key, dq, dk, a):
    ks = jax.random.split(key, 4)
    wq, bq = linear_init(ks[0], dq, a)
    wk, bk = linear_init(ks[1], dk, a)
    wv, bv = linear_init(ks[2], dk, a)
    wo, bo = linear_init(ks[3], a, a)
    return dict(wq=wq, bq=bq, wk=wk, bk=bk, wv=wv, bv=bv, wo=wo, bo=bo)


def init_params(key, *, max_gene_slots, gene_input_dim, gene_ffn_hidden, gene_ffn_out,
                drug_input_dim, drug_ffn_hidden, drug_ffn_out,
                cross_attn_dim, depth, final_dim, final_red):
    keys = jax.random.split(key, 16)
    p = {}
    gin = max_gene_slots * gene_input_dim
    p["gene_w1"], p["gene_b1"] = linear_init(keys[0], gin, gene_ffn_hidden)
    p["gene_ln_g"] = jnp.ones((1, gene_ffn_hidden), jnp.float32)
    p["gene_ln_b"] = jnp.zeros((1, gene_ffn_hidden), jnp.float32)
    p["gene_w2"], p["gene_b2"] = linear_init(keys[1], gene_ffn_hidden, gene_ffn_out)
    p["gvn_g"] = jnp.ones((1, gene_ffn_out), jnp.float32)
    p["gvn_b"] = jnp.zeros((1, gene_ffn_out), jnp.float32)
    p["drug_w1"], p["drug_b1"] = linear_init(keys[2], drug_input_dim, drug_ffn_hidden)
    p["drug_ln_g"] = jnp.ones((1, drug_ffn_hidden), jnp.float32)
    p["drug_ln_b"] = jnp.zeros((1, drug_ffn_hidden), jnp.float32)
    p["drug_w2"], p["drug_b2"] = linear_init(keys[3], drug_ffn_hidden, drug_ffn_out)
    p2d_keys = jax.random.split(keys[4], depth)
    p["p2d_layers"] = [
        mha_layer_init(p2d_keys[l],
                       gene_ffn_out if l == 0 else cross_attn_dim,
                       drug_ffn_out, cross_attn_dim)
        for l in range(depth)]
    d2p_keys = jax.random.split(keys[5], depth)
    p["d2p_layers"] = [
        mha_layer_init(d2p_keys[l],
                       drug_ffn_out if l == 0 else cross_attn_dim,
                       gene_ffn_out, cross_attn_dim)
        for l in range(depth)]
    head = {}
    head["w1"], head["b1"] = linear_init(keys[6], 2 * cross_attn_dim, final_dim)
    d2 = final_dim // final_red
    head["w2"], head["b2"] = linear_init(keys[7], final_dim, d2)
    head["w3"], head["b3"] = linear_init(keys[8], d2, 1)
    eps = 1e-5  # BatchNorm1d eval: gamma=1, beta=0, mean=0, var=1 (fresh stats)
    head["bn1_scale"] = jnp.full((1, final_dim), 1.0 / math.sqrt(1.0 + eps), jnp.float32)
    head["bn1_shift"] = jnp.zeros((1, final_dim), jnp.float32)
    head["bn2_scale"] = jnp.full((1, d2), 1.0 / math.sqrt(1.0 + eps), jnp.float32)
    head["bn2_shift"] = jnp.zeros((1, d2), jnp.float32)
    p["head"] = head
    return p


# ----------------------------------------------------------------------------
# Main
# ----------------------------------------------------------------------------
if __name__ == "__main__":
    B = 2
    N_GENES = 40
    GENE_INPUT_DIM = 10
    MAX_GENE_SLOTS = 16
    NUM_PATHWAYS = 8
    GENE_FFN_HIDDEN = 128
    GENE_FFN_OUT = 32
    DRUG_INPUT_DIM = 768
    DRUG_FFN_HIDDEN = 128
    DRUG_FFN_OUT = 64
    CROSS_ATTN_DIM = 32
    NUM_HEADS = 4
    DEPTH = 2
    FINAL_DIM = 64
    FINAL_RED = 2

    root = jax.random.PRNGKey(0)
    k_params, k_gene, k_drug, k_idx, k_mask = jax.random.split(root, 5)

    params = init_params(
        k_params,
        max_gene_slots=MAX_GENE_SLOTS, gene_input_dim=GENE_INPUT_DIM,
        gene_ffn_hidden=GENE_FFN_HIDDEN, gene_ffn_out=GENE_FFN_OUT,
        drug_input_dim=DRUG_INPUT_DIM, drug_ffn_hidden=DRUG_FFN_HIDDEN,
        drug_ffn_out=DRUG_FFN_OUT, cross_attn_dim=CROSS_ATTN_DIM,
        depth=DEPTH, final_dim=FINAL_DIM, final_red=FINAL_RED)

    gene_embeddings_input = jax.random.normal(
        k_gene, (B, N_GENES, GENE_INPUT_DIM), jnp.float32)
    drug_chembert_embeddings = jax.random.normal(
        k_drug, (B, DRUG_INPUT_DIM), jnp.float32)
    raw_idx = jax.random.randint(k_idx, (NUM_PATHWAYS, MAX_GENE_SLOTS), 0, N_GENES)
    pad_mask = jax.random.bernoulli(k_mask, 0.2, (NUM_PATHWAYS, MAX_GENE_SLOTS))
    pathway_gene_indices = jnp.where(pad_mask, -1, raw_idx).astype(jnp.int32)

    fwd = jax.jit(functools.partial(drug_response_forward, num_heads=NUM_HEADS))
    outs = fwd(params, pathway_gene_indices, gene_embeddings_input,
               drug_chembert_embeddings)
    outs = jax.block_until_ready(outs)

    x, p2d_w, d2p_w, gene_val, drug_emb, path_emb = outs
    assert x.shape == (B, 1)
    assert p2d_w.shape == (B, NUM_HEADS, NUM_PATHWAYS, 1)
    assert d2p_w.shape == (B, NUM_HEADS, 1, NUM_PATHWAYS)
    assert gene_val.shape == (B, NUM_PATHWAYS, GENE_FFN_OUT)
    assert drug_emb.shape == (B, DRUG_FFN_OUT)
    assert path_emb.shape == (B, NUM_PATHWAYS, GENE_FFN_OUT)
    assert bool(jnp.all(jnp.isfinite(x)))

    # numerical check against the pure-JAX reference (no Lk==1 / head-batching
    # shortcuts in the reference)
    refs = drug_response_forward_ref(params, pathway_gene_indices,
                                     gene_embeddings_input,
                                     drug_chembert_embeddings,
                                     num_heads=NUM_HEADS)
    names = ["x", "p2d_w", "d2p_w", "gene_val", "drug_emb", "path_emb"]
    for name, got, want in zip(names, outs, refs):
        assert got.shape == want.shape, (name, got.shape, want.shape)
        err = float(jnp.max(jnp.abs(got - want)))
        assert err < 2e-2, (name, err)

    print("KERNEL_OK")
</pallas_src>

<mosaic_0001>
module attributes {stable_mosaic.version = 11 : i64} {
  func.func @kernel(%arg0: memref<16x160xf32, #tpu.memory_space<vmem>>, %arg1: memref<2x768xf32, #tpu.memory_space<vmem>>, %arg2: memref<160x128xf32, #tpu.memory_space<vmem>>, %arg3: memref<1x128xf32, #tpu.memory_space<vmem>>, %arg4: memref<1x128xf32, #tpu.memory_space<vmem>>, %arg5: memref<1x128xf32, #tpu.memory_space<vmem>>, %arg6: memref<128x32xf32, #tpu.memory_space<vmem>>, %arg7: memref<1x32xf32, #tpu.memory_space<vmem>>, %arg8: memref<1x32xf32, #tpu.memory_space<vmem>>, %arg9: memref<1x32xf32, #tpu.memory_space<vmem>>, %arg10: memref<768x128xf32, #tpu.memory_space<vmem>>, %arg11: memref<1x128xf32, #tpu.memory_space<vmem>>, %arg12: memref<1x128xf32, #tpu.memory_space<vmem>>, %arg13: memref<1x128xf32, #tpu.memory_space<vmem>>, %arg14: memref<128x64xf32, #tpu.memory_space<vmem>>, %arg15: memref<1x64xf32, #tpu.memory_space<vmem>>, %arg16: memref<64x32xf32, #tpu.memory_space<vmem>>, %arg17: memref<1x32xf32, #tpu.memory_space<vmem>>, %arg18: memref<32x32xf32, #tpu.memory_space<vmem>>, %arg19: memref<1x32xf32, #tpu.memory_space<vmem>>, %arg20: memref<32x4xf32, #tpu.memory_space<vmem>>, %arg21: memref<4x32xf32, #tpu.memory_space<vmem>>, %arg22: memref<64x32xf32, #tpu.memory_space<vmem>>, %arg23: memref<1x32xf32, #tpu.memory_space<vmem>>, %arg24: memref<32x32xf32, #tpu.memory_space<vmem>>, %arg25: memref<1x32xf32, #tpu.memory_space<vmem>>, %arg26: memref<32x32xf32, #tpu.memory_space<vmem>>, %arg27: memref<1x32xf32, #tpu.memory_space<vmem>>, %arg28: memref<32x32xf32, #tpu.memory_space<vmem>>, %arg29: memref<1x32xf32, #tpu.memory_space<vmem>>, %arg30: memref<32x32xf32, #tpu.memory_space<vmem>>, %arg31: memref<1x32xf32, #tpu.memory_space<vmem>>, %arg32: memref<32x32xf32, #tpu.memory_space<vmem>>, %arg33: memref<1x32xf32, #tpu.memory_space<vmem>>, %arg34: memref<32x32xf32, #tpu.memory_space<vmem>>, %arg35: memref<1x32xf32, #tpu.memory_space<vmem>>, %arg36: memref<32x32xf32, #tpu.memory_space<vmem>>, %arg37: memref<1x32xf32, #tpu.memory_space<vmem>>, %arg38: memref<64x64xf32, #tpu.memory_space<vmem>>, %arg39: memref<1x64xf32, #tpu.memory_space<vmem>>, %arg40: memref<1x64xf32, #tpu.memory_space<vmem>>, %arg41: memref<1x64xf32, #tpu.memory_space<vmem>>, %arg42: memref<64x32xf32, #tpu.memory_space<vmem>>, %arg43: memref<1x32xf32, #tpu.memory_space<vmem>>, %arg44: memref<1x32xf32, #tpu.memory_space<vmem>>, %arg45: memref<1x32xf32, #tpu.memory_space<vmem>>, %arg46: memref<32x1xf32, #tpu.memory_space<vmem>>, %arg47: memref<1x1xf32, #tpu.memory_space<vmem>>, %arg48: memref<16x32xf32, #tpu.memory_space<vmem>>, %arg49: memref<16x32xf32, #tpu.memory_space<vmem>>, %arg50: memref<2x64xf32, #tpu.memory_space<vmem>>, %arg51: memref<16x4xf32, #tpu.memory_space<vmem>>, %arg52: memref<2x1xf32, #tpu.memory_space<vmem>>) attributes {dimension_semantics = [], scalar_prefetch = 0 : i64, scratch_operands = 0 : i64, tpu.core_type = #tpu.core_type<tc>} {
    %c0 = arith.constant 0 : index
    %c0_0 = arith.constant 0 : index
    %0 = vector.load %arg0[%c0, %c0_0] : memref<16x160xf32, #tpu.memory_space<vmem>>, vector<16x160xf32>
    %c0_1 = arith.constant 0 : index
    %c0_2 = arith.constant 0 : index
    %1 = vector.load %arg2[%c0_1, %c0_2] : memref<160x128xf32, #tpu.memory_space<vmem>>, vector<160x128xf32>
    %cst = arith.constant dense<0.000000e+00> : vector<16x128xf32>
    %2 = tpu.matmul %0, %1, %cst {dimension_numbers = #tpu.dot_dimension_numbers<[1], [0], [0], [1], [0, 0, 1, 1], [], []>} : vector<16x160xf32>, vector<160x128xf32>, vector<16x128xf32> -> vector<16x128xf32>
    %c0_3 = arith.constant 0 : index
    %c0_4 = arith.constant 0 : index
    %3 = vector.load %arg3[%c0_3, %c0_4] : memref<1x128xf32, #tpu.memory_space<vmem>>, vector<1x128xf32>
    %4 = vector.broadcast %3 : vector<1x128xf32> to vector<16x128xf32>
    %5 = arith.addf %2, %4 : vector<16x128xf32>
    %c0_5 = arith.constant 0 : index
    %c0_6 = arith.constant 0 : index
    %6 = vector.load %arg4[%c0_5, %c0_6] : memref<1x128xf32, #tpu.memory_space<vmem>>, vector<1x128xf32>
    %c0_7 = arith.constant 0 : index
    %c0_8 = arith.constant 0 : index
    %7 = vector.load %arg5[%c0_7, %c0_8] : memref<1x128xf32, #tpu.memory_space<vmem>>, vector<1x128xf32>
    %cst_9 = arith.constant dense<0.000000e+00> : vector<16xf32>
    %8 = vector.multi_reduction <add>, %5, %cst_9 [1] : vector<16x128xf32> to vector<16xf32>
    %9 = vector.shape_cast %8 : vector<16xf32> to vector<16x1xf32>
    %cst_10 = arith.constant 1.280000e+02 : f32
    %10 = vector.broadcast %cst_10 : f32 to vector<16x1xf32>
    %11 = arith.divf %9, %10 : vector<16x1xf32>
    %12 = vector.broadcast %11 : vector<16x1xf32> to vector<16x128xf32>
    %13 = arith.subf %5, %12 : vector<16x128xf32>
    %14 = arith.mulf %13, %13 : vector<16x128xf32>
    %cst_11 = arith.constant dense<0.000000e+00> : vector<16xf32>
    %15 = vector.multi_reduction <add>, %14, %cst_11 [1] : vector<16x128xf32> to vector<16xf32>
    %16 = vector.shape_cast %15 : vector<16xf32> to vector<16x1xf32>
    %cst_12 = arith.constant 1.280000e+02 : f32
    %17 = vector.broadcast %cst_12 : f32 to vector<16x1xf32>
    %18 = arith.divf %16, %17 : vector<16x1xf32>
    %19 = vector.broadcast %11 : vector<16x1xf32> to vector<16x128xf32>
    %20 = arith.subf %5, %19 : vector<16x128xf32>
    %cst_13 = arith.constant 9.99999974E-6 : f32
    %21 = vector.broadcast %cst_13 : f32 to vector<16x1xf32>
    %22 = arith.addf %18, %21 : vector<16x1xf32>
    %23 = math.rsqrt %22 : vector<16x1xf32>
    %24 = vector.broadcast %23 : vector<16x1xf32> to vector<16x128xf32>
    %25 = arith.mulf %20, %24 : vector<16x128xf32>
    %26 = vector.broadcast %6 : vector<1x128xf32> to vector<16x128xf32>
    %27 = arith.mulf %25, %26 : vector<16x128xf32>
    %28 = vector.broadcast %7 : vector<1x128xf32> to vector<16x128xf32>
    %29 = arith.addf %27, %28 : vector<16x128xf32>
    %cst_14 = arith.constant 0.000000e+00 : f32
    %30 = vector.broadcast %cst_14 : f32 to vector<16x128xf32>
    %31 = arith.maximumf %29, %30 : vector<16x128xf32>
    %c0_15 = arith.constant 0 : index
    %c0_16 = arith.constant 0 : index
    %32 = vector.load %arg6[%c0_15, %c0_16] : memref<128x32xf32, #tpu.memory_space<vmem>>, vector<128x32xf32>
    %cst_17 = arith.constant dense<0.000000e+00> : vector<16x32xf32>
    %33 = tpu.matmul %31, %32, %cst_17 {dimension_numbers = #tpu.dot_dimension_numbers<[1], [0], [0], [1], [0, 0, 1, 1], [], []>} : vector<16x128xf32>, vector<128x32xf32>, vector<16x32xf32> -> vector<16x32xf32>
    %c0_18 = arith.constant 0 : index
    %c0_19 = arith.constant 0 : index
    %34 = vector.load %arg7[%c0_18, %c0_19] : memref<1x32xf32, #tpu.memory_space<vmem>>, vector<1x32xf32>
    %35 = vector.broadcast %34 : vector<1x32xf32> to vector<16x32xf32>
    %36 = arith.addf %33, %35 : vector<16x32xf32>
    %c0_20 = arith.constant 0 : index
    %c0_21 = arith.constant 0 : index
    %37 = vector.load %arg8[%c0_20, %c0_21] : memref<1x32xf32, #tpu.memory_space<vmem>>, vector<1x32xf32>
    %c0_22 = arith.constant 0 : index
    %c0_23 = arith.constant 0 : index
    %38 = vector.load %arg9[%c0_22, %c0_23] : memref<1x32xf32, #tpu.memory_space<vmem>>, vector<1x32xf32>
    %cst_24 = arith.constant dense<0.000000e+00> : vector<16xf32>
    %39 = vector.multi_reduction <add>, %36, %cst_24 [1] : vector<16x32xf32> to vector<16xf32>
    %40 = vector.shape_cast %39 : vector<16xf32> to vector<16x1xf32>
    %cst_25 = arith.constant 3.200000e+01 : f32
    %41 = vector.broadcast %cst_25 : f32 to vector<16x1xf32>
    %42 = arith.divf %40, %41 : vector<16x1xf32>
    %43 = vector.broadcast %42 : vector<16x1xf32> to vector<16x32xf32>
    %44 = arith.subf %36, %43 : vector<16x32xf32>
    %45 = arith.mulf %44, %44 : vector<16x32xf32>
    %cst_26 = arith.constant dense<0.000000e+00> : vector<16xf32>
    %46 = vector.multi_reduction <add>, %45, %cst_26 [1] : vector<16x32xf32> to vector<16xf32>
    %47 = vector.shape_cast %46 : vector<16xf32> to vector<16x1xf32>
    %cst_27 = arith.constant 3.200000e+01 : f32
    %48 = vector.broadcast %cst_27 : f32 to vector<16x1xf32>
    %49 = arith.divf %47, %48 : vector<16x1xf32>
    %50 = vector.broadcast %42 : vector<16x1xf32> to vector<16x32xf32>
    %51 = arith.subf %36, %50 : vector<16x32xf32>
    %cst_28 = arith.constant 9.99999974E-6 : f32
    %52 = vector.broadcast %cst_28 : f32 to vector<16x1xf32>
    %53 = arith.addf %49, %52 : vector<16x1xf32>
    %54 = math.rsqrt %53 : vector<16x1xf32>
    %55 = vector.broadcast %54 : vector<16x1xf32> to vector<16x32xf32>
    %56 = arith.mulf %51, %55 : vector<16x32xf32>
    %57 = vector.broadcast %37 : vector<1x32xf32> to vector<16x32xf32>
    %58 = arith.mulf %56, %57 : vector<16x32xf32>
    %59 = vector.broadcast %38 : vector<1x32xf32> to vector<16x32xf32>
    %60 = arith.addf %58, %59 : vector<16x32xf32>
    %c0_29 = arith.constant 0 : index
    %c0_30 = arith.constant 0 : index
    %61 = vector.load %arg48[%c0_29, %c0_30] : memref<16x32xf32, #tpu.memory_space<vmem>>, vector<16x32xf32>
    tpu.vector_store %arg48[%c0_29, %c0_30], %36 {strides = array<i32>} : memref<16x32xf32, #tpu.memory_space<vmem>>, vector<16x32xf32>,
    %c0_31 = arith.constant 0 : index
    %c0_32 = arith.constant 0 : index
    %62 = vector.load %arg49[%c0_31, %c0_32] : memref<16x32xf32, #tpu.memory_space<vmem>>, vector<16x32xf32>
    tpu.vector_store %arg49[%c0_31, %c0_32], %60 {strides = array<i32>} : memref<16x32xf32, #tpu.memory_space<vmem>>, vector<16x32xf32>,
    %c0_33 = arith.constant 0 : index
    %c0_34 = arith.constant 0 : index
    %63 = vector.load %arg1[%c0_33, %c0_34] : memref<2x768xf32, #tpu.memory_space<vmem>>, vector<2x768xf32>
    %c0_35 = arith.constant 0 : index
    %c0_36 = arith.constant 0 : index
    %64 = vector.load %arg10[%c0_35, %c0_36] : memref<768x128xf32, #tpu.memory_space<vmem>>, vector<768x128xf32>
    %cst_37 = arith.constant dense<0.000000e+00> : vector<2x128xf32>
    %65 = tpu.matmul %63, %64, %cst_37 {dimension_numbers = #tpu.dot_dimension_numbers<[1], [0], [0], [1], [0, 0, 1, 1], [], []>} : vector<2x768xf32>, vector<768x128xf32>, vector<2x128xf32> -> vector<2x128xf32>
    %c0_38 = arith.constant 0 : index
    %c0_39 = arith.constant 0 : index
    %66 = vector.load %arg11[%c0_38, %c0_39] : memref<1x128xf32, #tpu.memory_space<vmem>>, vector<1x128xf32>
    %67 = vector.broadcast %66 : vector<1x128xf32> to vector<2x128xf32>
    %68 = arith.addf %65, %67 : vector<2x128xf32>
    %c0_40 = arith.constant 0 : index
    %c0_41 = arith.constant 0 : index
    %69 = vector.load %arg12[%c0_40, %c0_41] : memref<1x128xf32, #tpu.memory_space<vmem>>, vector<1x128xf32>
    %c0_42 = arith.constant 0 : index
    %c0_43 = arith.constant 0 : index
    %70 = vector.load %arg13[%c0_42, %c0_43] : memref<1x128xf32, #tpu.memory_space<vmem>>, vector<1x128xf32>
    %cst_44 = arith.constant dense<0.000000e+00> : vector<2xf32>
    %71 = vector.multi_reduction <add>, %68, %cst_44 [1] : vector<2x128xf32> to vector<2xf32>
    %72 = vector.shape_cast %71 : vector<2xf32> to vector<2x1xf32>
    %cst_45 = arith.constant 1.280000e+02 : f32
    %73 = vector.broadcast %cst_45 : f32 to vector<2x1xf32>
    %74 = arith.divf %72, %73 : vector<2x1xf32>
    %75 = vector.broadcast %74 : vector<2x1xf32> to vector<2x128xf32>
    %76 = arith.subf %68, %75 : vector<2x128xf32>
    %77 = arith.mulf %76, %76 : vector<2x128xf32>
    %cst_46 = arith.constant dense<0.000000e+00> : vector<2xf32>
    %78 = vector.multi_reduction <add>, %77, %cst_46 [1] : vector<2x128xf32> to vector<2xf32>
    %79 = vector.shape_cast %78 : vector<2xf32> to vector<2x1xf32>
    %cst_47 = arith.constant 1.280000e+02 : f32
    %80 = vector.broadcast %cst_47 : f32 to vector<2x1xf32>
    %81 = arith.divf %79, %80 : vector<2x1xf32>
    %82 = vector.broadcast %74 : vector<2x1xf32> to vector<2x128xf32>
    %83 = arith.subf %68, %82 : vector<2x128xf32>
    %cst_48 = arith.constant 9.99999974E-6 : f32
    %84 = vector.broadcast %cst_48 : f32 to vector<2x1xf32>
    %85 = arith.addf %81, %84 : vector<2x1xf32>
    %86 = math.rsqrt %85 : vector<2x1xf32>
    %87 = vector.broadcast %86 : vector<2x1xf32> to vector<2x128xf32>
    %88 = arith.mulf %83, %87 : vector<2x128xf32>
    %89 = vector.broadcast %69 : vector<1x128xf32> to vector<2x128xf32>
    %90 = arith.mulf %88, %89 : vector<2x128xf32>
    %91 = vector.broadcast %70 : vector<1x128xf32> to vector<2x128xf32>
    %92 = arith.addf %90, %91 : vector<2x128xf32>
    %cst_49 = arith.constant 0.000000e+00 : f32
    %93 = vector.broadcast %cst_49 : f32 to vector<2x128xf32>
    %94 = arith.maximumf %92, %93 : vector<2x128xf32>
    %c0_50 = arith.constant 0 : index
    %c0_51 = arith.constant 0 : index
    %95 = vector.load %arg14[%c0_50, %c0_51] : memref<128x64xf32, #tpu.memory_space<vmem>>, vector<128x64xf32>
    %cst_52 = arith.constant dense<0.000000e+00> : vector<2x64xf32>
    %96 = tpu.matmul %94, %95, %cst_52 {dimension_numbers = #tpu.dot_dimension_numbers<[1], [0], [0], [1], [0, 0, 1, 1], [], []>} : vector<2x128xf32>, vector<128x64xf32>, vector<2x64xf32> -> vector<2x64xf32>
    %c0_53 = arith.constant 0 : index
    %c0_54 = arith.constant 0 : index
    %97 = vector.load %arg15[%c0_53, %c0_54] : memref<1x64xf32, #tpu.memory_space<vmem>>, vector<1x64xf32>
    %98 = vector.broadcast %97 : vector<1x64xf32> to vector<2x64xf32>
    %99 = arith.addf %96, %98 : vector<2x64xf32>
    %c0_55 = arith.constant 0 : index
    %c0_56 = arith.constant 0 : index
    %100 = vector.load %arg50[%c0_55, %c0_56] : memref<2x64xf32, #tpu.memory_space<vmem>>, vector<2x64xf32>
    tpu.vector_store %arg50[%c0_55, %c0_56], %99 {strides = array<i32>} : memref<2x64xf32, #tpu.memory_space<vmem>>, vector<2x64xf32>,
    %c0_57 = arith.constant 0 : index
    %c0_58 = arith.constant 0 : index
    %101 = vector.load %arg16[%c0_57, %c0_58] : memref<64x32xf32, #tpu.memory_space<vmem>>, vector<64x32xf32>
    %cst_59 = arith.constant dense<0.000000e+00> : vector<2x32xf32>
    %102 = tpu.matmul %99, %101, %cst_59 {dimension_numbers = #tpu.dot_dimension_numbers<[1], [0], [0], [1], [0, 0, 1, 1], [], []>} : vector<2x64xf32>, vector<64x32xf32>, vector<2x32xf32> -> vector<2x32xf32>
    %c0_60 = arith.constant 0 : index
    %c0_61 = arith.constant 0 : index
    %103 = vector.load %arg17[%c0_60, %c0_61] : memref<1x32xf32, #tpu.memory_space<vmem>>, vector<1x32xf32>
    %104 = vector.broadcast %103 : vector<1x32xf32> to vector<2x32xf32>
    %105 = arith.addf %102, %104 : vector<2x32xf32>
    %c0_62 = arith.constant 0 : index
    %c0_63 = arith.constant 0 : index
    %106 = vector.load %arg18[%c0_62, %c0_63] : memref<32x32xf32, #tpu.memory_space<vmem>>, vector<32x32xf32>
    %cst_64 = arith.constant dense<0.000000e+00> : vector<2x32xf32>
    %107 = tpu.matmul %105, %106, %cst_64 {dimension_numbers = #tpu.dot_dimension_numbers<[1], [0], [0], [1], [0, 0, 1, 1], [], []>} : vector<2x32xf32>, vector<32x32xf32>, vector<2x32xf32> -> vector<2x32xf32>
    %c0_65 = arith.constant 0 : index
    %c0_66 = arith.constant 0 : index
    %108 = vector.load %arg19[%c0_65, %c0_66] : memref<1x32xf32, #tpu.memory_space<vmem>>, vector<1x32xf32>
    %109 = vector.broadcast %108 : vector<1x32xf32> to vector<2x32xf32>
    %110 = arith.addf %107, %109 : vector<2x32xf32>
    %c0_67 = arith.constant 0 : index
    %c0_68 = arith.constant 0 : index
    %111 = vector.load %arg20[%c0_67, %c0_68] : memref<32x4xf32, #tpu.memory_space<vmem>>, vector<32x4xf32>
    %c0_69 = arith.constant 0 : index
    %c0_70 = arith.constant 0 : index
    %112 = vector.load %arg21[%c0_69, %c0_70] : memref<4x32xf32, #tpu.memory_space<vmem>>, vector<4x32xf32>
    %c0_71 = arith.constant 0 : index
    %c0_72 = arith.constant 0 : index
    %113 = vector.load %arg38[%c0_71, %c0_72] : memref<64x64xf32, #tpu.memory_space<vmem>>, vector<64x64xf32>
    %114 = vector.extract_strided_slice %113 {offsets = [0, 0], sizes = [32, 64], strides = [1, 1]} : vector<64x64xf32> to vector<32x64xf32>
    %115 = vector.extract_strided_slice %113 {offsets = [32, 0], sizes = [32, 64], strides = [1, 1]} : vector<64x64xf32> to vector<32x64xf32>
    %116 = vector.extract_strided_slice %60 {offsets = [0, 0], sizes = [8, 32], strides = [1, 1]} : vector<16x32xf32> to vector<8x32xf32>
    %117 = vector.extract_strided_slice %99 {offsets = [0, 0], sizes = [1, 64], strides = [1, 1]} : vector<2x64xf32> to vector<1x64xf32>
    %c0_73 = arith.constant 0 : index
    %c0_74 = arith.constant 0 : index
    %118 = vector.load %arg22[%c0_73, %c0_74] : memref<64x32xf32, #tpu.memory_space<vmem>>, vector<64x32xf32>
    %cst_75 = arith.constant dense<0.000000e+00> : vector<1x32xf32>
    %119 = tpu.matmul %117, %118, %cst_75 {dimension_numbers = #tpu.dot_dimension_numbers<[1], [0], [0], [1], [0, 0, 1, 1], [], []>} : vector<1x64xf32>, vector<64x32xf32>, vector<1x32xf32> -> vector<1x32xf32>
    %c0_76 = arith.constant 0 : index
    %c0_77 = arith.constant 0 : index
    %120 = vector.load %arg23[%c0_76, %c0_77] : memref<1x32xf32, #tpu.memory_space<vmem>>, vector<1x32xf32>
    %121 = arith.addf %119, %120 : vector<1x32xf32>
    %c0_78 = arith.constant 0 : index
    %c0_79 = arith.constant 0 : index
    %122 = vector.load %arg24[%c0_78, %c0_79] : memref<32x32xf32, #tpu.memory_space<vmem>>, vector<32x32xf32>
    %cst_80 = arith.constant dense<0.000000e+00> : vector<8x32xf32>
    %123 = tpu.matmul %116, %122, %cst_80 {dimension_numbers = #tpu.dot_dimension_numbers<[1], [0], [0], [1], [0, 0, 1, 1], [], []>} : vector<8x32xf32>, vector<32x32xf32>, vector<8x32xf32> -> vector<8x32xf32>
    %c0_81 = arith.constant 0 : index
    %c0_82 = arith.constant 0 : index
    %124 = vector.load %arg25[%c0_81, %c0_82] : memref<1x32xf32, #tpu.memory_space<vmem>>, vector<1x32xf32>
    %125 = vector.broadcast %124 : vector<1x32xf32> to vector<8x32xf32>
    %126 = arith.addf %123, %125 : vector<8x32xf32>
    %c0_83 = arith.constant 0 : index
    %c0_84 = arith.constant 0 : index
    %127 = vector.load %arg26[%c0_83, %c0_84] : memref<32x32xf32, #tpu.memory_space<vmem>>, vector<32x32xf32>
    %cst_85 = arith.constant dense<0.000000e+00> : vector<8x32xf32>
    %128 = tpu.matmul %116, %127, %cst_85 {dimension_numbers = #tpu.dot_dimension_numbers<[1], [0], [0], [1], [0, 0, 1, 1], [], []>} : vector<8x32xf32>, vector<32x32xf32>, vector<8x32xf32> -> vector<8x32xf32>
    %c0_86 = arith.constant 0 : index
    %c0_87 = arith.constant 0 : index
    %129 = vector.load %arg27[%c0_86, %c0_87] : memref<1x32xf32, #tpu.memory_space<vmem>>, vector<1x32xf32>
    %130 = vector.broadcast %129 : vector<1x32xf32> to vector<8x32xf32>
    %131 = arith.addf %128, %130 : vector<8x32xf32>
    %132 = vector.broadcast %121 : vector<1x32xf32> to vector<8x32xf32>
    %133 = arith.mulf %132, %126 : vector<8x32xf32>
    %cst_88 = arith.constant dense<0.000000e+00> : vector<8x4xf32>
    %134 = tpu.matmul %133, %111, %cst_88 {dimension_numbers = #tpu.dot_dimension_numbers<[1], [0], [0], [1], [0, 0, 1, 1], [], []>} : vector<8x32xf32>, vector<32x4xf32>, vector<8x4xf32> -> vector<8x4xf32>
    %cst_89 = arith.constant 0.353553385 : f32
    %135 = vector.broadcast %cst_89 : f32 to vector<8x4xf32>
    %136 = arith.mulf %134, %135 : vector<8x4xf32>
    %cst_90 = arith.constant dense<0xFF800000> : vector<4xf32>
    %137 = vector.multi_reduction <maximumf>, %136, %cst_90 [0] : vector<8x4xf32> to vector<4xf32>
    %138 = vector.shape_cast %137 : vector<4xf32> to vector<1x4xf32>
    %139 = vector.broadcast %138 : vector<1x4xf32> to vector<8x4xf32>
    %140 = arith.subf %136, %139 : vector<8x4xf32>
    %141 = math.exp %140 : vector<8x4xf32>
    %cst_91 = arith.constant dense<0.000000e+00> : vector<4xf32>
    %142 = vector.multi_reduction <add>, %141, %cst_91 [0] : vector<8x4xf32> to vector<4xf32>
    %143 = vector.shape_cast %142 : vector<4xf32> to vector<1x4xf32>
    %144 = vector.broadcast %143 : vector<1x4xf32> to vector<8x4xf32>
    %145 = arith.divf %141, %144 : vector<8x4xf32>
    %cst_92 = arith.constant dense<0.000000e+00> : vector<8x32xf32>
    %146 = tpu.matmul %145, %112, %cst_92 {dimension_numbers = #tpu.dot_dimension_numbers<[1], [0], [0], [1], [0, 0, 1, 1], [], []>} : vector<8x4xf32>, vector<4x32xf32>, vector<8x32xf32> -> vector<8x32xf32>
    %147 = arith.mulf %146, %131 : vector<8x32xf32>
    %cst_93 = arith.constant dense<0.000000e+00> : vector<32xf32>
    %148 = vector.multi_reduction <add>, %147, %cst_93 [0] : vector<8x32xf32> to vector<32xf32>
    %149 = vector.shape_cast %148 : vector<32xf32> to vector<1x32xf32>
    %c0_94 = arith.constant 0 : index
    %c0_95 = arith.constant 0 : index
    %150 = vector.load %arg28[%c0_94, %c0_95] : memref<32x32xf32, #tpu.memory_space<vmem>>, vector<32x32xf32>
    %cst_96 = arith.constant dense<0.000000e+00> : vector<1x32xf32>
    %151 = tpu.matmul %149, %150, %cst_96 {dimension_numbers = #tpu.dot_dimension_numbers<[1], [0], [0], [1], [0, 0, 1, 1], [], []>} : vector<1x32xf32>, vector<32x32xf32>, vector<1x32xf32> -> vector<1x32xf32>
    %c0_97 = arith.constant 0 : index
    %c0_98 = arith.constant 0 : index
    %152 = vector.load %arg29[%c0_97, %c0_98] : memref<1x32xf32, #tpu.memory_space<vmem>>, vector<1x32xf32>
    %153 = arith.addf %151, %152 : vector<1x32xf32>
    %c0_99 = arith.constant 0 : index
    %c0_100 = arith.constant 0 : index
    %154 = vector.load %arg30[%c0_99, %c0_100] : memref<32x32xf32, #tpu.memory_space<vmem>>, vector<32x32xf32>
    %cst_101 = arith.constant dense<0.000000e+00> : vector<1x32xf32>
    %155 = tpu.matmul %153, %154, %cst_101 {dimension_numbers = #tpu.dot_dimension_numbers<[1], [0], [0], [1], [0, 0, 1, 1], [], []>} : vector<1x32xf32>, vector<32x32xf32>, vector<1x32xf32> -> vector<1x32xf32>
    %c0_102 = arith.constant 0 : index
    %c0_103 = arith.constant 0 : index
    %156 = vector.load %arg31[%c0_102, %c0_103] : memref<1x32xf32, #tpu.memory_space<vmem>>, vector<1x32xf32>
    %157 = arith.addf %155, %156 : vector<1x32xf32>
    %c0_104 = arith.constant 0 : index
    %c0_105 = arith.constant 0 : index
    %158 = vector.load %arg32[%c0_104, %c0_105] : memref<32x32xf32, #tpu.memory_space<vmem>>, vector<32x32xf32>
    %cst_106 = arith.constant dense<0.000000e+00> : vector<8x32xf32>
    %159 = tpu.matmul %116, %158, %cst_106 {dimension_numbers = #tpu.dot_dimension_numbers<[1], [0], [0], [1], [0, 0, 1, 1], [], []>} : vector<8x32xf32>, vector<32x32xf32>, vector<8x32xf32> -> vector<8x32xf32>
    %c0_107 = arith.constant 0 : index
    %c0_108 = arith.constant 0 : index
    %160 = vector.load %arg33[%c0_107, %c0_108] : memref<1x32xf32, #tpu.memory_space<vmem>>, vector<1x32xf32>
    %161 = vector.broadcast %160 : vector<1x32xf32> to vector<8x32xf32>
    %162 = arith.addf %159, %161 : vector<8x32xf32>
    %c0_109 = arith.constant 0 : index
    %c0_110 = arith.constant 0 : index
    %163 = vector.load %arg34[%c0_109, %c0_110] : memref<32x32xf32, #tpu.memory_space<vmem>>, vector<32x32xf32>
    %cst_111 = arith.constant dense<0.000000e+00> : vector<8x32xf32>
    %164 = tpu.matmul %116, %163, %cst_111 {dimension_numbers = #tpu.dot_dimension_numbers<[1], [0], [0], [1], [0, 0, 1, 1], [], []>} : vector<8x32xf32>, vector<32x32xf32>, vector<8x32xf32> -> vector<8x32xf32>
    %c0_112 = arith.constant 0 : index
    %c0_113 = arith.constant 0 : index
    %165 = vector.load %arg35[%c0_112, %c0_113] : memref<1x32xf32, #tpu.memory_space<vmem>>, vector<1x32xf32>
    %166 = vector.broadcast %165 : vector<1x32xf32> to vector<8x32xf32>
    %167 = arith.addf %164, %166 : vector<8x32xf32>
    %168 = vector.broadcast %157 : vector<1x32xf32> to vector<8x32xf32>
    %169 = arith.mulf %168, %162 : vector<8x32xf32>
    %cst_114 = arith.constant dense<0.000000e+00> : vector<8x4xf32>
    %170 = tpu.matmul %169, %111, %cst_114 {dimension_numbers = #tpu.dot_dimension_numbers<[1], [0], [0], [1], [0, 0, 1, 1], [], []>} : vector<8x32xf32>, vector<32x4xf32>, vector<8x4xf32> -> vector<8x4xf32>
    %cst_115 = arith.constant 0.353553385 : f32
    %171 = vector.broadcast %cst_115 : f32 to vector<8x4xf32>
    %172 = arith.mulf %170, %171 : vector<8x4xf32>
    %cst_116 = arith.constant dense<0xFF800000> : vector<4xf32>
    %173 = vector.multi_reduction <maximumf>, %172, %cst_116 [0] : vector<8x4xf32> to vector<4xf32>
    %174 = vector.shape_cast %173 : vector<4xf32> to vector<1x4xf32>
    %175 = vector.broadcast %174 : vector<1x4xf32> to vector<8x4xf32>
    %176 = arith.subf %172, %175 : vector<8x4xf32>
    %177 = math.exp %176 : vector<8x4xf32>
    %cst_117 = arith.constant dense<0.000000e+00> : vector<4xf32>
    %178 = vector.multi_reduction <add>, %177, %cst_117 [0] : vector<8x4xf32> to vector<4xf32>
    %179 = vector.shape_cast %178 : vector<4xf32> to vector<1x4xf32>
    %180 = vector.broadcast %179 : vector<1x4xf32> to vector<8x4xf32>
    %181 = arith.divf %177, %180 : vector<8x4xf32>
    %c0_118 = arith.constant 0 : index
    %c0_119 = arith.constant 0 : index
    %182 = vector.load %arg51[%c0_118, %c0_119] : memref<16x4xf32, #tpu.memory_space<vmem>>, vector<8x4xf32>
    tpu.vector_store %arg51[%c0_118, %c0_119], %181 {strides = array<i32>} : memref<16x4xf32, #tpu.memory_space<vmem>>, vector<8x4xf32>,
    %cst_120 = arith.constant dense<0.000000e+00> : vector<8x32xf32>
    %183 = tpu.matmul %181, %112, %cst_120 {dimension_numbers = #tpu.dot_dimension_numbers<[1], [0], [0], [1], [0, 0, 1, 1], [], []>} : vector<8x4xf32>, vector<4x32xf32>, vector<8x32xf32> -> vector<8x32xf32>
    %184 = arith.mulf %183, %167 : vector<8x32xf32>
    %cst_121 = arith.constant dense<0.000000e+00> : vector<32xf32>
    %185 = vector.multi_reduction <add>, %184, %cst_121 [0] : vector<8x32xf32> to vector<32xf32>
    %186 = vector.shape_cast %185 : vector<32xf32> to vector<1x32xf32>
    %c0_122 = arith.constant 0 : index
    %c0_123 = arith.constant 0 : index
    %187 = vector.load %arg36[%c0_122, %c0_123] : memref<32x32xf32, #tpu.memory_space<vmem>>, vector<32x32xf32>
    %cst_124 = arith.constant dense<0.000000e+00> : vector<1x32xf32>
    %188 = tpu.matmul %186, %187, %cst_124 {dimension_numbers = #tpu.dot_dimension_numbers<[1], [0], [0], [1], [0, 0, 1, 1], [], []>} : vector<1x32xf32>, vector<32x32xf32>, vector<1x32xf32> -> vector<1x32xf32>
    %c0_125 = arith.constant 0 : index
    %c0_126 = arith.constant 0 : index
    %189 = vector.load %arg37[%c0_125, %c0_126] : memref<1x32xf32, #tpu.memory_space<vmem>>, vector<1x32xf32>
    %190 = arith.addf %188, %189 : vector<1x32xf32>
    %191 = vector.extract_strided_slice %110 {offsets = [0, 0], sizes = [1, 32], strides = [1, 1]} : vector<2x32xf32> to vector<1x32xf32>
    %cst_127 = arith.constant dense<0.000000e+00> : vector<1x64xf32>
    %192 = tpu.matmul %191, %114, %cst_127 {dimension_numbers = #tpu.dot_dimension_numbers<[1], [0], [0], [1], [0, 0, 1, 1], [], []>} : vector<1x32xf32>, vector<32x64xf32>, vector<1x64xf32> -> vector<1x64xf32>
    %cst_128 = arith.constant dense<0.000000e+00> : vector<1x64xf32>
    %193 = tpu.matmul %190, %115, %cst_128 {dimension_numbers = #tpu.dot_dimension_numbers<[1], [0], [0], [1], [0, 0, 1, 1], [], []>} : vector<1x32xf32>, vector<32x64xf32>, vector<1x64xf32> -> vector<1x64xf32>
    %194 = arith.addf %192, %193 : vector<1x64xf32>
    %c0_129 = arith.constant 0 : index
    %c0_130 = arith.constant 0 : index
    %195 = vector.load %arg39[%c0_129, %c0_130] : memref<1x64xf32, #tpu.memory_space<vmem>>, vector<1x64xf32>
    %196 = arith.addf %194, %195 : vector<1x64xf32>
    %c0_131 = arith.constant 0 : index
    %c0_132 = arith.constant 0 : index
    %197 = vector.load %arg40[%c0_131, %c0_132] : memref<1x64xf32, #tpu.memory_space<vmem>>, vector<1x64xf32>
    %198 = arith.mulf %196, %197 : vector<1x64xf32>
    %c0_133 = arith.constant 0 : index
    %c0_134 = arith.constant 0 : index
    %199 = vector.load %arg41[%c0_133, %c0_134] : memref<1x64xf32, #tpu.memory_space<vmem>>, vector<1x64xf32>
    %200 = arith.addf %198, %199 : vector<1x64xf32>
    %cst_135 = arith.constant 0.000000e+00 : f32
    %201 = vector.broadcast %cst_135 : f32 to vector<1x64xf32>
    %202 = arith.maximumf %200, %201 : vector<1x64xf32>
    %c0_136 = arith.constant 0 : index
    %c0_137 = arith.constant 0 : index
    %203 = vector.load %arg42[%c0_136, %c0_137] : memref<64x32xf32, #tpu.memory_space<vmem>>, vector<64x32xf32>
    %cst_138 = arith.constant dense<0.000000e+00> : vector<1x32xf32>
    %204 = tpu.matmul %202, %203, %cst_138 {dimension_numbers = #tpu.dot_dimension_numbers<[1], [0], [0], [1], [0, 0, 1, 1], [], []>} : vector<1x64xf32>, vector<64x32xf32>, vector<1x32xf32> -> vector<1x32xf32>
    %c0_139 = arith.constant 0 : index
    %c0_140 = arith.constant 0 : index
    %205 = vector.load %arg43[%c0_139, %c0_140] : memref<1x32xf32, #tpu.memory_space<vmem>>, vector<1x32xf32>
    %206 = arith.addf %204, %205 : vector<1x32xf32>
    %c0_141 = arith.constant 0 : index
    %c0_142 = arith.constant 0 : index
    %207 = vector.load %arg44[%c0_141, %c0_142] : memref<1x32xf32, #tpu.memory_space<vmem>>, vector<1x32xf32>
    %208 = arith.mulf %206, %207 : vector<1x32xf32>
    %c0_143 = arith.constant 0 : index
    %c0_144 = arith.constant 0 : index
    %209 = vector.load %arg45[%c0_143, %c0_144] : memref<1x32xf32, #tpu.memory_space<vmem>>, vector<1x32xf32>
    %210 = arith.addf %208, %209 : vector<1x32xf32>
    %cst_145 = arith.constant 0.000000e+00 : f32
    %211 = vector.broadcast %cst_145 : f32 to vector<1x32xf32>
    %212 = arith.maximumf %210, %211 : vector<1x32xf32>
    %c0_146 = arith.constant 0 : index
    %c0_147 = arith.constant 0 : index
    %213 = vector.load %arg46[%c0_146, %c0_147] : memref<32x1xf32, #tpu.memory_space<vmem>>, vector<32x1xf32>
    %cst_148 = arith.constant dense<0.000000e+00> : vector<1x1xf32>
    %214 = tpu.matmul %212, %213, %cst_148 {dimension_numbers = #tpu.dot_dimension_numbers<[1], [0], [0], [1], [0, 0, 1, 1], [], []>} : vector<1x32xf32>, vector<32x1xf32>, vector<1x1xf32> -> vector<1x1xf32>
    %c0_149 = arith.constant 0 : index
    %c0_150 = arith.constant 0 : index
    %215 = vector.load %arg47[%c0_149, %c0_150] : memref<1x1xf32, #tpu.memory_space<vmem>>, vector<1x1xf32>
    %216 = arith.addf %214, %215 : vector<1x1xf32>
    %c0_151 = arith.constant 0 : index
    %c0_152 = arith.constant 0 : index
    %217 = vector.load %arg52[%c0_151, %c0_152] : memref<2x1xf32, #tpu.memory_space<vmem>>, vector<1x1xf32>
    tpu.vector_store %arg52[%c0_151, %c0_152], %216 {strides = array<i32>} : memref<2x1xf32, #tpu.memory_space<vmem>>, vector<1x1xf32>,
    %218 = vector.extract_strided_slice %60 {offsets = [8, 0], sizes = [8, 32], strides = [1, 1]} : vector<16x32xf32> to vector<8x32xf32>
    %219 = vector.extract_strided_slice %99 {offsets = [1, 0], sizes = [1, 64], strides = [1, 1]} : vector<2x64xf32> to vector<1x64xf32>
    %c0_153 = arith.constant 0 : index
    %c0_154 = arith.constant 0 : index
    %220 = vector.load %arg22[%c0_153, %c0_154] : memref<64x32xf32, #tpu.memory_space<vmem>>, vector<64x32xf32>
    %cst_155 = arith.constant dense<0.000000e+00> : vector<1x32xf32>
    %221 = tpu.matmul %219, %220, %cst_155 {dimension_numbers = #tpu.dot_dimension_numbers<[1], [0], [0], [1], [0, 0, 1, 1], [], []>} : vector<1x64xf32>, vector<64x32xf32>, vector<1x32xf32> -> vector<1x32xf32>
    %c0_156 = arith.constant 0 : index
    %c0_157 = arith.constant 0 : index
    %222 = vector.load %arg23[%c0_156, %c0_157] : memref<1x32xf32, #tpu.memory_space<vmem>>, vector<1x32xf32>
    %223 = arith.addf %221, %222 : vector<1x32xf32>
    %c0_158 = arith.constant 0 : index
    %c0_159 = arith.constant 0 : index
    %224 = vector.load %arg24[%c0_158, %c0_159] : memref<32x32xf32, #tpu.memory_space<vmem>>, vector<32x32xf32>
    %cst_160 = arith.constant dense<0.000000e+00> : vector<8x32xf32>
    %225 = tpu.matmul %218, %224, %cst_160 {dimension_numbers = #tpu.dot_dimension_numbers<[1], [0], [0], [1], [0, 0, 1, 1], [], []>} : vector<8x32xf32>, vector<32x32xf32>, vector<8x32xf32> -> vector<8x32xf32>
    %c0_161 = arith.constant 0 : index
    %c0_162 = arith.constant 0 : index
    %226 = vector.load %arg25[%c0_161, %c0_162] : memref<1x32xf32, #tpu.memory_space<vmem>>, vector<1x32xf32>
    %227 = vector.broadcast %226 : vector<1x32xf32> to vector<8x32xf32>
    %228 = arith.addf %225, %227 : vector<8x32xf32>
    %c0_163 = arith.constant 0 : index
    %c0_164 = arith.constant 0 : index
    %229 = vector.load %arg26[%c0_163, %c0_164] : memref<32x32xf32, #tpu.memory_space<vmem>>, vector<32x32xf32>
    %cst_165 = arith.constant dense<0.000000e+00> : vector<8x32xf32>
    %230 = tpu.matmul %218, %229, %cst_165 {dimension_numbers = #tpu.dot_dimension_numbers<[1], [0], [0], [1], [0, 0, 1, 1], [], []>} : vector<8x32xf32>, vector<32x32xf32>, vector<8x32xf32> -> vector<8x32xf32>
    %c0_166 = arith.constant 0 : index
    %c0_167 = arith.constant 0 : index
    %231 = vector.load %arg27[%c0_166, %c0_167] : memref<1x32xf32, #tpu.memory_space<vmem>>, vector<1x32xf32>
    %232 = vector.broadcast %231 : vector<1x32xf32> to vector<8x32xf32>
    %233 = arith.addf %230, %232 : vector<8x32xf32>
    %234 = vector.broadcast %223 : vector<1x32xf32> to vector<8x32xf32>
    %235 = arith.mulf %234, %228 : vector<8x32xf32>
    %cst_168 = arith.constant dense<0.000000e+00> : vector<8x4xf32>
    %236 = tpu.matmul %235, %111, %cst_168 {dimension_numbers = #tpu.dot_dimension_numbers<[1], [0], [0], [1], [0, 0, 1, 1], [], []>} : vector<8x32xf32>, vector<32x4xf32>, vector<8x4xf32> -> vector<8x4xf32>
    %cst_169 = arith.constant 0.353553385 : f32
    %237 = vector.broadcast %cst_169 : f32 to vector<8x4xf32>
    %238 = arith.mulf %236, %237 : vector<8x4xf32>
    %cst_170 = arith.constant dense<0xFF800000> : vector<4xf32>
    %239 = vector.multi_reduction <maximumf>, %238, %cst_170 [0] : vector<8x4xf32> to vector<4xf32>
    %240 = vector.shape_cast %239 : vector<4xf32> to vector<1x4xf32>
    %241 = vector.broadcast %240 : vector<1x4xf32> to vector<8x4xf32>
    %242 = arith.subf %238, %241 : vector<8x4xf32>
    %243 = math.exp %242 : vector<8x4xf32>
    %cst_171 = arith.constant dense<0.000000e+00> : vector<4xf32>
    %244 = vector.multi_reduction <add>, %243, %cst_171 [0] : vector<8x4xf32> to vector<4xf32>
    %245 = vector.shape_cast %244 : vector<4xf32> to vector<1x4xf32>
    %246 = vector.broadcast %245 : vector<1x4xf32> to vector<8x4xf32>
    %247 = arith.divf %243, %246 : vector<8x4xf32>
    %cst_172 = arith.constant dense<0.000000e+00> : vector<8x32xf32>
    %248 = tpu.matmul %247, %112, %cst_172 {dimension_numbers = #tpu.dot_dimension_numbers<[1], [0], [0], [1], [0, 0, 1, 1], [], []>} : vector<8x4xf32>, vector<4x32xf32>, vector<8x32xf32> -> vector<8x32xf32>
    %249 = arith.mulf %248, %233 : vector<8x32xf32>
    %cst_173 = arith.constant dense<0.000000e+00> : vector<32xf32>
    %250 = vector.multi_reduction <add>, %249, %cst_173 [0] : vector<8x32xf32> to vector<32xf32>
    %251 = vector.shape_cast %250 : vector<32xf32> to vector<1x32xf32>
    %c0_174 = arith.constant 0 : index
    %c0_175 = arith.constant 0 : index
    %252 = vector.load %arg28[%c0_174, %c0_175] : memref<32x32xf32, #tpu.memory_space<vmem>>, vector<32x32xf32>
    %cst_176 = arith.constant dense<0.000000e+00> : vector<1x32xf32>
    %253 = tpu.matmul %251, %252, %cst_176 {dimension_numbers = #tpu.dot_dimension_numbers<[1], [0], [0], [1], [0, 0, 1, 1], [], []>} : vector<1x32xf32>, vector<32x32xf32>, vector<1x32xf32> -> vector<1x32xf32>
    %c0_177 = arith.constant 0 : index
    %c0_178 = arith.constant 0 : index
    %254 = vector.load %arg29[%c0_177, %c0_178] : memref<1x32xf32, #tpu.memory_space<vmem>>, vector<1x32xf32>
    %255 = arith.addf %253, %254 : vector<1x32xf32>
    %c0_179 = arith.constant 0 : index
    %c0_180 = arith.constant 0 : index
    %256 = vector.load %arg30[%c0_179, %c0_180] : memref<32x32xf32, #tpu.memory_space<vmem>>, vector<32x32xf32>
    %cst_181 = arith.constant dense<0.000000e+00> : vector<1x32xf32>
    %257 = tpu.matmul %255, %256, %cst_181 {dimension_numbers = #tpu.dot_dimension_numbers<[1], [0], [0], [1], [0, 0, 1, 1], [], []>} : vector<1x32xf32>, vector<32x32xf32>, vector<1x32xf32> -> vector<1x32xf32>
    %c0_182 = arith.constant 0 : index
    %c0_183 = arith.constant 0 : index
    %258 = vector.load %arg31[%c0_182, %c0_183] : memref<1x32xf32, #tpu.memory_space<vmem>>, vector<1x32xf32>
    %259 = arith.addf %257, %258 : vector<1x32xf32>
    %c0_184 = arith.constant 0 : index
    %c0_185 = arith.constant 0 : index
    %260 = vector.load %arg32[%c0_184, %c0_185] : memref<32x32xf32, #tpu.memory_space<vmem>>, vector<32x32xf32>
    %cst_186 = arith.constant dense<0.000000e+00> : vector<8x32xf32>
    %261 = tpu.matmul %218, %260, %cst_186 {dimension_numbers = #tpu.dot_dimension_numbers<[1], [0], [0], [1], [0, 0, 1, 1], [], []>} : vector<8x32xf32>, vector<32x32xf32>, vector<8x32xf32> -> vector<8x32xf32>
    %c0_187 = arith.constant 0 : index
    %c0_188 = arith.constant 0 : index
    %262 = vector.load %arg33[%c0_187, %c0_188] : memref<1x32xf32, #tpu.memory_space<vmem>>, vector<1x32xf32>
    %263 = vector.broadcast %262 : vector<1x32xf32> to vector<8x32xf32>
    %264 = arith.addf %261, %263 : vector<8x32xf32>
    %c0_189 = arith.constant 0 : index
    %c0_190 = arith.constant 0 : index
    %265 = vector.load %arg34[%c0_189, %c0_190] : memref<32x32xf32, #tpu.memory_space<vmem>>, vector<32x32xf32>
    %cst_191 = arith.constant dense<0.000000e+00> : vector<8x32xf32>
    %266 = tpu.matmul %218, %265, %cst_191 {dimension_numbers = #tpu.dot_dimension_numbers<[1], [0], [0], [1], [0, 0, 1, 1], [], []>} : vector<8x32xf32>, vector<32x32xf32>, vector<8x32xf32> -> vector<8x32xf32>
    %c0_192 = arith.constant 0 : index
    %c0_193 = arith.constant 0 : index
    %267 = vector.load %arg35[%c0_192, %c0_193] : memref<1x32xf32, #tpu.memory_space<vmem>>, vector<1x32xf32>
    %268 = vector.broadcast %267 : vector<1x32xf32> to vector<8x32xf32>
    %269 = arith.addf %266, %268 : vector<8x32xf32>
    %270 = vector.broadcast %259 : vector<1x32xf32> to vector<8x32xf32>
    %271 = arith.mulf %270, %264 : vector<8x32xf32>
    %cst_194 = arith.constant dense<0.000000e+00> : vector<8x4xf32>
    %272 = tpu.matmul %271, %111, %cst_194 {dimension_numbers = #tpu.dot_dimension_numbers<[1], [0], [0], [1], [0, 0, 1, 1], [], []>} : vector<8x32xf32>, vector<32x4xf32>, vector<8x4xf32> -> vector<8x4xf32>
    %cst_195 = arith.constant 0.353553385 : f32
    %273 = vector.broadcast %cst_195 : f32 to vector<8x4xf32>
    %274 = arith.mulf %272, %273 : vector<8x4xf32>
    %cst_196 = arith.constant dense<0xFF800000> : vector<4xf32>
    %275 = vector.multi_reduction <maximumf>, %274, %cst_196 [0] : vector<8x4xf32> to vector<4xf32>
    %276 = vector.shape_cast %275 : vector<4xf32> to vector<1x4xf32>
    %277 = vector.broadcast %276 : vector<1x4xf32> to vector<8x4xf32>
    %278 = arith.subf %274, %277 : vector<8x4xf32>
    %279 = math.exp %278 : vector<8x4xf32>
    %cst_197 = arith.constant dense<0.000000e+00> : vector<4xf32>
    %280 = vector.multi_reduction <add>, %279, %cst_197 [0] : vector<8x4xf32> to vector<4xf32>
    %281 = vector.shape_cast %280 : vector<4xf32> to vector<1x4xf32>
    %282 = vector.broadcast %281 : vector<1x4xf32> to vector<8x4xf32>
    %283 = arith.divf %279, %282 : vector<8x4xf32>
    %c8 = arith.constant 8 : index
    %c0_198 = arith.constant 0 : index
    %284 = vector.load %arg51[%c8, %c0_198] : memref<16x4xf32, #tpu.memory_space<vmem>>, vector<8x4xf32>
    tpu.vector_store %arg51[%c8, %c0_198], %283 {strides = array<i32>} : memref<16x4xf32, #tpu.memory_space<vmem>>, vector<8x4xf32>,
    %cst_199 = arith.constant dense<0.000000e+00> : vector<8x32xf32>
    %285 = tpu.matmul %283, %112, %cst_199 {dimension_numbers = #tpu.dot_dimension_numbers<[1], [0], [0], [1], [0, 0, 1, 1], [], []>} : vector<8x4xf32>, vector<4x32xf32>, vector<8x32xf32> -> vector<8x32xf32>
    %286 = arith.mulf %285, %269 : vector<8x32xf32>
    %cst_200 = arith.constant dense<0.000000e+00> : vector<32xf32>
    %287 = vector.multi_reduction <add>, %286, %cst_200 [0] : vector<8x32xf32> to vector<32xf32>
    %288 = vector.shape_cast %287 : vector<32xf32> to vector<1x32xf32>
    %c0_201 = arith.constant 0 : index
    %c0_202 = arith.constant 0 : index
    %289 = vector.load %arg36[%c0_201, %c0_202] : memref<32x32xf32, #tpu.memory_space<vmem>>, vector<32x32xf32>
    %cst_203 = arith.constant dense<0.000000e+00> : vector<1x32xf32>
    %290 = tpu.matmul %288, %289, %cst_203 {dimension_numbers = #tpu.dot_dimension_numbers<[1], [0], [0], [1], [0, 0, 1, 1], [], []>} : vector<1x32xf32>, vector<32x32xf32>, vector<1x32xf32> -> vector<1x32xf32>
    %c0_204 = arith.constant 0 : index
    %c0_205 = arith.constant 0 : index
    %291 = vector.load %arg37[%c0_204, %c0_205] : memref<1x32xf32, #tpu.memory_space<vmem>>, vector<1x32xf32>
    %292 = arith.addf %290, %291 : vector<1x32xf32>
    %293 = vector.extract_strided_slice %110 {offsets = [1, 0], sizes = [1, 32], strides = [1, 1]} : vector<2x32xf32> to vector<1x32xf32>
    %cst_206 = arith.constant dense<0.000000e+00> : vector<1x64xf32>
    %294 = tpu.matmul %293, %114, %cst_206 {dimension_numbers = #tpu.dot_dimension_numbers<[1], [0], [0], [1], [0, 0, 1, 1], [], []>} : vector<1x32xf32>, vector<32x64xf32>, vector<1x64xf32> -> vector<1x64xf32>
    %cst_207 = arith.constant dense<0.000000e+00> : vector<1x64xf32>
    %295 = tpu.matmul %292, %115, %cst_207 {dimension_numbers = #tpu.dot_dimension_numbers<[1], [0], [0], [1], [0, 0, 1, 1], [], []>} : vector<1x32xf32>, vector<32x64xf32>, vector<1x64xf32> -> vector<1x64xf32>
    %296 = arith.addf %294, %295 : vector<1x64xf32>
    %c0_208 = arith.constant 0 : index
    %c0_209 = arith.constant 0 : index
    %297 = vector.load %arg39[%c0_208, %c0_209] : memref<1x64xf32, #tpu.memory_space<vmem>>, vector<1x64xf32>
    %298 = arith.addf %296, %297 : vector<1x64xf32>
    %c0_210 = arith.constant 0 : index
    %c0_211 = arith.constant 0 : index
    %299 = vector.load %arg40[%c0_210, %c0_211] : memref<1x64xf32, #tpu.memory_space<vmem>>, vector<1x64xf32>
    %300 = arith.mulf %298, %299 : vector<1x64xf32>
    %c0_212 = arith.constant 0 : index
    %c0_213 = arith.constant 0 : index
    %301 = vector.load %arg41[%c0_212, %c0_213] : memref<1x64xf32, #tpu.memory_space<vmem>>, vector<1x64xf32>
    %302 = arith.addf %300, %301 : vector<1x64xf32>
    %cst_214 = arith.constant 0.000000e+00 : f32
    %303 = vector.broadcast %cst_214 : f32 to vector<1x64xf32>
    %304 = arith.maximumf %302, %303 : vector<1x64xf32>
    %c0_215 = arith.constant 0 : index
    %c0_216 = arith.constant 0 : index
    %305 = vector.load %arg42[%c0_215, %c0_216] : memref<64x32xf32, #tpu.memory_space<vmem>>, vector<64x32xf32>
    %cst_217 = arith.constant dense<0.000000e+00> : vector<1x32xf32>
    %306 = tpu.matmul %304, %305, %cst_217 {dimension_numbers = #tpu.dot_dimension_numbers<[1], [0], [0], [1], [0, 0, 1, 1], [], []>} : vector<1x64xf32>, vector<64x32xf32>, vector<1x32xf32> -> vector<1x32xf32>
    %c0_218 = arith.constant 0 : index
    %c0_219 = arith.constant 0 : index
    %307 = vector.load %arg43[%c0_218, %c0_219] : memref<1x32xf32, #tpu.memory_space<vmem>>, vector<1x32xf32>
    %308 = arith.addf %306, %307 : vector<1x32xf32>
    %c0_220 = arith.constant 0 : index
    %c0_221 = arith.constant 0 : index
    %309 = vector.load %arg44[%c0_220, %c0_221] : memref<1x32xf32, #tpu.memory_space<vmem>>, vector<1x32xf32>
    %310 = arith.mulf %308, %309 : vector<1x32xf32>
    %c0_222 = arith.constant 0 : index
    %c0_223 = arith.constant 0 : index
    %311 = vector.load %arg45[%c0_222, %c0_223] : memref<1x32xf32, #tpu.memory_space<vmem>>, vector<1x32xf32>
    %312 = arith.addf %310, %311 : vector<1x32xf32>
    %cst_224 = arith.constant 0.000000e+00 : f32
    %313 = vector.broadcast %cst_224 : f32 to vector<1x32xf32>
    %314 = arith.maximumf %312, %313 : vector<1x32xf32>
    %c0_225 = arith.constant 0 : index
    %c0_226 = arith.constant 0 : index
    %315 = vector.load %arg46[%c0_225, %c0_226] : memref<32x1xf32, #tpu.memory_space<vmem>>, vector<32x1xf32>
    %cst_227 = arith.constant dense<0.000000e+00> : vector<1x1xf32>
    %316 = tpu.matmul %314, %315, %cst_227 {dimension_numbers = #tpu.dot_dimension_numbers<[1], [0], [0], [1], [0, 0, 1, 1], [], []>} : vector<1x32xf32>, vector<32x1xf32>, vector<1x1xf32> -> vector<1x1xf32>
    %c0_228 = arith.constant 0 : index
    %c0_229 = arith.constant 0 : index
    %317 = vector.load %arg47[%c0_228, %c0_229] : memref<1x1xf32, #tpu.memory_space<vmem>>, vector<1x1xf32>
    %318 = arith.addf %316, %317 : vector<1x1xf32>
    %c1 = arith.constant 1 : index
    %c0_230 = arith.constant 0 : index
    %319 = vector.load %arg52[%c1, %c0_230] : memref<2x1xf32, #tpu.memory_space<vmem>>, vector<1x1xf32>
    tpu.vector_store %arg52[%c1, %c0_230], %318 {strides = array<i32>} : memref<2x1xf32, #tpu.memory_space<vmem>>, vector<1x1xf32>,
    return
  }
}

</mosaic_0001>

<bundles_post_ra>
// kernel: drug_response_forward.1
= control target key start
LH: loop header
LB: loop body
LE: loop exit
PB: predicated region body
PF: predicated region fallthrough
CT: control target
= control target key end

     0   :  { %s5423_s6 = smov 1   ;;  %s5424_s10 = smov 2   ;;  %s6489_s0 = inlined_call_operand.smem [shape: u32[53], index: -1, kind: input, shape index: {}] }
   0x1   :  { %s5495_s5 = sld [smem:[%s6489_s0]]   ;;  %s5425_s14 = smov 3  }
   0x2   :  { %s5500_s9 = sld [smem:[%s6489_s0 + %s5423_s6]]   ;;  %s5426_s18 = smov 4  }
   0x3   :  { %s5505_s13 = sld [smem:[%s6489_s0 + %s5424_s10]]   ;;  %s5427_s22 = smov 5  }
   0x4   :  { %s5510_s17 = sld [smem:[%s6489_s0 + %s5425_s14]]   ;;  %s5428_s26 = smov 6  }
   0x5   :  { %s5515_s21 = sld [smem:[%s6489_s0 + %s5426_s18]]   ;;  %s5429_s30 = smov 7  }
   0x6   :  { %s5520_s25 = sld [smem:[%s6489_s0 + %s5427_s22]]   ;;  %s5430_s4 = smov 8  }
   0x7   :  { %s5525_s29 = sld [smem:[%s6489_s0 + %s5428_s26]]   ;;  %s5431_s10 = smov 9  }
   0x8   :  { %s5530_s3 = sld [smem:[%s6489_s0 + %s5429_s30]]   ;;  %s5432_s15 = smov 10  }
   0x9   :  { %s5535_s8 = sld [smem:[%s6489_s0 + %s5430_s4]]   ;;  %s5433_s20 = smov 11  }
   0xa   :  { %s5540_s14 = sld [smem:[%s6489_s0 + %s5431_s10]]   ;;  %s5434_s26 = smov 12  }
   0xb   :  { %s5545_s19 = sld [smem:[%s6489_s0 + %s5432_s15]]   ;;  %s5435_s1 = smov 13  }
   0xc   :  { %s5550_s24 = sld [smem:[%s6489_s0 + %s5433_s20]]   ;;  %s5436_s7 = smov 14  }
   0xd   :  { %s5555_s30 = sld [smem:[%s6489_s0 + %s5434_s26]]   ;;  %s5437_s15 = smov 15  }
   0xe   :  { %s5560_s6 = sld [smem:[%s6489_s0 + %s5435_s1]]   ;;  %s5438_s22 = smov 16  }
   0xf   :  { %6513 = sst [smem:[#allocation17_spill]] %s5535_s8  ;;  %s5439_s28 = smov 17  }
  0x10   :  { %6514 = sst [smem:[#allocation18_spill]] %s5540_s14  ;;  %s5470_s23 = smov 48  }
  0x11   :  { %s5565_s12 = sld [smem:[%s6489_s0 + %s5436_s7]]   ;;  %s5440_s7 = smov 18  }
  0x12   :  { %s5570_s20 = sld [smem:[%s6489_s0 + %s5437_s15]]   ;;  %s5441_s15 = smov 19  }
  0x13   :  { %6515 = sst [smem:[#allocation19_spill]] %s5555_s30  ;;  %s5471_s1 = smov 49  }
  0x14   :  { %6516 = sst [smem:[#allocation20_spill]] %s5560_s6  ;;  %s5472_s10 = smov 50  }
  0x15   :  { %s5575_s27 = sld [smem:[%s6489_s0 + %s5438_s22]]   ;;  %s5442_s22 = smov 20  }
  0x16   :  { %s5580_s4 = sld [smem:[%s6489_s0 + %s5439_s28]]   ;;  %s5443_s28 = smov 21  }
  0x17   :  { %6517 = sst [smem:[#allocation21_spill]] %s5565_s12  ;;  %s5473_s16 = smov 51  }
  0x18   :  { %6518 = sst [smem:[#allocation22_spill]] %s5570_s20 }
  0x19   :  { %s5585_s14 = sld [smem:[%s6489_s0 + %s5440_s7]]   ;;  %s5444_s7 = smov 22  }
  0x1a   :  { %s5590_s20 = sld [smem:[%s6489_s0 + %s5441_s15]]   ;;  %s5445_s15 = smov 23  }
  0x1b   :  { %6519 = sst [smem:[#allocation23_spill]] %s5575_s27 }
  0x1c   :  { %6520 = sst [smem:[#allocation24_spill]] %s5580_s4 }
  0x1d   :  { %s5595_s8 = sld [smem:[%s6489_s0 + %s5442_s22]]   ;;  %s5446_s22 = smov 24  }
  0x1e   :  { %s5600_s4 = sld [smem:[%s6489_s0 + %s5443_s28]]   ;;  %s5447_s28 = smov 25  }
  0x1f   :  { %6521 = sst [smem:[#allocation25_spill]] %s5585_s14 }
  0x20   :  { %6522 = sst [smem:[#allocation26_spill]] %s5590_s20 }
  0x21   :  { %s5605_s14 = sld [smem:[%s6489_s0 + %s5444_s7]]   ;;  %s5448_s7 = smov 26  }
  0x22   :  { %s5610_s20 = sld [smem:[%s6489_s0 + %s5445_s15]]   ;;  %s5449_s15 = smov 27  }
  0x23   :  { %6523 = sst [smem:[#allocation27_spill]] %s5595_s8 }
  0x24   :  { %6524 = sst [smem:[#allocation28_spill]] %s5600_s4 }
  0x25   :  { %s5615_s8 = sld [smem:[%s6489_s0 + %s5446_s22]]   ;;  %s5450_s22 = smov 28  }
  0x26   :  { %s5620_s4 = sld [smem:[%s6489_s0 + %s5447_s28]]   ;;  %s5451_s28 = smov 29  }
  0x27   :  { %6525 = sst [smem:[#allocation29_spill]] %s5605_s14 }
  0x28   :  { %6526 = sst [smem:[#allocation30_spill]] %s5610_s20 }
  0x29   :  { %s5625_s14 = sld [smem:[%s6489_s0 + %s5448_s7]]   ;;  %s5452_s7 = smov 30  }
  0x2a   :  { %s5630_s20 = sld [smem:[%s6489_s0 + %s5449_s15]]   ;;  %s5453_s15 = smov 31  }
  0x2b   :  { %6527 = sst [smem:[#allocation31_spill]] %s5615_s8 }
  0x2c   :  { %6528 = sst [smem:[#allocation32_spill]] %s5620_s4 }
  0x2d   :  { %s5635_s8 = sld [smem:[%s6489_s0 + %s5450_s22]]   ;;  %s5454_s22 = smov 32  }
  0x2e   :  { %s5640_s4 = sld [smem:[%s6489_s0 + %s5451_s28]]   ;;  %s5455_s28 = smov 33  }
  0x2f   :  { %6529 = sst [smem:[#allocation33_spill]] %s5625_s14 }
  0x30   :  { %6530 = sst [smem:[#allocation34_spill]] %s5630_s20 }
  0x31   :  { %s5645_s14 = sld [smem:[%s6489_s0 + %s5452_s7]]   ;;  %s5456_s7 = smov 34  }
  0x32   :  { %s5650_s20 = sld [smem:[%s6489_s0 + %s5453_s15]]   ;;  %s5457_s15 = smov 35  }
  0x33   :  { %6531 = sst [smem:[#allocation35_spill]] %s5635_s8 }
  0x34   :  { %6532 = sst [smem:[#allocation36_spill]] %s5640_s4 }
  0x35   :  { %s5655_s8 = sld [smem:[%s6489_s0 + %s5454_s22]]   ;;  %s5458_s22 = smov 36  }
  0x36   :  { %s5660_s4 = sld [smem:[%s6489_s0 + %s5455_s28]]   ;;  %s5459_s28 = smov 37  }
  0x37   :  { %6533 = sst [smem:[#allocation37_spill]] %s5645_s14 }
  0x38   :  { %6534 = sst [smem:[#allocation38_spill]] %s5650_s20 }
  0x39   :  { %s5665_s14 = sld [smem:[%s6489_s0 + %s5456_s7]]   ;;  %s5460_s7 = smov 38  }
  0x3a   :  { %s5670_s20 = sld [smem:[%s6489_s0 + %s5457_s15]]   ;;  %s5461_s15 = smov 39  }
  0x3b   :  { %6535 = sst [smem:[#allocation39_spill]] %s5655_s8 }
  0x3c   :  { %6536 = sst [smem:[#allocation40_spill]] %s5660_s4 }
  0x3d   :  { %s5675_s8 = sld [smem:[%s6489_s0 + %s5458_s22]]   ;;  %s5462_s22 = smov 40  }
  0x3e   :  { %s5680_s4 = sld [smem:[%s6489_s0 + %s5459_s28]]   ;;  %s5463_s28 = smov 41  }
  0x3f   :  { %6537 = sst [smem:[#allocation41_spill]] %s5665_s14 }
  0x40   :  { %6538 = sst [smem:[#allocation42_spill]] %s5670_s20 }
  0x41   :  { %s5685_s14 = sld [smem:[%s6489_s0 + %s5460_s7]]   ;;  %s5464_s7 = smov 42  }
  0x42   :  { %s5690_s20 = sld [smem:[%s6489_s0 + %s5461_s15]]   ;;  %s5465_s15 = smov 43  }
  0x43   :  { %6539 = sst [smem:[#allocation43_spill]] %s5675_s8 }
  0x44   :  { %6540 = sst [smem:[#allocation44_spill]] %s5680_s4 }
  0x45   :  { %s5695_s8 = sld [smem:[%s6489_s0 + %s5462_s22]]   ;;  %s5466_s22 = smov 44  }
  0x46   :  { %s5700_s4 = sld [smem:[%s6489_s0 + %s5463_s28]]   ;;  %s5467_s28 = smov 45  }
  0x47   :  { %6541 = sst [smem:[#allocation45_spill]] %s5685_s14 }
  0x48   :  { %6542 = sst [smem:[#allocation46_spill]] %s5690_s20 }
  0x49   :  { %s5705_s14 = sld [smem:[%s6489_s0 + %s5464_s7]]   ;;  %s5468_s7 = smov 46  }
  0x4a   :  { %s5710_s20 = sld [smem:[%s6489_s0 + %s5465_s15]]   ;;  %s5469_s15 = smov 47  }
  0x4b   :  { %6543 = sst [smem:[#allocation47_spill]] %s5695_s8 }
  0x4c   :  { %6544 = sst [smem:[#allocation48_spill]] %s5700_s4 }
  0x4d   :  { %s5715_s8 = sld [smem:[%s6489_s0 + %s5466_s22]]  }
  0x4e   :  { %s5720_s4 = sld [smem:[%s6489_s0 + %s5467_s28]]  }
  0x4f   :  { %6545 = sst [smem:[#allocation49_spill]] %s5705_s14 }
  0x50   :  { %s5725_s14 = sld [smem:[%s6489_s0 + %s5468_s7]]  }
  0x51   :  { %s3955_s6 = sld [smem:[%s6489_s0 + %s5469_s15]]  }
  0x52   :  { %s5733_s30 = sld [smem:[%s6489_s0 + %s5470_s23]]   ;;  %s5474_s23 = smov 52  }
  0x53   :  { %s5738_s27 = sld [smem:[%s6489_s0 + %s5471_s1]]  }
  0x54   :  { %s5748_s12 = sld [smem:[%s6489_s0 + %s5473_s16]]  }
  0x56   :  { %6546 = sst [smem:[#allocation50_spill]] %s5725_s14 }
  0x57   :  { %s5743_s14 = sld [smem:[%s6489_s0 + %s5472_s10]]   ;;  %v111_v0 = vstv %s3955_s6 }
  0x58   :  { %6547 = sst [smem:[#allocation51_spill]] %s5733_s30  ;;  %112 = vst [vmem:[#allocation2] sm:$0x1] %v111_v0 }
  0x59   :  { %s5753_s30 = sld [smem:[%s6489_s0 + %s5474_s23]]  }
  0x5a   :  { %113 = vsyncpa [#allocation4], 0 }
  0x5b   :  { %114 = vsyncpa [#allocation7], 0 }
  0x5c   :  { %115 = vsyncpa [#allocation5], 0 }
  0x5d   :  { %116 = vsyncpa [#allocation11], 0  ;;  %s5475_s1 = smov [#allocation6]   ;;  %s5476_s2 = smov [#allocation3]  }
  0x5e   :  { %s219_s28 = sshll.u32 %s5475_s1, 4  ;;  %s209_s10 = sshll.u32 %s5476_s2, 4  ;;  %s220_s28 = int_to_ptr.vmem [resolvable:$true] %s219_s28  ;;  %s210_s10 = int_to_ptr.vmem [resolvable:$true] %s209_s10 }
  0x5f   :  { %s5283_s7 = scalar_lea.hbm %s5715_s8, 16 }
  0x60   :  { %p5284_p0 = scmp.ne.s32.totalorder %s5715_s8, %s5283_s7  ;;  %p5287_p1 = scmp.lt.u32.totalorder %s5283_s7, %s5715_s8 }
  0x62   :  { %p5289_p2 = pnand %p5287_p1, %p5284_p0 }
  0x64   :  { %5292 = shalt.err (!%p5289_p2)
}
  0x65   :  { %s5293_s0 = scalar_lea.vmem %s220_s28, 16  ;;  %s5297_s6 = scalar_lea.vmem %s220_s28, 32 }
  0x66   :  { %p5294_p3 = scmp.ne.s32.totalorder %s220_s28, %s5293_s0  ;;  %p5298_p4 = scmp.lt.s32.totalorder %s220_s28, %s220_s28 }
  0x67   :  { %p5299_p5 = scmp.lt.s32.totalorder %s5297_s6, %s5293_s0 }
  0x69   :  { %p5300_p6 = por %p5299_p5, %p5298_p4 }
  0x6b   :  { %p5301_p7 = pnand %p5300_p6, %p5294_p3 }
  0x6d   :  { %5304 = shalt.err (!%p5301_p7)
}
  0x6e   :  { %222 = dma.hbm_to_vmem [thread:$0]  %s5715_s8, 16, %s220_s28, [#allocation7]  }
  0x6f   :  { %s5305_s11 = scalar_lea.hbm %s5710_s20, 16 }
  0x70   :  { %p5306_p8 = scmp.ne.s32.totalorder %s5710_s20, %s5305_s11  ;;  %p5309_p9 = scmp.lt.u32.totalorder %s5305_s11, %s5710_s20 }
  0x72   :  { %p5311_p10 = pnand %p5309_p9, %p5306_p8 }
  0x74   :  { %5314 = shalt.err (!%p5311_p10)
}
  0x75   :  { %s5315_s16 = scalar_lea.vmem %s210_s10, 16  ;;  %s5319_s15 = scalar_lea.vmem %s210_s10, 32 }
  0x76   :  { %p5316_p11 = scmp.ne.s32.totalorder %s210_s10, %s5315_s16  ;;  %p5320_p12 = scmp.lt.s32.totalorder %s210_s10, %s210_s10 }
  0x77   :  { %p5321_p13 = scmp.lt.s32.totalorder %s5319_s15, %s5315_s16 }
  0x79   :  { %p5322_p0 = por %p5321_p13, %p5320_p12 }
  0x7b   :  { %p5323_p1 = pnand %p5322_p0, %p5316_p11 }
  0x7d   :  { %5326 = shalt.err (!%p5323_p1)
}
  0x7e   :  { %212 = dma.hbm_to_vmem [thread:$0]  %s5710_s20, 16, %s210_s10, [#allocation4]  }
  0x7f   :  { %s5477_s18 = smov [#allocation8]   ;;  %s5327_s23 = scalar_lea.hbm %s5720_s4, 16 }
  0x80   :  { %s229_s8 = sshll.u32 %s5477_s18, 4  ;;  %p5328_p2 = scmp.ne.s32.totalorder %s5720_s4, %s5327_s23  ;;  %s230_s8 = int_to_ptr.vmem [resolvable:$true] %s229_s8 }
  0x81   :  { %p5331_p3 = scmp.lt.u32.totalorder %s5327_s23, %s5720_s4 }
  0x83   :  { %p5333_p4 = pnand %p5331_p3, %p5328_p2 }
  0x85   :  { %5336 = shalt.err (!%p5333_p4)
}
  0x86   :  { %s5337_s22 = scalar_lea.vmem %s230_s8, 16  ;;  %s5341_s26 = scalar_lea.vmem %s230_s8, 32 }
  0x87   :  { %p5338_p5 = scmp.ne.s32.totalorder %s230_s8, %s5337_s22  ;;  %p5342_p6 = scmp.lt.s32.totalorder %s230_s8, %s230_s8 }
  0x88   :  { %p5343_p7 = scmp.lt.s32.totalorder %s5341_s26, %s5337_s22 }
  0x8a   :  { %p5344_p8 = por %p5343_p7, %p5342_p6 }
  0x8c   :  { %p5345_p9 = pnand %p5344_p8, %p5338_p5 }
  0x8e   :  { %5348 = shalt.err (!%p5345_p9)
}
  0x8f   :  { %232 = dma.hbm_to_vmem [thread:$0]  %s5720_s4, 16, %s230_s8, [#allocation7]  }
  0x90   :  { %5415 = dma.done.wait [#allocation4], 16  }
  0x91   :  { %5416 = vsyncadd [#allocation4], 4294967280 }
  0x92   :  { %5417 = dma.done.wait [#allocation7], 32  }
  0x93   :  { %5418 = vsyncadd [#allocation7], 4294967264  ;;  %v5478_v1 = vmov 0.0|0.0   ;;  %v250_v2 = vld [vmem:[%s5505_s13] sm:$0xff]  ;;  %v251_v3 = vld [vmem:[%s5505_s13 + $0x8] sm:$0xff]  ;;  %vm277_vm0 = vcmask 261120  }
  0x94   :  { %4800 = vmatprep.subr.bf16.mxu0 %v5478_v1  ;;  %v252_v4 = vld [vmem:[%s5505_s13 + $0x10] sm:$0xff]  ;;  %v4801_v5 = vpack.c.bf16 %v251_v3, %v250_v2  ;;  %v253_v6 = vld [vmem:[%s5505_s13 + $0x18] sm:$0xff]  ;;  %v254_v8 = vld [vmem:[%s5505_s13 + $0x20] sm:$0xff]  ;;  %vm899_vm1 = vcmask 1041408   ;;  %vm5480_vm2 = vmmov 0   ;;  %vm1038_vm3 = vcmask 523264  }
  0x95   :  { %v4804_v7 = vpack.c.bf16 %v253_v6, %v252_v4  ;;  %v255_v9 = vld [vmem:[%s5505_s13 + $0x28] sm:$0xff]  ;;  %v256_v12 = vld [vmem:[%s5505_s13 + $0x30] sm:$0xff]  ;;  %v257_v13 = vld [vmem:[%s5505_s13 + $0x38] sm:$0xff]  ;;  %vm1021_vm4 = vcmask 517120   ;;  %s6558_s20 = sld [smem:[#allocation29_spill]]  ;;  %s6559_s4 = sld [smem:[#allocation24_spill]] }
  0x96   :  { %4802 = vmatpush1.bf16.msra.mxu0 %v4801_v5  ;;  %v247_v10 = vld [vmem:[%s5495_s5 + $0x8] sm:$0xff]  ;;  %v4807_v11 = vpack.c.bf16 %v255_v9, %v254_v8  ;;  %v4810_v14 = vpack.c.bf16 %v257_v13, %v256_v12  ;;  %v258_v15 = vld [vmem:[%s5505_s13 + $0x40] sm:$0xff]  ;;  %v260_v18 = vld [vmem:[%s5505_s13 + $0x50] sm:$0xff]  ;;  %s6560_s1 = sld [smem:[#allocation27_spill]]  ;;  %s6561_s28 = sld [smem:[#allocation30_spill]]  ;;  %vm1555_vm5 = vcmask 1043456  }
  0x97   :  { %4803 = vmatprep.subr.bf16.mxu0 %v5478_v1  ;;  %3962 = vmatprep.mubr.msk.f32.mxu0 %vm277_vm0, %v247_v10  ;;  %v259_v16 = vld [vmem:[%s5505_s13 + $0x48] sm:$0xff]  ;;  %v261_v19 = vld [vmem:[%s5505_s13 + $0x58] sm:$0xff]  ;;  %v262_v21 = vld [vmem:[%s5505_s13 + $0x60] sm:$0xff]  ;;  %s6562_s2 = sld [smem:[#allocation32_spill]]  ;;  %s6563_s10 = sld [smem:[#allocation28_spill]]  ;;  %vm1532_vm6 = vcmask 31744  }
  0x98   :  { %v4813_v17 = vpack.c.bf16 %v259_v16, %v258_v15  ;;  %v4816_v20 = vpack.c.bf16 %v261_v19, %v260_v18  ;;  %v263_v22 = vld [vmem:[%s5505_s13 + $0x68] sm:$0xff]  ;;  %v264_v24 = vld [vmem:[%s5505_s13 + $0x70] sm:$0xff]  ;;  %v265_v25 = vld [vmem:[%s5505_s13 + $0x78] sm:$0xff]  ;;  %s6564_s7 = sld [smem:[#allocation35_spill]]  ;;  %s6565_s0 = sld [smem:[#allocation37_spill]]  ;;  %vm2531_vm7 = vcmask 0  }
  0x99   :  { %v4819_v23 = vpack.c.bf16 %v263_v22, %v262_v21  ;;  %v4822_v26 = vpack.c.bf16 %v265_v25, %v264_v24  ;;  %v266_v27 = vld [vmem:[%s5505_s13 + $0x80] sm:$0xff]  ;;  %v267_v28 = vld [vmem:[%s5505_s13 + $0x88] sm:$0xff]  ;;  %v268_v30 = vld [vmem:[%s5505_s13 + $0x90] sm:$0xff]  ;;  %s6566_s6 = sld [smem:[#allocation34_spill]]  ;;  %s6567_s11 = sld [smem:[#allocation39_spill]] }
  0x9a   :  { %4805 = vmatpush1.bf16.msra.mxu0 %v4804_v7  ;;  %v4825_v29 = vpack.c.bf16 %v267_v28, %v266_v27  ;;  %v269_v31 = vld [vmem:[%s5505_s13 + $0x98] sm:$0xff]  ;;  %v246_v33 = vld [vmem:[%s5495_s5] sm:$0xff]  ;;  %v248_v35 = vld [vmem:[%s5495_s5 + $0x10] sm:$0xff]  ;;  %s6550_s13 = sld [smem:[#allocation19_spill]]  ;;  %s6568_s16 = sld [smem:[#allocation41_spill]] }
  0x9b   :  { %4806 = vmatprep.subr.bf16.mxu0 %v5478_v1  ;;  %v4828_v32 = vpack.c.bf16 %v269_v31, %v268_v30  ;;  %v249_v34 = vld [vmem:[%s5495_s5 + $0x18] sm:$0xff]  ;;  %v3961_v36 = vld [vmem:[%s5510_s17] ss:$0 sm:$0xff]  ;;  %v403_v44 = vld [vmem:[%s5525_s29 + $0x8] sm:$0xff]  ;;  %s6548_s5 = sld [smem:[#allocation21_spill]]  ;;  %s6551_s17 = sld [smem:[#allocation20_spill]] }
  0x9c   :  { %v402_v43 = vld [vmem:[%s5525_s29] sm:$0xff]  ;;  %v404_v45 = vld [vmem:[%s5525_s29 + $0x10] sm:$0xff]  ;;  %v405_v47 = vld [vmem:[%s5525_s29 + $0x18] sm:$0xff]  ;;  %s6569_s15 = sld [smem:[#allocation36_spill]]  ;;  %s6570_s18 = sld [smem:[#allocation38_spill]] }
  0x9d   :  { %v4830_v46 = vpack.c.bf16 %v403_v44, %v402_v43  ;;  %v4834_v48 = vpack.c.bf16 %v405_v47, %v404_v45  ;;  %v406_v57 = vld [vmem:[%s5525_s29 + $0x20] sm:$0xff]  ;;  %v407_v58 = vld [vmem:[%s5525_s29 + $0x28] sm:$0xff]  ;;  %v408_v60 = vld [vmem:[%s5525_s29 + $0x30] sm:$0xff]  ;;  %s6571_s8 = sld [smem:[#allocation40_spill]]  ;;  %s6572_s23 = sld [smem:[#allocation43_spill]] }
  0x9e   :  { %4808 = vmatpush1.bf16.msra.mxu0 %v4807_v11  ;;  %v4838_v59 = vpack.c.bf16 %v407_v58, %v406_v57  ;;  %v409_v61 = vld [vmem:[%s5525_s29 + $0x38] sm:$0xff]  ;;  %v410_v63 = vld [vmem:[%s5525_s29 + $0x40] sm:$0xff]  ;;  %v411_v0 = vld [vmem:[%s5525_s29 + $0x48] sm:$0xff]  ;;  %s6573_s22 = sld [smem:[#allocation45_spill]]  ;;  %s6574_s26 = sld [smem:[#allocation42_spill]] }
  0x9f   :  { %4809 = vmatprep.subr.bf16.mxu0 %v5478_v1  ;;  %4831 = vmatprep.subr.bf16.mxu1 %v4830_v46  ;;  %v4842_v62 = vpack.c.bf16 %v409_v61, %v408_v60  ;;  %v4846_v2 = vpack.c.bf16 %v411_v0, %v410_v63  ;;  %v412_v3 = vld [vmem:[%s5525_s29 + $0x50] sm:$0xff]  ;;  %v413_v4 = vld [vmem:[%s5525_s29 + $0x58] sm:$0xff]  ;;  %v414_v6 = vld [vmem:[%s5525_s29 + $0x60] sm:$0xff] }
  0xa0   :  { %4833 = vmatpush3.bf16.msra.mxu1 %v4830_v46  ;;  %v4850_v5 = vpack.c.bf16 %v413_v4, %v412_v3  ;;  %v415_v7 = vld [vmem:[%s5525_s29 + $0x68] sm:$0xff]  ;;  %v416_v9 = vld [vmem:[%s5525_s29 + $0x70] sm:$0xff]  ;;  %v417_v10 = vld [vmem:[%s5525_s29 + $0x78] sm:$0xff]  ;;  %s6554_s29 = sld [smem:[#allocation25_spill]] }
  0xa1   :  { %4835 = vmatprep.subr.bf16.mxu1 %v4834_v48  ;;  %v4854_v8 = vpack.c.bf16 %v415_v7, %v414_v6  ;;  %v4858_v11 = vpack.c.bf16 %v417_v10, %v416_v9  ;;  %v567_v12 = vld [vmem:[%s5545_s19 + $0x80] sm:$0xff]  ;;  %v568_v13 = vld [vmem:[%s5545_s19 + $0x88] sm:$0xff]  ;;  %v601_v21 = vld [vmem:[%s5545_s19 + $0x190] sm:$0xff] }
  0xa2   :  { %4811 = vmatpush1.bf16.msra.mxu0 %v4810_v14  ;;  %v4862_v14 = vpack.c.bf16 %v568_v13, %v567_v12  ;;  %v599_v15 = vld [vmem:[%s5545_s19 + $0x180] sm:$0xff]  ;;  %v600_v16 = vld [vmem:[%s5545_s19 + $0x188] sm:$0xff]  ;;  %v602_v22 = vld [vmem:[%s5545_s19 + $0x198] sm:$0xff] }
  0xa3   :  { %4812 = vmatprep.subr.bf16.mxu0 %v5478_v1  ;;  %v583_v18 = vld [vmem:[%s5545_s19 + $0x100] sm:$0xff]  ;;  %v584_v19 = vld [vmem:[%s5545_s19 + $0x108] sm:$0xff]  ;;  %v585_v24 = vld [vmem:[%s5545_s19 + $0x110] sm:$0xff] }
  0xa4   :  { %4837 = vmatpush3.bf16.msra.mxu1 %v4834_v48  ;;  %v586_v25 = vld [vmem:[%s5545_s19 + $0x118] sm:$0xff]  ;;  %v603_v27 = vld [vmem:[%s5545_s19 + $0x1a0] sm:$0xff]  ;;  %v604_v28 = vld [vmem:[%s5545_s19 + $0x1a8] sm:$0xff] }
  0xa5   :  { %4839 = vmatprep.subr.bf16.mxu1 %v4838_v59  ;;  %v587_v30 = vld [vmem:[%s5545_s19 + $0x120] sm:$0xff]  ;;  %v588_v31 = vld [vmem:[%s5545_s19 + $0x128] sm:$0xff]  ;;  %v609_v45 = vld [vmem:[%s5545_s19 + $0x1d0] sm:$0xff] }
  0xa6   :  { %4814 = vmatpush1.bf16.msra.mxu0 %v4813_v17  ;;  %v4894_v17 = vpack.c.bf16 %v600_v16, %v599_v15  ;;  %v592_v43 = vld [vmem:[%s5545_s19 + $0x148] sm:$0xff]  ;;  %v610_v46 = vld [vmem:[%s5545_s19 + $0x1d8] sm:$0xff]  ;;  %v593_v48 = vld [vmem:[%s5545_s19 + $0x150] sm:$0xff] }
  0xa7   :  { %4815 = vmatprep.subr.bf16.mxu0 %v5478_v1  ;;  %v4914_v47 = vpack.c.bf16 %v610_v46, %v609_v45  ;;  %v612_v57 = vld [vmem:[%s5545_s19 + $0x1e8] sm:$0xff]  ;;  %v595_v61 = vld [vmem:[%s5545_s19 + $0x160] sm:$0xff]  ;;  %v613_v3 = vld [vmem:[%s5545_s19 + $0x1f0] sm:$0xff] }
  0xa8   :  { %4841 = vmatpush3.bf16.msra.mxu1 %v4838_v59  ;;  %v614_v4 = vld [vmem:[%s5545_s19 + $0x1f8] sm:$0xff] }
  0xa9   :  { %4843 = vmatprep.subr.bf16.mxu1 %v4842_v62  ;;  %v4922_v7 = vpack.c.bf16 %v614_v4, %v613_v3  ;;  %v598_v9 = vld [vmem:[%s5545_s19 + $0x178] sm:$0xff]  ;;  %v580_v3 = vld [vmem:[%s5545_s19 + $0xe8] sm:$0xff] }
  0xaa   :  { %4817 = vmatpush1.bf16.msra.mxu0 %v4816_v20  ;;  %v4896_v20 = vpack.c.bf16 %v584_v19, %v583_v18  ;;  %v574_v45 = vld [vmem:[%s5545_s19 + $0xb8] sm:$0xff] }
  0xab   :  { %4818 = vmatprep.subr.bf16.mxu0 %v5478_v1 }
  0xac   :  { %4845 = vmatpush3.bf16.msra.mxu1 %v4842_v62  ;;  %v596_v62 = vld [vmem:[%s5545_s19 + $0x168] sm:$0xff] }
  0xad   :  { %4847 = vmatprep.subr.bf16.mxu1 %v4846_v2  ;;  %v4920_v63 = vpack.c.bf16 %v596_v62, %v595_v61 }
  0xae   :  { %4820 = vmatpush1.bf16.msra.mxu0 %v4819_v23  ;;  %v4898_v23 = vpack.c.bf16 %v602_v22, %v601_v21  ;;  %v3965_v22 = vld [vmem:[%s5520_s25] ss:$0 sm:$0xff]  ;;  %s6553_s25 = sld [smem:[#allocation18_spill]] }
  0xaf   :  { %4821 = vmatprep.subr.bf16.mxu0 %v5478_v1 }
  0xb0   :  { %4849 = vmatpush3.bf16.msra.mxu1 %v4846_v2  ;;  %v549_v2 = vld [vmem:[%s5500_s9] sm:$0xff] }
  0xb1   :  { %4851 = vmatprep.subr.bf16.mxu1 %v4850_v5  ;;  %v656_v6 = vcombine.high %v549_v2, %v549_v2 }
  0xb2   :  { %4823 = vmatpush1.bf16.msra.mxu0 %v4822_v26  ;;  %v4900_v26 = vpack.c.bf16 %v586_v25, %v585_v24 }
  0xb3   :  { %4824 = vmatprep.subr.bf16.mxu0 %v5478_v1 }
  0xb4   :  { %4853 = vmatpush3.bf16.msra.mxu1 %v4850_v5 }
  0xb5   :  { %4855 = vmatprep.subr.bf16.mxu1 %v4854_v8 }
  0xb6   :  { %4826 = vmatpush1.bf16.msra.mxu0 %v4825_v29  ;;  %v4902_v29 = vpack.c.bf16 %v604_v28, %v603_v27 }
  0xb7   :  { %4827 = vmatprep.subr.bf16.mxu0 %v5478_v1 }
  0xb8   :  { %4857 = vmatpush3.bf16.msra.mxu1 %v4854_v8  ;;  %v597_v8 = vld [vmem:[%s5545_s19 + $0x170] sm:$0xff] }
  0xb9   :  { %4859 = vmatprep.subr.bf16.mxu1 %v4858_v11  ;;  %v4924_v10 = vpack.c.bf16 %v598_v9, %v597_v8  ;;  %v564_v8 = vld [vmem:[%s5545_s19 + $0x68] sm:$0xff]  ;;  %v581_v9 = vld [vmem:[%s5545_s19 + $0xf0] sm:$0xff] }
  0xba   :  { %4829 = vmatpush1.bf16.msra.mxu0 %v4828_v32  ;;  %v4904_v32 = vpack.c.bf16 %v588_v31, %v587_v30  ;;  %v552_v30 = vld [vmem:[%s5545_s19 + $0x8] sm:$0xff]  ;;  %v569_v31 = vld [vmem:[%s5545_s19 + $0x90] sm:$0xff] }
  0xbb   :  { %4895 = vmatprep.subr.bf16.mxu0 %v4894_v17 }
  0xbc   :  { %4861 = vmatpush3.bf16.msra.mxu1 %v4858_v11 }
  0xbd   :  { %349 = vmatmul.mubr.f32.vlgmr.msra.gmra.mrb[0].mxu0 %v246_v33  ;;  %4863 = vmatprep.subr.bf16.mxu1 %v4862_v14  ;;  %v605_v33 = vld [vmem:[%s5545_s19 + $0x1b0] sm:$0xff] }
  0xbe   :  { %3963 = vmatprep.mubr.msk.f32.mxu0 %vm277_vm0, %v249_v34  ;;  %4897 = vmatpush3.bf16.msra.mxu0 %v4896_v20  ;;  %v606_v34 = vld [vmem:[%s5545_s19 + $0x1b8] sm:$0xff]  ;;  %v3964_v20 = vld [vmem:[%s5515_s21] ss:$0 sm:$0xff]  ;;  %s6552_s21 = sld [smem:[#allocation17_spill]] }
  0xbf   :  { %4899 = vmatprep.subr.bf16.mxu0 %v4898_v23 }
  0xc1   :  { %354 = vmatmul.mubr.f32.gmra.mrb[2].mxu0 %v248_v35  ;;  %v4906_v35 = vpack.c.bf16 %v606_v34, %v605_v33 }
  0xc2   :  { %4901 = vmatpush3.bf16.msra.mxu0 %v4900_v26 }
  0xc3   :  { %4903 = vmatprep.subr.bf16.mxu0 %v4902_v29  ;;  %v551_v29 = vld [vmem:[%s5545_s19] sm:$0xff] }
  0xc6   :  { %4905 = vmatpush3.bf16.msra.mxu0 %v4904_v32  ;;  %v570_v32 = vld [vmem:[%s5545_s19 + $0x98] sm:$0xff] }
  0xc7   :  { %4907 = vmatprep.subr.bf16.mxu0 %v4906_v35  ;;  %v4866_v35 = vpack.c.bf16 %v570_v32, %v569_v31 }
 0x190   :  { %v350_v37 = vpop.f32.mrb[0].mxu0 }
 0x191   :  { %v351_v38 = vadd.f32 %v3961_v36, %v350_v37  ;;  %v352_v39 = vpop.f32.mrb[1].mxu0  ;;  %v590_v37 = vld [vmem:[%s5545_s19 + $0x138] sm:$0xff] }
 0x192   :  { %v607_v39 = vld [vmem:[%s5545_s19 + $0x1c0] sm:$0xff] }
 0x193   :  { %361 = vadd.xlane.f32.xlu0 %v351_v38 }
 0x194   :  { %v355_v40 = vpop.f32.mrb[2].mxu0 }
 0x195   :  { %v356_v41 = vadd.f32 %v3961_v36, %v355_v40  ;;  %v357_v42 = vpop.f32.mrb[3].mxu0  ;;  %v589_v36 = vld [vmem:[%s5545_s19 + $0x130] sm:$0xff]  ;;  %v608_v40 = vld [vmem:[%s5545_s19 + $0x1c8] sm:$0xff] }
 0x196   :  { %v591_v42 = vld [vmem:[%s5545_s19 + $0x140] sm:$0xff] }
 0x197   :  { %363 = vadd.xlane.f32.xlu0 %v356_v41  ;;  %v4912_v44 = vpack.c.bf16 %v592_v43, %v591_v42  ;;  %v555_v42 = vld [vmem:[%s5545_s19 + $0x20] sm:$0xff]  ;;  %v556_v43 = vld [vmem:[%s5545_s19 + $0x28] sm:$0xff] }
 0x198   :  { %v4872_v46 = vpack.c.bf16 %v556_v43, %v555_v42  ;;  %v623_v42 = vld [vmem:[%s5545_s19 + $0x240] sm:$0xff]  ;;  %v624_v43 = vld [vmem:[%s5545_s19 + $0x248] sm:$0xff] }
 0x220   :  { %v362_v49 = vpop.xlane.xlu0 %361 }
 0x221   :  { %v366_v50 = vmul.f32 0.0078125, %v362_v49  ;;  %v594_v49 = vld [vmem:[%s5545_s19 + $0x158] sm:$0xff] }
 0x223   :  { %v5808_v51 = vsub.f32 %v351_v38, %v366_v50  ;;  %v4908_v38 = vpack.c.bf16 %v590_v37, %v589_v36  ;;  %v4916_v50 = vpack.c.bf16 %v594_v49, %v593_v48  ;;  %v553_v36 = vld [vmem:[%s5545_s19 + $0x10] sm:$0xff]  ;;  %v554_v37 = vld [vmem:[%s5545_s19 + $0x18] sm:$0xff] }
 0x224   :  { %v364_v52 = vpop.xlane.xlu0 %363  ;;  %v557_v48 = vld [vmem:[%s5545_s19 + $0x30] sm:$0xff]  ;;  %v558_v49 = vld [vmem:[%s5545_s19 + $0x38] sm:$0xff] }
 0x225   :  { %v367_v53 = vmul.f32 0.0078125, %v364_v52  ;;  %v370_v54 = vmul.f32 %v5808_v51, %v5808_v51  ;;  %4909 = vmatpush3.bf16.msra.mxu0 %v4908_v38  ;;  %v5479_v52 = vmov 1983009808   ;;  %v571_v38 = vld [vmem:[%s5545_s19 + $0xa0] sm:$0xff] }
 0x227   :  { %v5812_v55 = vsub.f32 %v356_v41, %v367_v53  ;;  %372 = vadd.xlane.f32.xlu1 %v370_v54  ;;  %v4910_v41 = vpack.c.bf16 %v608_v40, %v607_v39  ;;  %v658_v53 = vunpack.c.l.s4 %v5479_v52  ;;  %v660_v54 = vlaneseq  ;;  %v572_v39 = vld [vmem:[%s5545_s19 + $0xa8] sm:$0xff] }
 0x228   :  { %v4868_v40 = vpack.c.bf16 %v554_v37, %v553_v36  ;;  %v576_v52 = vld [vmem:[%s5545_s19 + $0xc8] sm:$0xff]  ;;  %v622_v37 = vld [vmem:[%s5545_s19 + $0x238] sm:$0xff] }
 0x229   :  { %v371_v56 = vmul.f32 %v5812_v55, %v5812_v55  ;;  %4911 = vmatprep.subr.bf16.mxu0 %v4910_v41  ;;  %v659_v58 = vunpack.c.0.s8 %v658_v53  ;;  %v5856_v59 = vshrl.u32 %v660_v54, 7  ;;  %v4870_v41 = vpack.c.bf16 %v572_v39, %v571_v38  ;;  %v639_v38 = vld [vmem:[%s5545_s19 + $0x2c0] sm:$0xff]  ;;  %v640_v39 = vld [vmem:[%s5545_s19 + $0x2c8] sm:$0xff] }
 0x22a   :  { %4913 = vmatpush3.bf16.msra.mxu0 %v4912_v44  ;;  %v573_v44 = vld [vmem:[%s5545_s19 + $0xb0] sm:$0xff]  ;;  %v4876_v53 = vpack.c.bf16 %v558_v49, %v557_v48  ;;  %v626_v49 = vld [vmem:[%s5545_s19 + $0x258] sm:$0xff] }
 0x22b   :  { %374 = vadd.xlane.f32.xlu1 %v371_v56  ;;  %4915 = vmatprep.subr.bf16.mxu0 %v4914_v47  ;;  %v611_v56 = vld [vmem:[%s5545_s19 + $0x1e0] sm:$0xff]  ;;  %v662_v0 = vsub.s32 %v659_v58, %v5856_v59  ;;  %v4874_v47 = vpack.c.bf16 %v574_v45, %v573_v44  ;;  %v577_v58 = vld [vmem:[%s5545_s19 + $0xd0] sm:$0xff]  ;;  %v642_v45 = vld [vmem:[%s5545_s19 + $0x2d8] sm:$0xff] }
 0x22c   :  { %v4918_v60 = vpack.c.bf16 %v612_v57, %v611_v56  ;;  %v559_v56 = vld [vmem:[%s5545_s19 + $0x40] sm:$0xff]  ;;  %v560_v57 = vld [vmem:[%s5545_s19 + $0x48] sm:$0xff]  ;;  %v641_v44 = vld [vmem:[%s5545_s19 + $0x2d0] sm:$0xff] }
 0x22d   :  { %v5864_v5 = vrot.slane %v549_v2, %v662_v0  ;;  %v670_v11 = vrot.slane %v656_v6, %v662_v0  ;;  %v4880_v61 = vpack.c.bf16 %v560_v57, %v559_v56  ;;  %v562_v0 = vld [vmem:[%s5545_s19 + $0x58] sm:$0xff]  ;;  %v579_v2 = vld [vmem:[%s5545_s19 + $0xe0] sm:$0xff]  ;;  %v625_v48 = vld [vmem:[%s5545_s19 + $0x250] sm:$0xff] }
 0x22e   :  { %4917 = vmatpush3.bf16.msra.mxu0 %v4916_v50  ;;  %v575_v50 = vld [vmem:[%s5545_s19 + $0xc0] sm:$0xff]  ;;  %v4886_v6 = vpack.c.bf16 %v580_v3, %v579_v2  ;;  %v628_v57 = vld [vmem:[%s5545_s19 + $0x268] sm:$0xff] }
 0x22f   :  { %4919 = vmatprep.subr.bf16.mxu0 %v4918_v60  ;;  %v672_v12 = vcombine.high %v670_v11, %v670_v11  ;;  %v671_v34 = vcombine.high %v5864_v5, %v5864_v5  ;;  %v4878_v54 = vpack.c.bf16 %v576_v52, %v575_v50  ;;  %v578_v60 = vld [vmem:[%s5545_s19 + $0xd8] sm:$0xff]  ;;  %v643_v50 = vld [vmem:[%s5545_s19 + $0x2e0] sm:$0xff]  ;;  %v644_v52 = vld [vmem:[%s5545_s19 + $0x2e8] sm:$0xff] }
 0x230   :  { %v4882_v62 = vpack.c.bf16 %v578_v60, %v577_v58  ;;  %v627_v56 = vld [vmem:[%s5545_s19 + $0x260] sm:$0xff]  ;;  %v645_v58 = vld [vmem:[%s5545_s19 + $0x2f0] sm:$0xff]  ;;  %v646_v60 = vld [vmem:[%s5545_s19 + $0x2f8] sm:$0xff] }
 0x231   :  { %821 = vmatprep.mubr.f32.mxu0 %v672_v12 }
 0x232   :  { %4921 = vmatpush3.bf16.msra.mxu0 %v4920_v63  ;;  %v561_v63 = vld [vmem:[%s5545_s19 + $0x50] sm:$0xff] }
 0x233   :  { %4923 = vmatprep.subr.bf16.mxu0 %v4922_v7  ;;  %v4884_v4 = vpack.c.bf16 %v562_v0, %v561_v63  ;;  %v563_v7 = vld [vmem:[%s5545_s19 + $0x60] sm:$0xff]  ;;  %v629_v63 = vld [vmem:[%s5545_s19 + $0x270] sm:$0xff]  ;;  %v630_v0 = vld [vmem:[%s5545_s19 + $0x278] sm:$0xff] }
 0x234   :  { %v4956_v2 = vpack.c.bf16 %v630_v0, %v629_v63  ;;  %v5481_v0 = vmov 0.0  }
 0x236   :  { %4925 = vmatpush3.bf16.msra.mxu0 %v4924_v10  ;;  %v582_v10 = vld [vmem:[%s5545_s19 + $0xf8] sm:$0xff] }
 0x237   :  { %4958 = vmatprep.subr.bf16.mxu0 %v5478_v1  ;;  %v4890_v12 = vpack.c.bf16 %v582_v10, %v581_v9 }
 0x239   :  { %822 = vmatmul.mubr.f32.vlgmr.msra.gmra.mrb[4].mxu0 %v670_v11  ;;  %v4888_v11 = vpack.c.bf16 %v564_v8, %v563_v7  ;;  %v3966_v7 = vld [vmem:[%s5530_s3] ss:$0 sm:$0xff]  ;;  %s6555_s3 = sld [smem:[#allocation31_spill]] }
 0x23a   :  { %4407 = vmatprep.mubr.msk.f32.mxu0 %vm5480_vm2, %v5481_v0 }
 0x2b4   :  { %v373_v13 = vpop.xlane.xlu1 %372 }
 0x2b5   :  { %v376_v14 = vmul.f32 0.0078125, %v373_v13  ;;  %v565_v13 = vld [vmem:[%s5545_s19 + $0x70] sm:$0xff] }
 0x2b7   :  { %v378_v15 = vadd.f32 1e-05, %v376_v14  ;;  %v566_v14 = vld [vmem:[%s5545_s19 + $0x78] sm:$0xff] }
 0x2b8   :  { %v375_v16 = vpop.xlane.xlu1 %374 }
 0x2b9   :  { %5257 = vrsqrt.f32 %v378_v15  ;;  %v377_v17 = vmul.f32 0.0078125, %v375_v16  ;;  %v631_v15 = vld [vmem:[%s5545_s19 + $0x280] sm:$0xff]  ;;  %v632_v16 = vld [vmem:[%s5545_s19 + $0x288] sm:$0xff] }
 0x2bb   :  { %v379_v18 = vadd.f32 1e-05, %v377_v17  ;;  %v4892_v17 = vpack.c.bf16 %v566_v14, %v565_v13  ;;  %v3969_v13 = vld [vmem:[%s5550_s24] ss:$0 sm:$0xff]  ;;  %s6557_s24 = sld [smem:[#allocation33_spill]] }
 0x2bd   :  { %5259 = vrsqrt.f32 %v379_v18  ;;  %v4926_v18 = vpack.c.bf16 %v632_v16, %v631_v15 }
 0x2c3   :  { %v5258_v19 = vpop.eup %5257 }
 0x2c4   :  { %v382_v21 = vmul.f32 %v5258_v19, %v5808_v51  ;;  %v4864_v51 = vpack.c.bf16 %v552_v30, %v551_v29  ;;  %v615_v19 = vld [vmem:[%s5545_s19 + $0x200] sm:$0xff]  ;;  %v636_v30 = vld [vmem:[%s5545_s19 + $0x2a8] sm:$0xff] }
 0x2c5   :  { %v635_v29 = vld [vmem:[%s5545_s19 + $0x2a0] sm:$0xff] }
 0x2c6   :  { %v390_v23 = vmul.f32 %v3964_v20, %v382_v21  ;;  %v5910_v21 = vld.sshfl [vmem:[%s5500_s9 + $0x8] sm:$0x33 pattern:$0x76325410]  ;;  %v4934_v32 = vpack.c.bf16 %v636_v30, %v635_v29  ;;  %v931_v29 = vld [vmem:[%s6548_s5 + $0x18] sm:$0xff]  ;;  %s6549_s9 = sld [smem:[#allocation23_spill]] }
 0x2c7   :  { %v5260_v24 = vpop.eup %5259 }
 0x2c8   :  { %v383_v25 = vmul.f32 %v5260_v24, %v5812_v55  ;;  %v398_v26 = vadd.f32 %v3965_v22, %v390_v23  ;;  %v634_v23 = vld [vmem:[%s5545_s19 + $0x298] sm:$0xff] }
 0x2ca   :  { %v391_v27 = vmul.f32 %v3964_v20, %v383_v25  ;;  %v400_v28 = vmax.f32 %v398_v26, 0.0  ;;  %v616_v20 = vld [vmem:[%s5545_s19 + $0x208] sm:$0xff]  ;;  %v680_v25 = vcombine.high %v5910_v21, %v5910_v21 }
 0x2cb   :  { %v4928_v24 = vpack.c.bf16 %v616_v20, %v615_v19 }
 0x2cc   :  { %v399_v33 = vadd.f32 %v3965_v22, %v391_v27  ;;  %4372 = vmatprep.mubr.f32.mxu1 %v400_v28  ;;  %v633_v22 = vld [vmem:[%s5545_s19 + $0x290] sm:$0xff]  ;;  %v618_v28 = vld [vmem:[%s5545_s19 + $0x218] sm:$0xff] }
 0x2cd   :  { %v4930_v26 = vpack.c.bf16 %v634_v23, %v633_v22  ;;  %v617_v27 = vld [vmem:[%s5545_s19 + $0x210] sm:$0xff] }
 0x2ce   :  { %v401_v55 = vmax.f32 %v399_v33, 0.0  ;;  %v4932_v31 = vpack.c.bf16 %v618_v28, %v617_v27  ;;  %v619_v33 = vld [vmem:[%s5545_s19 + $0x220] sm:$0xff]  ;;  %v930_v27 = vld [vmem:[%s6548_s5 + $0x10] sm:$0xff] }
 0x2cf   :  { %v4962_v30 = vpack.c.bf16 %v931_v29, %v930_v27  ;;  %v3972_v27 = vld [vmem:[%s6551_s17] ss:$0 sm:$0xff]  ;;  %s6578_s17 = sld [smem:[#allocation46_spill]] }
 0x2d0   :  { %4373 = vmatmul.mubr.f32.vlgmr.msra.gmra.mrb[0].mxu1 %v401_v55  ;;  %v638_v55 = vld [vmem:[%s5545_s19 + $0x2b8] sm:$0xff] }
 0x2d1   :  { %4865 = vmatpush3.bf16.msra.mxu1 %v4864_v51  ;;  %751 = vmatprep.mubr.f32.mxu1 %v671_v34  ;;  %v620_v51 = vld [vmem:[%s5545_s19 + $0x228] sm:$0xff]  ;;  %v637_v34 = vld [vmem:[%s5545_s19 + $0x2b0] sm:$0xff] }
 0x2d2   :  { %4867 = vmatprep.subr.bf16.mxu1 %v4866_v35  ;;  %v4936_v35 = vpack.c.bf16 %v620_v51, %v619_v33  ;;  %v4938_v36 = vpack.c.bf16 %v638_v55, %v637_v34 }
 0x2d5   :  { %4869 = vmatpush3.bf16.msra.mxu1 %v4868_v40 }
 0x2d6   :  { %4871 = vmatprep.subr.bf16.mxu1 %v4870_v41  ;;  %v4942_v41 = vpack.c.bf16 %v640_v39, %v639_v38 }
 0x2d9   :  { %4873 = vmatpush3.bf16.msra.mxu1 %v4872_v46  ;;  %v4944_v46 = vpack.c.bf16 %v624_v43, %v623_v42  ;;  %v932_v43 = vld [vmem:[%s6548_s5 + $0x20] sm:$0xff] }
 0x2da   :  { %4875 = vmatprep.subr.bf16.mxu1 %v4874_v47  ;;  %v4946_v47 = vpack.c.bf16 %v642_v45, %v641_v44  ;;  %v933_v44 = vld [vmem:[%s6548_s5 + $0x28] sm:$0xff] }
 0x2db   :  { %v4965_v45 = vpack.c.bf16 %v933_v44, %v932_v43  ;;  %v1288_v44 = vld [vmem:[%s6555_s3] sm:$0xff] }
 0x2dd   :  { %4877 = vmatpush3.bf16.msra.mxu1 %v4876_v53  ;;  %v4948_v53 = vpack.c.bf16 %v626_v49, %v625_v48  ;;  %v936_v49 = vld [vmem:[%s6548_s5 + $0x40] sm:$0xff] }
 0x2de   :  { %4879 = vmatprep.subr.bf16.mxu1 %v4878_v54  ;;  %v4950_v54 = vpack.c.bf16 %v644_v52, %v643_v50  ;;  %v937_v50 = vld [vmem:[%s6548_s5 + $0x48] sm:$0xff] }
 0x2df   :  { %v4971_v52 = vpack.c.bf16 %v937_v50, %v936_v49 }
 0x2e1   :  { %4881 = vmatpush3.bf16.msra.mxu1 %v4880_v61  ;;  %v4952_v61 = vpack.c.bf16 %v628_v57, %v627_v56  ;;  %v940_v57 = vld [vmem:[%s6548_s5 + $0x60] sm:$0xff] }
 0x2e2   :  { %4883 = vmatprep.subr.bf16.mxu1 %v4882_v62  ;;  %v4954_v62 = vpack.c.bf16 %v646_v60, %v645_v58  ;;  %v941_v58 = vld [vmem:[%s6548_s5 + $0x68] sm:$0xff] }
 0x2e3   :  { %v4977_v60 = vpack.c.bf16 %v941_v58, %v940_v57  ;;  %v1373_v57 = vld [vmem:[%s6557_s24 + $0x8] sm:$0xff] }
 0x2e5   :  { %4885 = vmatpush3.bf16.msra.mxu1 %v4884_v4 }
 0x2e6   :  { %4887 = vmatprep.subr.bf16.mxu1 %v4886_v6 }
 0x2e9   :  { %4889 = vmatpush3.bf16.msra.mxu1 %v4888_v11 }
 0x2ea   :  { %4891 = vmatprep.subr.bf16.mxu1 %v4890_v12 }
 0x2ed   :  { %4893 = vmatpush3.bf16.msra.mxu1 %v4892_v17 }
 0x2ee   :  { %4927 = vmatprep.subr.bf16.mxu1 %v4926_v18 }
 0x2f0   :  { %752 = vmatmul.mubr.f32.vlgmr.msra.gmra.mrb[2].mxu1 %v5864_v5  ;;  %v621_v5 = vld [vmem:[%s5545_s19 + $0x230] sm:$0xff]  ;;  %s6556_s19 = sld [smem:[#allocation22_spill]] }
 0x2f1   :  { %4929 = vmatpush3.bf16.msra.mxu1 %v4928_v24  ;;  %891 = vmatprep.mubr.f32.mxu1 %v680_v25  ;;  %v4940_v40 = vpack.c.bf16 %v622_v37, %v621_v5  ;;  %v928_v25 = vld [vmem:[%s6548_s5] sm:$0xff] }
 0x2f2   :  { %4931 = vmatprep.subr.bf16.mxu1 %v4930_v26  ;;  %v929_v26 = vld [vmem:[%s6548_s5 + $0x8] sm:$0xff] }
 0x2f3   :  { %v4959_v28 = vpack.c.bf16 %v929_v26, %v928_v25  ;;  %v3971_v25 = vld [vmem:[%s6550_s13] ss:$0 sm:$0xff]  ;;  %s6577_s13 = sld [smem:[#allocation44_spill]] }
 0x2f5   :  { %4933 = vmatpush3.bf16.msra.mxu1 %v4932_v31  ;;  %4960 = vmatpush3.bf16.msra.mxu0 %v4959_v28 }
 0x2f6   :  { %4935 = vmatprep.subr.bf16.mxu1 %v4934_v32  ;;  %4961 = vmatprep.subr.bf16.mxu0 %v5478_v1 }
 0x2f9   :  { %4937 = vmatpush3.bf16.msra.mxu1 %v4936_v35  ;;  %4963 = vmatpush3.bf16.msra.mxu0 %v4962_v30  ;;  %v3967_v30 = vld [vmem:[%s6552_s21] ss:$0 sm:$0xff]  ;;  %s6579_s21 = sld [smem:[#allocation47_spill]] }
 0x2fa   :  { %4939 = vmatprep.subr.bf16.mxu1 %v4938_v36  ;;  %4964 = vmatprep.subr.bf16.mxu0 %v5478_v1 }
 0x2fd   :  { %4941 = vmatpush3.bf16.msra.mxu1 %v4940_v40  ;;  %4966 = vmatpush3.bf16.msra.mxu0 %v4965_v45  ;;  %v1289_v45 = vld [vmem:[%s6555_s3 + $0x8] sm:$0xff] }
 0x2fe   :  { %4943 = vmatprep.subr.bf16.mxu1 %v4942_v41  ;;  %4967 = vmatprep.subr.bf16.mxu0 %v5478_v1 }
 0x301   :  { %4945 = vmatpush3.bf16.msra.mxu1 %v4944_v46  ;;  %v934_v46 = vld [vmem:[%s6548_s5 + $0x30] sm:$0xff] }
 0x302   :  { %4947 = vmatprep.subr.bf16.mxu1 %v4946_v47  ;;  %v935_v47 = vld [vmem:[%s6548_s5 + $0x38] sm:$0xff] }
 0x303   :  { %v4968_v48 = vpack.c.bf16 %v935_v47, %v934_v46  ;;  %v3973_v46 = vld [vmem:[%s6556_s19] ss:$0 sm:$0xff]  ;;  %s5483_s19 = smov [#allocation9]  }
 0x305   :  { %4949 = vmatpush3.bf16.msra.mxu1 %v4948_v53  ;;  %4969 = vmatpush3.bf16.msra.mxu0 %v4968_v48  ;;  %v938_v53 = vld [vmem:[%s6548_s5 + $0x50] sm:$0xff]  ;;  %v6033_v48 = vpack.c.bf16 %v1289_v45, %v1288_v44 }
 0x306   :  { %4951 = vmatprep.subr.bf16.mxu1 %v4950_v54  ;;  %4970 = vmatprep.subr.bf16.mxu0 %v5478_v1  ;;  %v939_v54 = vld [vmem:[%s6548_s5 + $0x58] sm:$0xff] }
 0x307   :  { %v4974_v56 = vpack.c.bf16 %v939_v54, %v938_v53  ;;  %v1291_v53 = vld [vmem:[%s6555_s3 + $0x18] sm:$0xff] }
 0x309   :  { %4953 = vmatpush3.bf16.msra.mxu1 %v4952_v61  ;;  %4972 = vmatpush3.bf16.msra.mxu0 %v4971_v52  ;;  %v942_v61 = vld [vmem:[%s6548_s5 + $0x70] sm:$0xff] }
 0x30a   :  { %4955 = vmatprep.subr.bf16.mxu1 %v4954_v62  ;;  %4973 = vmatprep.subr.bf16.mxu0 %v5478_v1  ;;  %v943_v62 = vld [vmem:[%s6548_s5 + $0x78] sm:$0xff]  ;;  %v1290_v52 = vld [vmem:[%s6555_s3 + $0x10] sm:$0xff]  ;;  %s6575_s5 = sld [smem:[#allocation26_spill]] }
 0x30b   :  { %v4980_v63 = vpack.c.bf16 %v943_v62, %v942_v61  ;;  %v6043_v54 = vpack.c.bf16 %v1291_v53, %v1290_v52  ;;  %v1375_v61 = vld [vmem:[%s6557_s24 + $0x18] sm:$0xff] }
 0x30c   :  { %v4107_v3 = vpop.f32.mrb[4].mxu0 }
 0x30d   :  { %4957 = vmatpush3.bf16.msra.mxu1 %v4956_v2  ;;  %v4108_v4 = vpop.f32.mrb[5].mxu0  ;;  %4975 = vmatpush3.bf16.msra.mxu0 %v4974_v56  ;;  %v1023_v2 = vld [vmem:[%s6549_s9] sm:$0xff] }
 0x30e   :  { %4982 = vmatprep.subr.bf16.mxu1 %v5478_v1  ;;  %v4109_v6 = vadd.f32 %v4108_v4, %v4107_v3  ;;  %4976 = vmatprep.subr.bf16.mxu0 %v5478_v1  ;;  %v1024_v3 = vld [vmem:[%s6549_s9 + $0x8] sm:$0xff]  ;;  %v1025_v4 = vld [vmem:[%s6549_s9 + $0x10] sm:$0xff]  ;;  %v1372_v56 = vld [vmem:[%s6557_s24] sm:$0xff] }
 0x30f   :  { %v6051_v58 = vpack.c.bf16 %v1373_v57, %v1372_v56 }
 0x310   :  { %892 = vmatmul.mubr.f32.vlgmr.msra.gmra.mrb[4].mxu1 %v5910_v21 }
 0x311   :  { %4978 = vmatpush3.bf16.msra.mxu0 %v4977_v60  ;;  %4426 = vmatprep.mubr.msk.f32.mxu1 %vm5480_vm2, %v5481_v0  ;;  %v1374_v60 = vld [vmem:[%s6557_s24 + $0x10] sm:$0xff]  ;;  %s3859_s24 = sshll.u32 %s5483_s19, 4  ;;  %s3860_s24 = int_to_ptr.vmem [resolvable:$true] %s3859_s24 }
 0x312   :  { %4979 = vmatprep.subr.bf16.mxu0 %v5478_v1  ;;  %v6059_v62 = vpack.c.bf16 %v1375_v61, %v1374_v60 }
 0x315   :  { %4981 = vmatpush3.bf16.msra.mxu0 %v4980_v63  ;;  %v1209_v63 = vld [vmem:[%s6558_s20] sm:$0xff] }
 0x316   :  { %4994 = vmatprep.subr.bf16.mxu0 %v5478_v1 }
 0x3a3   :  { %v4374_v8 = vpop.f32.mrb[0].mxu1 }
 0x3a4   :  { %v497_v9 = vadd.f32 %v4374_v8, %v3966_v7  ;;  %v491_v10 = vpop.f32.mrb[1].mxu1 }
 0x3a5   :  { %v492_v11 = vadd.f32 %v3966_v7, %v491_v10  ;;  %v1026_v7 = vld [vmem:[%s6549_s9 + $0x18] sm:$0xff]  ;;  %v1028_v10 = vld [vmem:[%s6549_s9 + $0x28] sm:$0xff] }
 0x3a6   :  { %546 = vst.msk [vmem:[#allocation9 + $0x8] sm:$0xff] %vm277_vm0, %v497_v9  ;;  %v505_v24 = vsel %vm277_vm0, %v497_v9, 0.0  ;;  %v4986_v8 = vpack.c.bf16 %v1026_v7, %v1025_v4 }
 0x3a7   :  { %545 = vst.msk [vmem:[#allocation9] sm:$0xff] %vm277_vm0, %v492_v11  ;;  %v502_v23 = vsel %vm277_vm0, %v492_v11, 0.0 }
 0x3c3   :  { %v4072_v12 = vpop.f32.mrb[2].mxu1 }
 0x3c4   :  { %v4073_v14 = vpop.f32.mrb[3].mxu1 }
 0x3c5   :  { %v4074_v15 = vadd.f32 %v4073_v14, %v4072_v12  ;;  %v1029_v12 = vld [vmem:[%s6549_s9 + $0x30] sm:$0xff] }
 0x3c7   :  { %v754_v16 = vadd.f32 %v4074_v15, %v3969_v13  ;;  %v1030_v13 = vld [vmem:[%s6549_s9 + $0x38] sm:$0xff] }
 0x3c8   :  { %v4992_v14 = vpack.c.bf16 %v1030_v13, %v1029_v12  ;;  %v1213_v12 = vld [vmem:[%s6558_s20 + $0x20] sm:$0xff]  ;;  %v1214_v13 = vld [vmem:[%s6558_s20 + $0x28] sm:$0xff] }
 0x3c9   :  { %v824_v17 = vadd.f32 %v4109_v6, %v754_v16  ;;  %v4983_v6 = vpack.c.bf16 %v1024_v3, %v1023_v2  ;;  %v1210_v2 = vld [vmem:[%s6558_s20 + $0x8] sm:$0xff]  ;;  %v3974_v3 = vld [vmem:[%s6559_s4] ss:$0 sm:$0xff] }
 0x3cb   :  { %4984 = vmatpush3.bf16.msra.mxu1 %v4983_v6  ;;  %v6073_v6 = vpack.c.bf16 %v1210_v2, %v1209_v63 }
 0x3cc   :  { %4985 = vmatprep.subr.bf16.mxu1 %v5478_v1 }
 0x3cf   :  { %4987 = vmatpush3.bf16.msra.mxu1 %v4986_v8 }
 0x3d0   :  { %4988 = vmatprep.subr.bf16.mxu1 %v5478_v1 }
 0x3e3   :  { %v4142_v18 = vpop.f32.mrb[4].mxu1 }
 0x3e4   :  { %v4143_v19 = vpop.f32.mrb[5].mxu1 }
 0x3e5   :  { %v4144_v20 = vadd.f32 %v4143_v19, %v4142_v18 }
 0x3e7   :  { %v894_v21 = vadd.f32 %v4144_v20, %v824_v17 }
 0x3e9   :  { %v900_v22 = vsel %vm899_vm1, %v894_v21, 0.0 }
 0x3ea   :  { %901 = vadd.xlane.f32.xlu0 %v900_v22 }
 0x3ee   :  { %503 = vadd.xlane.f32.xlu0 %v502_v23 }
 0x3f2   :  { %506 = vadd.xlane.f32.xlu0 %v505_v24 }
 0x477   :  { %v902_v31 = vpop.xlane.xlu0 %901 }
 0x478   :  { %v903_v32 = vmul.f32 0.0078125, %v902_v31 }
 0x47a   :  { %v5958_v33 = vsub.f32 %v894_v21, %v903_v32 }
 0x47b   :  { %v504_v51 = vpop.xlane.xlu0 %503 }
 0x47c   :  { %v509_v34 = vmul.f32 0.03125, %v504_v51  ;;  %v905_v55 = vmul.f32 %v5958_v33, %v5958_v33  ;;  %v3968_v51 = vld [vmem:[%s6553_s25] ss:$0 sm:$0xff]  ;;  %s6580_s25 = sld [smem:[#allocation48_spill]] }
 0x47e   :  { %v5962_v35 = vsub.f32 %v492_v11, %v509_v34  ;;  %v906_v36 = vsel %vm899_vm1, %v905_v55, 0.0 }
 0x47f   :  { %907 = vadd.xlane.f32.xlu1 %v906_v36  ;;  %v507_v5 = vpop.xlane.xlu0 %506 }
 0x480   :  { %v510_v37 = vmul.f32 0.03125, %v507_v5  ;;  %v513_v38 = vmul.f32 %v5962_v35, %v5962_v35 }
 0x482   :  { %v5967_v39 = vsub.f32 %v497_v9, %v510_v37  ;;  %v515_v40 = vsel %vm277_vm0, %v513_v38, 0.0  ;;  %v1027_v9 = vld [vmem:[%s6549_s9 + $0x20] sm:$0xff]  ;;  %s6576_s9 = sld [smem:[#allocation49_spill]] }
 0x483   :  { %516 = vadd.xlane.f32.xlu1 %v515_v40  ;;  %v4989_v11 = vpack.c.bf16 %v1028_v10, %v1027_v9  ;;  %v1112_v38 = vld [vmem:[%s6554_s29] sm:$0xff]  ;;  %v1114_v40 = vld [vmem:[%s6554_s29 + $0x10] sm:$0xff]  ;;  %v1212_v10 = vld [vmem:[%s6558_s20 + $0x18] sm:$0xff] }
 0x484   :  { %v514_v41 = vmul.f32 %v5967_v39, %v5967_v39  ;;  %v1211_v9 = vld [vmem:[%s6558_s20 + $0x10] sm:$0xff] }
 0x485   :  { %4990 = vmatpush3.bf16.msra.mxu1 %v4989_v11  ;;  %v6079_v11 = vpack.c.bf16 %v1212_v10, %v1211_v9  ;;  %v1638_v9 = vld [vmem:[%s6564_s7 + $0x8] sm:$0xff] }
 0x486   :  { %v518_v42 = vsel %vm277_vm0, %v514_v41, 0.0  ;;  %4991 = vmatprep.subr.bf16.mxu1 %v5478_v1 }
 0x487   :  { %519 = vadd.xlane.f32.xlu1 %v518_v42  ;;  %v1115_v42 = vld [vmem:[%s6554_s29 + $0x18] sm:$0xff] }
 0x488   :  { %v4998_v43 = vpack.c.bf16 %v1115_v42, %v1114_v40 }
 0x489   :  { %4993 = vmatpush3.bf16.msra.mxu1 %v4992_v14 }
 0x48a   :  { %5012 = vmatprep.subr.bf16.mxu1 %v5478_v1 }
 0x50c   :  { %v908_v15 = vpop.xlane.xlu1 %907 }
 0x50d   :  { %v909_v16 = vmul.f32 0.0078125, %v908_v15  ;;  %v6087_v15 = vpack.c.bf16 %v1214_v13, %v1213_v12  ;;  %v1639_v12 = vld [vmem:[%s6564_s7 + $0x10] sm:$0xff]  ;;  %v1640_v13 = vld [vmem:[%s6564_s7 + $0x18] sm:$0xff] }
 0x50f   :  { %v910_v17 = vadd.f32 1e-05, %v909_v16 }
 0x510   :  { %v517_v18 = vpop.xlane.xlu1 %516 }
 0x511   :  { %5261 = vrsqrt.f32 %v910_v17  ;;  %v521_v19 = vmul.f32 0.03125, %v517_v18  ;;  %v1215_v17 = vld [vmem:[%s6558_s20 + $0x30] sm:$0xff]  ;;  %v1216_v18 = vld [vmem:[%s6558_s20 + $0x38] sm:$0xff] }
 0x513   :  { %v523_v20 = vadd.f32 1e-05, %v521_v19  ;;  %v6093_v19 = vpack.c.bf16 %v1216_v18, %v1215_v17  ;;  %v1716_v17 = vld [vmem:[%s6565_s0 + $0x8] sm:$0xff]  ;;  %v1717_v18 = vld [vmem:[%s6565_s0 + $0x10] sm:$0xff] }
 0x514   :  { %v520_v21 = vpop.xlane.xlu1 %519 }
 0x515   :  { %5263 = vrsqrt.f32 %v523_v20  ;;  %v522_v22 = vmul.f32 0.03125, %v520_v21 }
 0x517   :  { %v524_v23 = vadd.f32 1e-05, %v522_v22  ;;  %v1196_v22 = vld [vmem:[%s6560_s1] sm:$0xff] }
 0x519   :  { %5265 = vrsqrt.f32 %v524_v23  ;;  %v1197_v23 = vld [vmem:[%s6560_s1 + $0x8] sm:$0xff] }
 0x51b   :  { %v5262_v24 = vpop.eup %5261 }
 0x51c   :  { %v912_v26 = vmul.f32 %v5262_v24, %v5958_v33  ;;  %v6106_v24 = vpack.c.bf16 %v1197_v23, %v1196_v22  ;;  %v1718_v22 = vld [vmem:[%s6565_s0 + $0x18] sm:$0xff] }
 0x51d   :  { %v6160_v23 = vpack.c.bf16 %v1718_v22, %v1717_v18 }
 0x51e   :  { %v919_v28 = vmul.f32 %v3971_v25, %v912_v26  ;;  %v1198_v25 = vld [vmem:[%s6560_s1 + $0x10] sm:$0xff]  ;;  %v1199_v26 = vld [vmem:[%s6560_s1 + $0x18] sm:$0xff] }
 0x51f   :  { %v5264_v29 = vpop.eup %5263 }
 0x520   :  { %v527_v31 = vmul.f32 %v5264_v29, %v5962_v35  ;;  %v926_v32 = vadd.f32 %v3972_v27, %v919_v28  ;;  %v6112_v27 = vpack.c.bf16 %v1199_v26, %v1198_v25  ;;  %v6166_v25 = vld [vmem:[%s6566_s6] ss:$0 sm:$0xff] }
 0x522   :  { %v927_v34 = vmax.f32 %v926_v32, 0.0  ;;  %v535_v55 = vmul.f32 %v3967_v30, %v527_v31  ;;  %v6120_v31 = vsub.s32 0, %v5856_v59  ;;  %v6123_v32 = vld [vmem:[%s6562_s2] ss:$0 sm:$0xff] }
 0x523   :  { %v5266_v36 = vpop.eup %5265 }
 0x524   :  { %v528_v5 = vmul.f32 %v5266_v36, %v5967_v39  ;;  %4408 = vmatmul.mubr.f32.vlgmr.msra.gmra.mrb[6].mxu0 %v927_v34  ;;  %v6014_v37 = vadd.f32 %v3968_v51, %v535_v55  ;;  %v1113_v39 = vld [vmem:[%s6554_s29 + $0x8] sm:$0xff]  ;;  %s6581_s29 = sld [smem:[#allocation50_spill]] }
 0x525   :  { %4437 = vmatprep.mubr.msk.f32.mxu0 %vm5480_vm2, %v5481_v0  ;;  %v4995_v41 = vpack.c.bf16 %v1113_v39, %v1112_v38  ;;  %v6131_v38 = vld [vmem:[%s6563_s10] sm:$0xf] }
 0x526   :  { %v536_v33 = vmul.f32 %v3967_v30, %v528_v5  ;;  %547 = vst.msk [vmem:[#allocation10] sm:$0xff] %vm277_vm0, %v6014_v37  ;;  %v1217_v30 = vld [vmem:[%s6561_s28] sm:$0x1] }
 0x527   :  { %4996 = vmatpush3.bf16.msra.mxu0 %v4995_v41 }
 0x528   :  { %v6020_v35 = vadd.f32 %v3968_v51, %v536_v33  ;;  %4997 = vmatprep.subr.bf16.mxu0 %v5478_v1 }
 0x52a   :  { %548 = vst.msk [vmem:[#allocation10 + $0x8] sm:$0xff] %vm277_vm0, %v6020_v35 }
 0x52b   :  { %4999 = vmatpush3.bf16.msra.mxu0 %v4998_v43 }
 0x52c   :  { %5000 = vmatprep.subr.bf16.mxu0 %v5478_v1 }
 0x5f7   :  { %v1017_v47 = vpop.f32.mrb[6].mxu0 }
 0x5f8   :  { %v6035_v49 = vadd.f32 %v3973_v46, %v1017_v47  ;;  %v4409_v50 = vpop.f32.mrb[7].mxu0 }
 0x5fa   :  { %4427 = vmatmul.mubr.msk.f32.vlgmr.msra.gmra.mrb[6].mxu1 %vm1038_vm3, %v6035_v49  ;;  %1022 = vst.msk [vmem:[#allocation12] sm:$0x3] %vm1021_vm4, %v6035_v49 }
 0x5fb   :  { %5014 = vmatpush3.bf16.msra.mxu1 %v6033_v48  ;;  %4467 = vmatprep.mubr.msk.f32.mxu1 %vm5480_vm2, %v5481_v0 }
 0x5fc   :  { %5015 = vmatprep.subr.bf16.mxu1 %v5478_v1 }
 0x5ff   :  { %5017 = vmatpush3.bf16.msra.mxu1 %v6043_v54 }
 0x600   :  { %5018 = vmatprep.subr.bf16.mxu1 %v5478_v1 }
 0x602   :  { %4468 = vmatmul.mubr.msk.f32.vlgmr.msra.gmra.mrb[8].mxu1 %vm277_vm0, %v6014_v37 }
 0x603   :  { %5020 = vmatpush3.bf16.msra.mxu1 %v6051_v58  ;;  %4478 = vmatprep.mubr.msk.f32.mxu1 %vm5480_vm2, %v5481_v0 }
 0x604   :  { %5021 = vmatprep.subr.bf16.mxu1 %v5478_v1 }
 0x607   :  { %5023 = vmatpush3.bf16.msra.mxu1 %v6059_v62 }
 0x608   :  { %4492 = vmatprep.subr.mxu1 %v5481_v0 }
 0x60a   :  { %4479 = vmatmul.mubr.msk.f32.vlgmr.msra.gmra.mrb[10].mxu1 %vm277_vm0, %v6014_v37 }
 0x60b   :  { %4494 = vmatprep.mubr.msk.f32.mxu1 %vm5480_vm2, %v5481_v0  ;;  %4493 = vmatpush3.msk.msra.mxu1 %vm1555_vm5, %v6131_v38 }
 0x60c   :  { %5030 = vmatprep.subr.bf16.mxu1 %v5478_v1 }
 0x6cd   :  { %v1108_v4 = vpop.f32.mrb[6].mxu1 }
 0x6ce   :  { %v1109_v7 = vadd.f32 %v3974_v3, %v1108_v4  ;;  %v4428_v8 = vpop.f32.mrb[7].mxu1 }
 0x6cf   :  { %v1637_v8 = vld [vmem:[%s6564_s7] sm:$0xff] }
 0x6d0   :  { %4438 = vmatmul.mubr.msk.f32.vlgmr.msra.gmra.mrb[8].mxu0 %vm277_vm0, %v1109_v7  ;;  %v6143_v10 = vpack.c.bf16 %v1638_v9, %v1637_v8 }
 0x6d1   :  { %5002 = vmatpush3.bf16.msra.mxu0 %v6073_v6  ;;  %4456 = vmatprep.mubr.msk.f32.mxu0 %vm5480_vm2, %v5481_v0 }
 0x6d2   :  { %5003 = vmatprep.subr.bf16.mxu0 %v5478_v1 }
 0x6d5   :  { %5005 = vmatpush3.bf16.msra.mxu0 %v6079_v11  ;;  %v1368_v14 = vpop.f32.mrb[8].mxu1 }
 0x6d6   :  { %v4469_v16 = vpop.f32.mrb[9].mxu1  ;;  %5006 = vmatprep.subr.bf16.mxu0 %v5478_v1  ;;  %v1369_v36 = vadd.f32 %v6123_v32, %v1368_v14  ;;  %v6149_v14 = vpack.c.bf16 %v1640_v13, %v1639_v12 }
 0x6d7   :  { %v1715_v16 = vld [vmem:[%s6565_s0] sm:$0xff] }
 0x6d9   :  { %5008 = vmatpush3.bf16.msra.mxu0 %v6087_v15 }
 0x6da   :  { %5009 = vmatprep.subr.bf16.mxu0 %v5478_v1 }
 0x6dd   :  { %5011 = vmatpush3.bf16.msra.mxu0 %v6093_v19  ;;  %v6097_v20 = vpop.f32.mrb[10].mxu1 }
 0x6de   :  { %v4480_v21 = vpop.f32.mrb[11].mxu1  ;;  %5024 = vmatprep.subr.bf16.mxu0 %v5478_v1  ;;  %v1450_v26 = vadd.f32 %v6166_v25, %v6097_v20 }
 0x6df   :  { %v6156_v21 = vpack.c.bf16 %v1716_v17, %v1715_v16 }
 0x6e0   :  { %4457 = vmatmul.mubr.msk.f32.vlgmr.msra.gmra.mrb[10].mxu0 %vm1038_vm3, %v6035_v49 }
 0x6e1   :  { %4489 = vmatprep.mubr.msk.f32.mxu0 %vm5480_vm2, %v5481_v0  ;;  %5026 = vmatpush3.bf16.msra.mxu0 %v6106_v24 }
 0x6e2   :  { %5027 = vmatprep.subr.bf16.mxu0 %v5478_v1 }
 0x6e5   :  { %5029 = vmatpush3.bf16.msra.mxu0 %v6112_v27 }
 0x6e6   :  { %5036 = vmatprep.subr.bf16.mxu0 %v5478_v1 }
 0x7a3   :  { %v6116_v28 = vpop.f32.mrb[8].mxu0 }
 0x7a4   :  { %v4439_v29 = vpop.f32.mrb[9].mxu0 }
 0x7b3   :  { %v1284_v51 = vpop.f32.mrb[10].mxu0 }
 0x7b4   :  { %v1285_v34 = vadd.f32 %v1284_v51, %v1217_v30  ;;  %v4458_v55 = vpop.f32.mrb[11].mxu0 }
 0x7b6   :  { %v1456_v5 = vrot.slane %v1285_v34, %v6120_v31 }
 0x7b8   :  { %v1457_v33 = vmul.f32 %v1456_v5, %v1369_v36 }
 0x7ba   :  { %4490 = vmatmul.mubr.msk.f32.vlgmr.msra.gmra.mrb[12].mxu0 %vm277_vm0, %v1457_v33 }
 0x7bb   :  { %4516 = vmatprep.mubr.msk.f32.mxu0 %vm5480_vm2, %v5481_v0  ;;  %5038 = vmatpush3.bf16.msra.mxu0 %v6156_v21 }
 0x7bc   :  { %5039 = vmatprep.subr.bf16.mxu0 %v5478_v1 }
 0x7bf   :  { %5041 = vmatpush3.bf16.msra.mxu0 %v6160_v23 }
 0x7c0   :  { %5048 = vmatprep.subr.bf16.mxu0 %v5478_v1 }
 0x88d   :  { %v1527_v59 = vpop.f32.mrb[12].mxu0 }
 0x88e   :  { %v1531_v39 = vmul.f32 0.35355338, %v1527_v59  ;;  %v4491_v40 = vpop.f32.mrb[13].mxu0  ;;  %v1793_v59 = vld [vmem:[%s6567_s11] sm:$0xff] }
 0x890   :  { %v1533_v41 = vsel %vm1532_vm6, %v1531_v39, -inf }
 0x891   :  { %v1534_v42 = vrot.slane %v1533_v41, 4 }
 0x893   :  { %v1535_v43 = vmax.f32 %v1533_v41, %v1534_v42 }
 0x895   :  { %v1536_v44 = vrot.slane %v1535_v43, 2 }
 0x897   :  { %v1537_v45 = vmax.f32 %v1535_v43, %v1536_v44  ;;  %v1795_v43 = vld [vmem:[%s6567_s11 + $0x10] sm:$0xff]  ;;  %v1796_v44 = vld [vmem:[%s6567_s11 + $0x18] sm:$0xff] }
 0x898   :  { %v6179_v20 = vpack.c.bf16 %v1796_v44, %v1795_v43 }
 0x899   :  { %v1538_v46 = vrot.slane %v1537_v45, 1 }
 0x89b   :  { %v1539_v47 = vmax.f32 %v1537_v45, %v1538_v46  ;;  %v1874_v45 = vld [vmem:[%s6568_s16] sm:$0xff]  ;;  %v1875_v46 = vld [vmem:[%s6568_s16 + $0x8] sm:$0xff] }
 0x89d   :  { %v1540_v50 = vsub.f32 %v1531_v39, %v1539_v47  ;;  %v1794_v39 = vld [vmem:[%s6567_s11 + $0x8] sm:$0xff]  ;;  %v1641_v47 = vld [vmem:[%s6569_s15] sm:$0x1] }
 0x89e   :  { %v6173_v41 = vpack.c.bf16 %v1794_v39, %v1793_v59 }
 0x89f   :  { %v1541_v52 = vmul.f32 1.442695, %v1540_v50 }
 0x8a1   :  { %5267 = vpow2.f32 %v1541_v52  ;;  %v6197_v52 = vpack.c.bf16 %v1875_v46, %v1874_v45 }
 0x8ab   :  { %v5268_v53 = vpop.eup %5267 }
 0x8ac   :  { %v1543_v56 = vsel %vm1532_vm6, %v5268_v53, 0.0 }
 0x8ad   :  { %v1544_v57 = vrot.slane %v1543_v56, 4 }
 0x8af   :  { %v1545_v60 = vadd.f32 %v1544_v57, %v1543_v56  ;;  %v1876_v57 = vld [vmem:[%s6568_s16 + $0x10] sm:$0xff] }
 0x8b1   :  { %v1546_v61 = vrot.slane %v1545_v60, 2 }
 0x8b3   :  { %v1547_v63 = vadd.f32 %v1546_v61, %v1545_v60  ;;  %v1877_v60 = vld [vmem:[%s6568_s16 + $0x18] sm:$0xff] }
 0x8b4   :  { %v6203_v61 = vpack.c.bf16 %v1877_v60, %v1876_v57  ;;  %v2136_v57 = vld [vmem:[%s6572_s23 + $0x8] sm:$0xff] }
 0x8b5   :  { %v1548_v2 = vrot.slane %v1547_v63, 1 }
 0x8b7   :  { %v1549_v3 = vadd.f32 %v1548_v2, %v1547_v63 }
 0x8b9   :  { %5269 = vrcp.f32 %v1549_v3  ;;  %v1719_v3 = vld [vmem:[%s6570_s18] sm:$0x1] }
 0x8c3   :  { %v5270_v4 = vpop.eup %5269 }
 0x8c4   :  { %v1551_v7 = vmul.f32 %v5270_v4, %v5268_v53  ;;  %v6219_v4 = vld [vmem:[%s6571_s8] ss:$0 sm:$0xff] }
 0x8c6   :  { %4495 = vmatmul.mubr.msk.f32.vlgmr.msra.gmra.mrb[12].mxu1 %vm1532_vm6, %v1551_v7 }
 0x8c7   :  { %4505 = vmatprep.mubr.msk.f32.mxu1 %vm5480_vm2, %v5481_v0  ;;  %5032 = vmatpush3.bf16.msra.mxu1 %v6143_v10 }
 0x8c8   :  { %5033 = vmatprep.subr.bf16.mxu1 %v5478_v1 }
 0x8cb   :  { %5035 = vmatpush3.bf16.msra.mxu1 %v6149_v14 }
 0x8cc   :  { %5042 = vmatprep.subr.bf16.mxu1 %v5478_v1 }
 0x999   :  { %v1625_v29 = vpop.f32.mrb[12].mxu1 }
 0x99a   :  { %v1629_v30 = vmul.f32 %v1625_v29, %v1450_v26  ;;  %v4496_v51 = vpop.f32.mrb[13].mxu1 }
 0x99c   :  { %v1630_v34 = vsel %vm277_vm0, %v1629_v30, 0.0 }
 0x99d   :  { %v1631_v55 = vrot.slane %v1630_v34, 4 }
 0x99f   :  { %v1632_v36 = vadd.f32 %v1631_v55, %v1630_v34 }
 0x9a1   :  { %v1633_v5 = vrot.slane %v1632_v36, 2 }
 0x9a3   :  { %v1634_v33 = vadd.f32 %v1633_v5, %v1632_v36 }
 0x9a5   :  { %v1635_v40 = vrot.slane %v1634_v33, 1 }
 0x9a7   :  { %v1636_v42 = vadd.f32 %v1635_v40, %v1634_v33 }
 0x9a9   :  { %4506 = vmatmul.mubr.msk.f32.vlgmr.msra.gmra.mrb[14].mxu1 %vm277_vm0, %v1636_v42 }
 0x9aa   :  { %5044 = vmatpush3.bf16.msra.mxu1 %v6173_v41  ;;  %4527 = vmatprep.mubr.msk.f32.mxu1 %vm5480_vm2, %v5481_v0 }
 0x9ab   :  { %5045 = vmatprep.subr.bf16.mxu1 %v5478_v1 }
 0x9ae   :  { %5047 = vmatpush3.bf16.msra.mxu1 %v6179_v20 }
 0x9af   :  { %5054 = vmatprep.subr.bf16.mxu1 %v5478_v1 }
 0x9b1   :  { %4528 = vmatmul.mubr.msk.f32.vlgmr.msra.gmra.mrb[16].mxu1 %vm277_vm0, %v6014_v37 }
 0x9b2   :  { %5056 = vmatpush3.bf16.msra.mxu1 %v6106_v24  ;;  %4549 = vmatprep.mubr.msk.f32.mxu1 %vm5480_vm2, %v5481_v0 }
 0x9b3   :  { %5057 = vmatprep.subr.bf16.mxu1 %v5478_v1 }
 0x9b6   :  { %5059 = vmatpush3.bf16.msra.mxu1 %v6112_v27 }
 0x9b7   :  { %5066 = vmatprep.subr.bf16.mxu1 %v5478_v1 }
 0xa7c   :  { %v1711_v50 = vpop.f32.mrb[14].mxu1 }
 0xa7d   :  { %v1712_v53 = vadd.f32 %v1711_v50, %v1641_v47  ;;  %v4507_v56 = vpop.f32.mrb[15].mxu1 }
 0xa7e   :  { %v2135_v56 = vld [vmem:[%s6572_s23] sm:$0xff] }
 0xa7f   :  { %4517 = vmatmul.mubr.msk.f32.vlgmr.msra.gmra.mrb[14].mxu0 %vm277_vm0, %v1712_v53  ;;  %v6235_v60 = vpack.c.bf16 %v2136_v57, %v2135_v56 }
 0xa80   :  { %5050 = vmatpush3.bf16.msra.mxu0 %v6197_v52  ;;  %4538 = vmatprep.mubr.msk.f32.mxu0 %vm5480_vm2, %v5481_v0 }
 0xa81   :  { %5051 = vmatprep.subr.bf16.mxu0 %v5478_v1 }
 0xa84   :  { %v1870_v63 = vpop.f32.mrb[16].mxu1  ;;  %5053 = vmatpush3.bf16.msra.mxu0 %v6203_v61 }
 0xa85   :  { %v4529_v2 = vpop.f32.mrb[17].mxu1  ;;  %4552 = vmatprep.subr.mxu0 %v5481_v0  ;;  %v1871_v12 = vadd.f32 %v6219_v4, %v1870_v63  ;;  %v2137_v63 = vld [vmem:[%s6572_s23 + $0x10] sm:$0xff] }
 0xa86   :  { %v2138_v2 = vld [vmem:[%s6572_s23 + $0x18] sm:$0xff] }
 0xa87   :  { %4539 = vmatmul.mubr.msk.f32.vlgmr.msra.gmra.mrb[16].mxu0 %vm277_vm0, %v6014_v37 }
 0xa88   :  { %4553 = vmatpush3.msk.msra.mxu0 %vm1555_vm5, %v6131_v38  ;;  %4554 = vmatprep.mubr.msk.f32.mxu0 %vm5480_vm2, %v5481_v0 }
 0xa89   :  { %5060 = vmatprep.subr.bf16.mxu0 %v5478_v1 }
 0xb52   :  { %v1789_v7 = vpop.f32.mrb[14].mxu0 }
 0xb53   :  { %v1790_v8 = vadd.f32 %v1789_v7, %v1719_v3  ;;  %v4518_v9 = vpop.f32.mrb[15].mxu0  ;;  %v6241_v3 = vpack.c.bf16 %v2138_v2, %v2137_v63  ;;  %v1205_v7 = vld [vmem:[%s6573_s22 + $0x20] sm:$0xff]  ;;  %v2368_v63 = vld [vmem:[%s6576_s9 + $0x10] sm:$0xff]  ;;  %v2369_v2 = vld [vmem:[%s6576_s9 + $0x18] sm:$0xff] }
 0xb55   :  { %v1958_v13 = vrot.slane %v1790_v8, %v6120_v31  ;;  %v1206_v8 = vld [vmem:[%s6573_s22 + $0x28] sm:$0xff] }
 0xb56   :  { %v6247_v9 = vpack.c.bf16 %v1206_v8, %v1205_v7  ;;  %v6294_v7 = vpack.c.bf16 %v2369_v2, %v2368_v63  ;;  %v2450_v63 = vld [vmem:[#allocation8] sm:$0x1] }
 0xb57   :  { %v1959_v16 = vmul.f32 %v1958_v13, %v1871_v12  ;;  %v6252_v12 = vld [vmem:[%s6574_s26] ss:$0 sm:$0xff] }
 0xb59   :  { %4550 = vmatmul.mubr.msk.f32.vlgmr.msra.gmra.mrb[18].mxu1 %vm277_vm0, %v1959_v16 }
 0xb5a   :  { %v1951_v37 = vpop.f32.mrb[16].mxu0  ;;  %4576 = vmatprep.mubr.msk.f32.mxu1 %vm5480_vm2, %v5481_v0  ;;  %5068 = vmatpush3.bf16.msra.mxu1 %v6247_v9 }
 0xb5b   :  { %v4540_v17 = vpop.f32.mrb[17].mxu0  ;;  %5069 = vmatprep.subr.bf16.mxu1 %v5478_v1  ;;  %v1952_v13 = vadd.f32 %v6252_v12, %v1951_v37  ;;  %v1204_v37 = vld [vmem:[%s6573_s22 + $0x18] sm:$0xff] }
 0xc2c   :  { %v2029_v18 = vpop.f32.mrb[18].mxu1 }
 0xc2d   :  { %v2033_v22 = vmul.f32 0.35355338, %v2029_v18  ;;  %v4551_v26 = vpop.f32.mrb[19].mxu1 }
 0xc2f   :  { %v2034_v29 = vsel %vm1532_vm6, %v2033_v22, -inf }
 0xc30   :  { %v2035_v30 = vrot.slane %v2034_v29, 4 }
 0xc32   :  { %v2036_v51 = vmax.f32 %v2034_v29, %v2035_v30 }
 0xc34   :  { %v2037_v34 = vrot.slane %v2036_v51, 2 }
 0xc36   :  { %v2038_v55 = vmax.f32 %v2036_v51, %v2037_v34  ;;  %v1201_v34 = vld [vmem:[%s6573_s22] sm:$0xff] }
 0xc38   :  { %v2039_v36 = vrot.slane %v2038_v55, 1 }
 0xc3a   :  { %v2040_v5 = vmax.f32 %v2038_v55, %v2039_v36  ;;  %v1202_v55 = vld [vmem:[%s6573_s22 + $0x8] sm:$0xff] }
 0xc3c   :  { %v2041_v33 = vsub.f32 %v2033_v22, %v2040_v5  ;;  %v6258_v5 = vpack.c.bf16 %v1202_v55, %v1201_v34 }
 0xc3e   :  { %v2042_v59 = vmul.f32 1.442695, %v2041_v33 }
 0xc40   :  { %5271 = vpow2.f32 %v2042_v59  ;;  %v1203_v59 = vld [vmem:[%s6573_s22 + $0x10] sm:$0xff] }
 0xc4a   :  { %v5272_v39 = vpop.eup %5271 }
 0xc4b   :  { %v2044_v40 = vsel %vm1532_vm6, %v5272_v39, 0.0 }
 0xc4c   :  { %v2045_v42 = vrot.slane %v2044_v40, 4 }
 0xc4e   :  { %v2046_v43 = vadd.f32 %v2045_v42, %v2044_v40  ;;  %v3976_v40 = vld [vmem:[%s6575_s5] ss:$0 sm:$0xff] }
 0xc4f   :  { %v6272_v42 = vadd.f32 %v3976_v40, %v6116_v28  ;;  %v2366_v28 = vld [vmem:[%s6576_s9] sm:$0xff] }
 0xc50   :  { %v2047_v44 = vrot.slane %v2046_v43, 2 }
 0xc52   :  { %v2048_v45 = vadd.f32 %v2047_v44, %v2046_v43  ;;  %v1207_v43 = vld [vmem:[%s6573_s22 + $0x30] sm:$0xff]  ;;  %v1208_v44 = vld [vmem:[%s6573_s22 + $0x38] sm:$0xff] }
 0xc54   :  { %v2049_v46 = vrot.slane %v2048_v45, 1 }
 0xc56   :  { %v2050_v47 = vadd.f32 %v2049_v46, %v2048_v45  ;;  %v6281_v45 = vpack.c.bf16 %v1208_v44, %v1207_v43  ;;  %v2367_v46 = vld [vmem:[%s6576_s9 + $0x8] sm:$0xff]  ;;  %v2456_v44 = vld [vmem:[%s6581_s29 + $0x18] sm:$0xff] }
 0xc58   :  { %5273 = vrcp.f32 %v2050_v47  ;;  %5071 = vmatpush3.bf16.msra.mxu1 %v6281_v45  ;;  %v2139_v47 = vld [vmem:[%s6577_s13] sm:$0x1] }
 0xc59   :  { %5078 = vmatprep.subr.bf16.mxu1 %v5478_v1 }
 0xc62   :  { %v5274_v50 = vpop.eup %5273 }
 0xc63   :  { %v2052_v53 = vmul.f32 %v5274_v50, %v5272_v39  ;;  %v6264_v39 = vpack.c.bf16 %v1204_v37, %v1203_v59  ;;  %v2363_v59 = vld [vmem:[%s6580_s25] sm:$0x1] }
 0xc65   :  { %2053 = vst.msk [vmem:[%s5748_s12] sm:$0xff] %vm1532_vm6, %v2052_v53  ;;  %4555 = vmatmul.mubr.msk.f32.vlgmr.msra.gmra.mrb[18].mxu0 %vm1532_vm6, %v2052_v53  ;;  %v6288_v53 = vpack.c.bf16 %v2367_v46, %v2366_v28  ;;  %v2374_v46 = vld [vmem:[#allocation3] sm:$0x1] }
 0xc66   :  { %4565 = vmatprep.mubr.msk.f32.mxu0 %vm5480_vm2, %v5481_v0  ;;  %5062 = vmatpush3.bf16.msra.mxu0 %v6235_v60 }
 0xc67   :  { %5063 = vmatprep.subr.bf16.mxu0 %v5478_v1 }
 0xc6a   :  { %5065 = vmatpush3.bf16.msra.mxu0 %v6241_v3 }
 0xc6b   :  { %5072 = vmatprep.subr.bf16.mxu0 %v5478_v1 }
 0xd38   :  { %v2123_v16 = vpop.f32.mrb[18].mxu0 }
 0xd39   :  { %v2127_v17 = vmul.f32 %v2123_v16, %v1952_v13  ;;  %v4556_v18 = vpop.f32.mrb[19].mxu0  ;;  %v2370_v16 = vld [vmem:[%s6576_s9 + $0x20] sm:$0xff] }
 0xd3b   :  { %v2128_v22 = vsel %vm277_vm0, %v2127_v17, 0.0  ;;  %v2371_v17 = vld [vmem:[%s6576_s9 + $0x28] sm:$0xff] }
 0xd3c   :  { %v2129_v26 = vrot.slane %v2128_v22, 4  ;;  %v6303_v18 = vpack.c.bf16 %v2371_v17, %v2370_v16 }
 0xd3e   :  { %v2130_v29 = vadd.f32 %v2129_v26, %v2128_v22  ;;  %v2372_v22 = vld [vmem:[%s6576_s9 + $0x30] sm:$0xff]  ;;  %v2373_v26 = vld [vmem:[%s6576_s9 + $0x38] sm:$0xff] }
 0xd40   :  { %v2131_v30 = vrot.slane %v2130_v29, 2 }
 0xd42   :  { %v2132_v51 = vadd.f32 %v2131_v30, %v2130_v29  ;;  %v6309_v29 = vpack.c.bf16 %v2373_v26, %v2372_v22 }
 0xd44   :  { %v2133_v36 = vrot.slane %v2132_v51, 1 }
 0xd46   :  { %v2134_v33 = vadd.f32 %v2133_v36, %v2132_v51  ;;  %v2359_v51 = vld [vmem:[%s6578_s17] sm:$0x1] }
 0xd47   :  { %v2361_v36 = vld [vmem:[%s6579_s21] sm:$0x1] }
 0xd48   :  { %4566 = vmatmul.mubr.msk.f32.vlgmr.msra.gmra.mrb[20].mxu0 %vm277_vm0, %v2134_v33 }
 0xd49   :  { %5074 = vmatpush3.bf16.msra.mxu0 %v6258_v5  ;;  %4587 = vmatprep.mubr.msk.f32.mxu0 %vm5480_vm2, %v5481_v0 }
 0xd4a   :  { %5075 = vmatprep.subr.bf16.mxu0 %v5478_v1 }
 0xd4d   :  { %5077 = vmatpush3.bf16.msra.mxu0 %v6264_v39 }
 0xd4e   :  { %5090 = vmatprep.subr.bf16.mxu0 %v5478_v1 }
 0xd50   :  { %4588 = vmatmul.mubr.msk.f32.vlgmr.msra.gmra.mrb[22].mxu0 %vm277_vm0, %v6272_v42 }
 0xd51   :  { %4617 = vmatprep.mubr.msk.f32.mxu0 %vm5480_vm2, %v5481_v0 }
 0xe1b   :  { %v2209_v50 = vpop.f32.mrb[20].mxu0 }
 0xe1c   :  { %v2210_v56 = vadd.f32 %v2209_v50, %v2139_v47  ;;  %v4567_v57 = vpop.f32.mrb[21].mxu0  ;;  %v2448_v50 = vld [vmem:[#allocation6] sm:$0x1] }
 0xe1e   :  { %4577 = vmatmul.mubr.msk.f32.vlgmr.msra.gmra.mrb[20].mxu1 %vm277_vm0, %v2210_v56 }
 0xe1f   :  { %5080 = vmatpush3.bf16.msra.mxu1 %v6288_v53  ;;  %4606 = vmatprep.mubr.msk.f32.mxu1 %vm5480_vm2, %v5481_v0 }
 0xe20   :  { %5081 = vmatprep.subr.bf16.mxu1 %v5478_v1 }
 0xe23   :  { %v2355_v8 = vpop.f32.mrb[22].mxu0  ;;  %5083 = vmatpush3.bf16.msra.mxu1 %v6294_v7 }
 0xe24   :  { %v4589_v13 = vpop.f32.mrb[23].mxu0  ;;  %5084 = vmatprep.subr.bf16.mxu1 %v5478_v1 }
 0xe27   :  { %5086 = vmatpush3.bf16.msra.mxu1 %v6303_v18 }
 0xe28   :  { %5087 = vmatprep.subr.bf16.mxu1 %v5478_v1 }
 0xe2b   :  { %5089 = vmatpush3.bf16.msra.mxu1 %v6309_v29 }
 0xe2c   :  { %5108 = vmatprep.subr.bf16.mxu1 %v5478_v1 }
 0xef1   :  { %v2282_v30 = vpop.f32.mrb[20].mxu1 }
 0xef2   :  { %v2356_v34 = vadd.f32 %v2355_v8, %v2282_v30  ;;  %v4578_v55 = vpop.f32.mrb[21].mxu1  ;;  %v2541_v30 = vld [vmem:[%s6561_s28] sm:$0x1] }
 0xef4   :  { %v2360_v33 = vadd.f32 %v2359_v51, %v2356_v34 }
 0xef6   :  { %v2362_v37 = vmul.f32 %v2361_v36, %v2360_v33 }
 0xef8   :  { %v2364_v40 = vadd.f32 %v2363_v59, %v2362_v37 }
 0xefa   :  { %v2365_v43 = vmax.f32 %v2364_v40, 0.0 }
 0xefc   :  { %4607 = vmatmul.mubr.msk.f32.vlgmr.msra.gmra.mrb[22].mxu1 %vm1038_vm3, %v2365_v43 }
 0xefd   :  { %5110 = vmatpush3.bf16.msra.mxu1 %v6033_v48  ;;  %4647 = vmatprep.mubr.msk.f32.mxu1 %vm5480_vm2, %v5481_v0  ;;  %v2453_v48 = vld [vmem:[%s6581_s29] sm:$0xff] }
 0xefe   :  { %5111 = vmatprep.subr.bf16.mxu1 %v5478_v1 }
 0xf01   :  { %5113 = vmatpush3.bf16.msra.mxu1 %v6043_v54  ;;  %v2454_v54 = vld [vmem:[%s6581_s29 + $0x8] sm:$0xff] }
 0xf02   :  { %5114 = vmatprep.subr.bf16.mxu1 %v5478_v1 }
 0xf04   :  { %4648 = vmatmul.mubr.msk.f32.vlgmr.msra.gmra.mrb[24].mxu1 %vm277_vm0, %v6020_v35 }
 0xf05   :  { %5116 = vmatpush3.bf16.msra.mxu1 %v6051_v58  ;;  %4658 = vmatprep.mubr.msk.f32.mxu1 %vm5480_vm2, %v5481_v0  ;;  %v6340_v58 = vpack.c.bf16 %v2454_v54, %v2453_v48 }
 0xf06   :  { %5117 = vmatprep.subr.bf16.mxu1 %v5478_v1 }
 0xf07   :  { %5092 = vmatpush3.bf16.msra.mxu0 %v6340_v58 }
 0xf08   :  { %5093 = vmatprep.subr.bf16.mxu0 %v5478_v1 }
 0xf09   :  { %5119 = vmatpush3.bf16.msra.mxu1 %v6059_v62  ;;  %v2455_v62 = vld [vmem:[%s6581_s29 + $0x10] sm:$0xff] }
 0xf0a   :  { %4672 = vmatprep.subr.mxu1 %v5481_v0  ;;  %v6346_v28 = vpack.c.bf16 %v2456_v44, %v2455_v62 }
 0xf0c   :  { %4659 = vmatmul.mubr.msk.f32.vlgmr.msra.gmra.mrb[26].mxu1 %vm277_vm0, %v6020_v35  ;;  %5095 = vmatpush3.bf16.msra.mxu0 %v6346_v28 }
 0xf0d   :  { %4673 = vmatpush3.msk.msra.mxu1 %vm1555_vm5, %v6131_v38  ;;  %4674 = vmatprep.mubr.msk.f32.mxu1 %vm5480_vm2, %v5481_v0 }
 0xf0e   :  { %5126 = vmatprep.subr.bf16.mxu1 %v5478_v1  ;;  %5096 = vmatprep.subr.bf16.mxu0 %v5478_v1 }
 0xfcf   :  { %v2444_v47 = vpop.f32.mrb[22].mxu1 }
 0xfd0   :  { %v2445_v56 = vadd.f32 %v2444_v47, %v2374_v46  ;;  %v4608_v57 = vpop.f32.mrb[23].mxu1 }
 0xfd2   :  { %v2449_v2 = vmul.f32 %v2448_v50, %v2445_v56 }
 0xfd4   :  { %v2451_v8 = vadd.f32 %v2450_v63, %v2449_v2 }
 0xfd6   :  { %v2452_v13 = vmax.f32 %v2451_v8, 0.0 }
 0xfd7   :  { %v2695_v16 = vpop.f32.mrb[24].mxu1 }
 0xfd8   :  { %v4649_v17 = vpop.f32.mrb[25].mxu1  ;;  %4618 = vmatmul.mubr.msk.f32.vlgmr.msra.gmra.mrb[24].mxu0 %vm277_vm0, %v2452_v13  ;;  %v2696_v36 = vadd.f32 %v6123_v32, %v2695_v16 }
 0xfd9   :  { %5098 = vmatpush3.bf16.msra.mxu0 %v6073_v6  ;;  %4636 = vmatprep.mubr.msk.f32.mxu0 %vm5480_vm2, %v5481_v0  ;;  %v2542_v6 = vrot.slane %v6035_v49, 1 }
 0xfda   :  { %5099 = vmatprep.subr.bf16.mxu0 %v5478_v1 }
 0xfdd   :  { %5101 = vmatpush3.bf16.msra.mxu0 %v6079_v11  ;;  %v2457_v11 = vld [vmem:[#allocation2] sm:$0x1] }
 0xfde   :  { %5102 = vmatprep.subr.bf16.mxu0 %v5478_v1 }
 0xfdf   :  { %v2776_v22 = vpop.f32.mrb[26].mxu1 }
 0xfe0   :  { %v4660_v26 = vpop.f32.mrb[27].mxu1 }
 0xfe1   :  { %5104 = vmatpush3.bf16.msra.mxu0 %v6087_v15 }
 0xfe2   :  { %5105 = vmatprep.subr.bf16.mxu0 %v5478_v1 }
 0xfe5   :  { %5107 = vmatpush3.bf16.msra.mxu0 %v6093_v19 }
 0xfe6   :  { %5120 = vmatprep.subr.bf16.mxu0 %v5478_v1 }
 0xfe8   :  { %4637 = vmatmul.mubr.msk.f32.vlgmr.msra.gmra.mrb[26].mxu0 %vm1038_vm3, %v2542_v6  ;;  %v2777_v6 = vadd.f32 %v6166_v25, %v2776_v22 }
 0xfe9   :  { %5122 = vmatpush3.bf16.msra.mxu0 %v6106_v24  ;;  %4669 = vmatprep.mubr.msk.f32.mxu0 %vm5480_vm2, %v5481_v0 }
 0xfea   :  { %5123 = vmatprep.subr.bf16.mxu0 %v5478_v1 }
 0xfed   :  { %5125 = vmatpush3.bf16.msra.mxu0 %v6112_v27 }
 0xfee   :  { %5132 = vmatprep.subr.bf16.mxu0 %v5478_v1 }
0x10ab   :  { %v2527_v15 = vpop.f32.mrb[24].mxu0 }
0x10ac   :  { %v2528_v19 = vadd.f32 %v2527_v15, %v2457_v11  ;;  %v4619_v49 = vpop.f32.mrb[25].mxu0 }
0x10ae   :  { %2532 = vst.msk [vmem:[%s5753_s30] sm:$0x1] %vm2531_vm7, %v2528_v19 }
0x10bb   :  { %v2611_v51 = vpop.f32.mrb[26].mxu0 }
0x10bc   :  { %v2612_v34 = vadd.f32 %v2611_v51, %v2541_v30  ;;  %v4638_v55 = vpop.f32.mrb[27].mxu0 }
0x10be   :  { %v2783_v33 = vrot.slane %v2612_v34, %v6120_v31 }
0x10c0   :  { %v2784_v59 = vmul.f32 %v2783_v33, %v2696_v36 }
0x10c2   :  { %4670 = vmatmul.mubr.msk.f32.vlgmr.msra.gmra.mrb[28].mxu0 %vm277_vm0, %v2784_v59 }
0x10c3   :  { %5134 = vmatpush3.bf16.msra.mxu0 %v6156_v21  ;;  %4696 = vmatprep.mubr.msk.f32.mxu0 %vm5480_vm2, %v5481_v0 }
0x10c4   :  { %5135 = vmatprep.subr.bf16.mxu0 %v5478_v1 }
0x10c7   :  { %5137 = vmatpush3.bf16.msra.mxu0 %v6160_v23 }
0x10c8   :  { %5144 = vmatprep.subr.bf16.mxu0 %v5478_v1 }
0x1195   :  { %v2854_v37 = vpop.f32.mrb[28].mxu0 }
0x1196   :  { %v2858_v40 = vmul.f32 0.35355338, %v2854_v37  ;;  %v4671_v43 = vpop.f32.mrb[29].mxu0 }
0x1198   :  { %v2859_v32 = vsel %vm1532_vm6, %v2858_v40, -inf }
0x1199   :  { %v2860_v48 = vrot.slane %v2859_v32, 4 }
0x119b   :  { %v2861_v54 = vmax.f32 %v2859_v32, %v2860_v48 }
0x119d   :  { %v2862_v62 = vrot.slane %v2861_v54, 2 }
0x119f   :  { %v2863_v44 = vmax.f32 %v2861_v54, %v2862_v62 }
0x11a1   :  { %v2864_v46 = vrot.slane %v2863_v44, 1 }
0x11a3   :  { %v2865_v21 = vmax.f32 %v2863_v44, %v2864_v46 }
0x11a5   :  { %v2866_v47 = vsub.f32 %v2858_v40, %v2865_v21 }
0x11a7   :  { %v2867_v50 = vmul.f32 1.442695, %v2866_v47 }
0x11a9   :  { %5275 = vpow2.f32 %v2867_v50 }
0x11b3   :  { %v5276_v56 = vpop.eup %5275 }
0x11b4   :  { %v2869_v57 = vsel %vm1532_vm6, %v5276_v56, 0.0 }
0x11b5   :  { %v2870_v23 = vrot.slane %v2869_v57, 4 }
0x11b7   :  { %v2871_v63 = vadd.f32 %v2870_v23, %v2869_v57 }
0x11b9   :  { %v2872_v2 = vrot.slane %v2871_v63, 2 }
0x11bb   :  { %v2873_v8 = vadd.f32 %v2872_v2, %v2871_v63 }
0x11bd   :  { %v2874_v13 = vrot.slane %v2873_v8, 1 }
0x11bf   :  { %v2875_v16 = vadd.f32 %v2874_v13, %v2873_v8 }
0x11c1   :  { %5277 = vrcp.f32 %v2875_v16 }
0x11cb   :  { %v5278_v17 = vpop.eup %5277 }
0x11cc   :  { %v2877_v26 = vmul.f32 %v5278_v17, %v5276_v56 }
0x11ce   :  { %4675 = vmatmul.mubr.msk.f32.vlgmr.msra.gmra.mrb[28].mxu1 %vm1532_vm6, %v2877_v26 }
0x11cf   :  { %5128 = vmatpush3.bf16.msra.mxu1 %v6143_v10  ;;  %4685 = vmatprep.mubr.msk.f32.mxu1 %vm5480_vm2, %v5481_v0 }
0x11d0   :  { %5129 = vmatprep.subr.bf16.mxu1 %v5478_v1 }
0x11d3   :  { %5131 = vmatpush3.bf16.msra.mxu1 %v6149_v14  ;;  %v2963_v14 = vld [vmem:[%s6569_s15] sm:$0x1] }
0x11d4   :  { %5138 = vmatprep.subr.bf16.mxu1 %v5478_v1 }
0x12a1   :  { %v2947_v11 = vpop.f32.mrb[28].mxu1 }
0x12a2   :  { %v2951_v15 = vmul.f32 %v2947_v11, %v2777_v6  ;;  %v4676_v19 = vpop.f32.mrb[29].mxu1 }
0x12a4   :  { %v2952_v49 = vsel %vm277_vm0, %v2951_v15, 0.0 }
0x12a5   :  { %v2953_v30 = vrot.slane %v2952_v49, 4 }
0x12a7   :  { %v2954_v51 = vadd.f32 %v2953_v30, %v2952_v49 }
0x12a9   :  { %v2955_v34 = vrot.slane %v2954_v51, 2 }
0x12ab   :  { %v2956_v10 = vadd.f32 %v2955_v34, %v2954_v51 }
0x12ad   :  { %v2957_v55 = vrot.slane %v2956_v10, 1 }
0x12af   :  { %v2958_v36 = vadd.f32 %v2957_v55, %v2956_v10 }
0x12b1   :  { %4686 = vmatmul.mubr.msk.f32.vlgmr.msra.gmra.mrb[30].mxu1 %vm277_vm0, %v2958_v36 }
0x12b2   :  { %5140 = vmatpush3.bf16.msra.mxu1 %v6173_v41  ;;  %4707 = vmatprep.mubr.msk.f32.mxu1 %vm5480_vm2, %v5481_v0 }
0x12b3   :  { %5141 = vmatprep.subr.bf16.mxu1 %v5478_v1 }
0x12b6   :  { %5143 = vmatpush3.bf16.msra.mxu1 %v6179_v20 }
0x12b7   :  { %5150 = vmatprep.subr.bf16.mxu1 %v5478_v1 }
0x12b9   :  { %4708 = vmatmul.mubr.msk.f32.vlgmr.msra.gmra.mrb[32].mxu1 %vm277_vm0, %v6020_v35 }
0x12ba   :  { %5152 = vmatpush3.bf16.msra.mxu1 %v6106_v24  ;;  %4729 = vmatprep.mubr.msk.f32.mxu1 %vm5480_vm2, %v5481_v0 }
0x12bb   :  { %5153 = vmatprep.subr.bf16.mxu1 %v5478_v1 }
0x12be   :  { %5155 = vmatpush3.bf16.msra.mxu1 %v6112_v27 }
0x12bf   :  { %5162 = vmatprep.subr.bf16.mxu1 %v5478_v1 }
0x1384   :  { %v3033_v25 = vpop.f32.mrb[30].mxu1 }
0x1385   :  { %v3034_v41 = vadd.f32 %v3033_v25, %v2963_v14  ;;  %v4687_v20 = vpop.f32.mrb[31].mxu1  ;;  %v3683_v14 = vld [vmem:[%s6579_s21] sm:$0x1] }
0x1386   :  { %v3685_v25 = vld [vmem:[%s6580_s25] sm:$0x1] }
0x1387   :  { %4697 = vmatmul.mubr.msk.f32.vlgmr.msra.gmra.mrb[30].mxu0 %vm277_vm0, %v3034_v41 }
0x1388   :  { %5146 = vmatpush3.bf16.msra.mxu0 %v6197_v52  ;;  %4718 = vmatprep.mubr.msk.f32.mxu0 %vm5480_vm2, %v5481_v0  ;;  %v3041_v52 = vld [vmem:[%s6570_s18] sm:$0x1] }
0x1389   :  { %5147 = vmatprep.subr.bf16.mxu0 %v5478_v1 }
0x138c   :  { %v3192_v24 = vpop.f32.mrb[32].mxu1  ;;  %5149 = vmatpush3.bf16.msra.mxu0 %v6203_v61 }
0x138d   :  { %v4709_v27 = vpop.f32.mrb[33].mxu1  ;;  %4732 = vmatprep.subr.mxu0 %v5481_v0  ;;  %v3193_v61 = vadd.f32 %v6219_v4, %v3192_v24 }
0x138f   :  { %4719 = vmatmul.mubr.msk.f32.vlgmr.msra.gmra.mrb[32].mxu0 %vm277_vm0, %v6020_v35 }
0x1390   :  { %4733 = vmatpush3.msk.msra.mxu0 %vm1555_vm5, %v6131_v38  ;;  %4734 = vmatprep.mubr.msk.f32.mxu0 %vm5480_vm2, %v5481_v0 }
0x1391   :  { %5156 = vmatprep.subr.bf16.mxu0 %v5478_v1 }
0x145a   :  { %v3111_v22 = vpop.f32.mrb[30].mxu0 }
0x145b   :  { %v3112_v33 = vadd.f32 %v3111_v22, %v3041_v52  ;;  %v4698_v59 = vpop.f32.mrb[31].mxu0  ;;  %v3770_v52 = vld [vmem:[#allocation6] sm:$0x1] }
0x145d   :  { %v3280_v37 = vrot.slane %v3112_v33, %v6120_v31 }
0x145f   :  { %v3281_v40 = vmul.f32 %v3280_v37, %v3193_v61 }
0x1461   :  { %4730 = vmatmul.mubr.msk.f32.vlgmr.msra.gmra.mrb[34].mxu1 %vm277_vm0, %v3281_v40 }
0x1462   :  { %v3273_v35 = vpop.f32.mrb[32].mxu0  ;;  %5164 = vmatpush3.bf16.msra.mxu1 %v6247_v9  ;;  %4756 = vmatprep.mubr.msk.f32.mxu1 %vm5480_vm2, %v5481_v0 }
0x1463   :  { %v4720_v38 = vpop.f32.mrb[33].mxu0  ;;  %5165 = vmatprep.subr.bf16.mxu1 %v5478_v1  ;;  %v3274_v17 = vadd.f32 %v6252_v12, %v3273_v35  ;;  %v3461_v12 = vld [vmem:[%s6577_s13] sm:$0x1] }
0x1466   :  { %5167 = vmatpush3.bf16.msra.mxu1 %v6281_v45 }
0x1467   :  { %5174 = vmatprep.subr.bf16.mxu1 %v5478_v1 }
0x1534   :  { %v3351_v43 = vpop.f32.mrb[34].mxu1 }
0x1535   :  { %v3355_v4 = vmul.f32 0.35355338, %v3351_v43  ;;  %v4731_v32 = vpop.f32.mrb[35].mxu1 }
0x1537   :  { %v3356_v31 = vsel %vm1532_vm6, %v3355_v4, -inf }
0x1538   :  { %v3357_v48 = vrot.slane %v3356_v31, 4 }
0x153a   :  { %v3358_v54 = vmax.f32 %v3356_v31, %v3357_v48 }
0x153c   :  { %v3359_v62 = vrot.slane %v3358_v54, 2 }
0x153e   :  { %v3360_v44 = vmax.f32 %v3358_v54, %v3359_v62 }
0x1540   :  { %v3361_v9 = vrot.slane %v3360_v44, 1 }
0x1542   :  { %v3362_v46 = vmax.f32 %v3360_v44, %v3361_v9 }
0x1544   :  { %v3363_v21 = vsub.f32 %v3355_v4, %v3362_v46 }
0x1546   :  { %v3364_v47 = vmul.f32 1.442695, %v3363_v21 }
0x1548   :  { %5279 = vpow2.f32 %v3364_v47 }
0x1552   :  { %v5280_v50 = vpop.eup %5279 }
0x1553   :  { %v3366_v45 = vsel %vm1532_vm6, %v5280_v50, 0.0 }
0x1554   :  { %v3367_v56 = vrot.slane %v3366_v45, 4 }
0x1556   :  { %v3368_v57 = vadd.f32 %v3367_v56, %v3366_v45 }
0x1558   :  { %v3369_v23 = vrot.slane %v3368_v57, 2 }
0x155a   :  { %v3370_v63 = vadd.f32 %v3369_v23, %v3368_v57 }
0x155c   :  { %v3371_v2 = vrot.slane %v3370_v63, 1 }
0x155e   :  { %v3372_v8 = vadd.f32 %v3371_v2, %v3370_v63 }
0x1560   :  { %5281 = vrcp.f32 %v3372_v8 }
0x156a   :  { %v5282_v13 = vpop.eup %5281 }
0x156b   :  { %v3374_v16 = vmul.f32 %v5282_v13, %v5280_v50 }
0x156d   :  { %3375 = vst.msk [vmem:[%s5748_s12 + $0x8] sm:$0xff] %vm1532_vm6, %v3374_v16  ;;  %4735 = vmatmul.mubr.msk.f32.vlgmr.msra.gmra.mrb[34].mxu0 %vm1532_vm6, %v3374_v16  ;;  %s5482_s12 = smov [#allocation10]  }
0x156e   :  { %5158 = vmatpush3.bf16.msra.mxu0 %v6235_v60  ;;  %4745 = vmatprep.mubr.msk.f32.mxu0 %vm5480_vm2, %v5481_v0  ;;  %s3871_s3 = sshll.u32 %s5482_s12, 4  ;;  %s3872_s3 = int_to_ptr.vmem [resolvable:$true] %s3871_s3 }
0x156f   :  { %5159 = vmatprep.subr.bf16.mxu0 %v5478_v1  ;;  %s5349_s20 = scalar_lea.vmem %s3872_s3, 256  ;;  %p5354_p11 = scmp.lt.s32.totalorder %s3872_s3, %s3872_s3 }
0x1570   :  { %p5350_p10 = scmp.ne.s32.totalorder %s3872_s3, %s5349_s20  ;;  %p5355_p12 = scmp.lt.s32.totalorder %s5349_s20, %s5349_s20 }
0x1572   :  { %5161 = vmatpush3.bf16.msra.mxu0 %v6241_v3  ;;  %v3608_v3 = vrot.slane %v6272_v42, 1  ;;  %p5356_p13 = por %p5355_p12, %p5354_p11 }
0x1573   :  { %5168 = vmatprep.subr.bf16.mxu0 %v5478_v1 }
0x1574   :  { %p5357_p0 = pnand %p5356_p13, %p5350_p10 }
0x1640   :  { %v3445_v26 = vpop.f32.mrb[34].mxu0 }
0x1641   :  { %v3449_v6 = vmul.f32 %v3445_v26, %v3274_v17  ;;  %v4736_v11 = vpop.f32.mrb[35].mxu0 }
0x1643   :  { %v3450_v15 = vsel %vm277_vm0, %v3449_v6, 0.0 }
0x1644   :  { %v3451_v19 = vrot.slane %v3450_v15, 4 }
0x1646   :  { %v3452_v49 = vadd.f32 %v3451_v19, %v3450_v15 }
0x1648   :  { %v3453_v30 = vrot.slane %v3452_v49, 2 }
0x164a   :  { %v3454_v60 = vadd.f32 %v3453_v30, %v3452_v49 }
0x164c   :  { %v3455_v51 = vrot.slane %v3454_v60, 1 }
0x164e   :  { %v3456_v34 = vadd.f32 %v3455_v51, %v3454_v60 }
0x1650   :  { %4746 = vmatmul.mubr.msk.f32.vlgmr.msra.gmra.mrb[36].mxu0 %vm277_vm0, %v3456_v34 }
0x1651   :  { %5170 = vmatpush3.bf16.msra.mxu0 %v6258_v5  ;;  %4767 = vmatprep.mubr.msk.f32.mxu0 %vm5480_vm2, %v5481_v0 }
0x1652   :  { %5171 = vmatprep.subr.bf16.mxu0 %v5478_v1 }
0x1655   :  { %5173 = vmatpush3.bf16.msra.mxu0 %v6264_v39 }
0x1656   :  { %5186 = vmatprep.subr.bf16.mxu0 %v5478_v1 }
0x1658   :  { %4768 = vmatmul.mubr.msk.f32.vlgmr.msra.gmra.mrb[38].mxu0 %vm277_vm0, %v3608_v3 }
0x1659   :  { %5188 = vmatpush3.bf16.msra.mxu0 %v6340_v58  ;;  %4797 = vmatprep.mubr.msk.f32.mxu0 %vm5480_vm2, %v5481_v0 }
0x165a   :  { %5189 = vmatprep.subr.bf16.mxu0 %v5478_v1 }
0x165d   :  { %5191 = vmatpush3.bf16.msra.mxu0 %v6346_v28 }
0x1723   :  { %v3531_v5 = vpop.f32.mrb[36].mxu0 }
0x1724   :  { %v3532_v10 = vadd.f32 %v3531_v5, %v3461_v12  ;;  %v4747_v39 = vpop.f32.mrb[37].mxu0 }
0x1726   :  { %4757 = vmatmul.mubr.msk.f32.vlgmr.msra.gmra.mrb[36].mxu1 %vm277_vm0, %v3532_v10 }
0x1727   :  { %5176 = vmatpush3.bf16.msra.mxu1 %v6288_v53  ;;  %4786 = vmatprep.mubr.msk.f32.mxu1 %vm5480_vm2, %v5481_v0  ;;  %v3681_v53 = vld [vmem:[%s6578_s17] sm:$0x1] }
0x1728   :  { %5177 = vmatprep.subr.bf16.mxu1 %v5478_v1 }
0x172b   :  { %v3677_v42 = vpop.f32.mrb[38].mxu0  ;;  %5179 = vmatpush3.bf16.msra.mxu1 %v6294_v7  ;;  %v3696_v7 = vld [vmem:[#allocation3] sm:$0x1] }
0x172c   :  { %v4769_v58 = vpop.f32.mrb[39].mxu0  ;;  %5180 = vmatprep.subr.bf16.mxu1 %v5478_v1 }
0x172f   :  { %5182 = vmatpush3.bf16.msra.mxu1 %v6303_v18 }
0x1730   :  { %5183 = vmatprep.subr.bf16.mxu1 %v5478_v1  ;;  %v3772_v1 = vld [vmem:[#allocation8] sm:$0x1] }
0x1733   :  { %5185 = vmatpush3.bf16.msra.mxu1 %v6309_v29 }
0x17f9   :  { %v3604_v28 = vpop.f32.mrb[36].mxu1 }
0x17fa   :  { %v3678_v55 = vadd.f32 %v3677_v42, %v3604_v28  ;;  %v4758_v36 = vpop.f32.mrb[37].mxu1 }
0x17fc   :  { %v3682_v0 = vadd.f32 %v3681_v53, %v3678_v55 }
0x17fe   :  { %v3684_v41 = vmul.f32 %v3683_v14, %v3682_v0 }
0x1800   :  { %v3686_v20 = vadd.f32 %v3685_v25, %v3684_v41 }
0x1802   :  { %v3687_v24 = vmax.f32 %v3686_v20, 0.0 }
0x1804   :  { %4787 = vmatmul.mubr.msk.f32.vlgmr.msra.gmra.mrb[38].mxu1 %vm1038_vm3, %v3687_v24 }
0x18d7   :  { %v3766_v27 = vpop.f32.mrb[38].mxu1 }
0x18d8   :  { %v3767_v18 = vadd.f32 %v3766_v27, %v3696_v7  ;;  %v4788_v22 = vpop.f32.mrb[39].mxu1 }
0x18da   :  { %v3771_v33 = vmul.f32 %v3770_v52, %v3767_v18 }
0x18dc   :  { %v3773_v29 = vadd.f32 %v3772_v1, %v3771_v33 }
0x18de   :  { %v3774_v59 = vmax.f32 %v3773_v29, 0.0 }
0x18e0   :  { %4798 = vmatmul.mubr.msk.f32.vlgmr.msra.gmra.mrb[40].mxu0 %vm277_vm0, %v3774_v59 }
0x18e1   :  { %5360 = shalt.err (!%p5357_p0)
}
0x18e2   :  { %s5361_s4 = scalar_lea.hbm %s5738_s27, 256 }
0x18e3   :  { %p5362_p1 = scmp.ne.s32.totalorder %s5738_s27, %s5361_s4  ;;  %p5365_p2 = scmp.lt.u32.totalorder %s5361_s4, %s5738_s27 }
0x18e5   :  { %p5367_p3 = pnand %p5365_p2, %p5362_p1 }
0x18e7   :  { %5370 = shalt.err (!%p5367_p3)
}
0x18e8   :  { %s5484_s1 = smov 128   ;;  %s5485_s28 = smov 8  }
0x18e9   :  { %3877 = dma.vmem_to_hbm [thread:$0]  %s3872_s3, 256, %s5738_s27, [#allocation11], %s5484_s1, %s5484_s1, %s5485_s28  }
0x18ea   :  { %s5371_s2 = scalar_lea.vmem %s3860_s24, 256  ;;  %p5376_p5 = scmp.lt.s32.totalorder %s3860_s24, %s3860_s24 }
0x18eb   :  { %p5372_p4 = scmp.ne.s32.totalorder %s3860_s24, %s5371_s2  ;;  %p5377_p6 = scmp.lt.s32.totalorder %s5371_s2, %s5371_s2 }
0x18ed   :  { %p5378_p7 = por %p5377_p6, %p5376_p5 }
0x18ef   :  { %p5379_p8 = pnand %p5378_p7, %p5372_p4 }
0x18f1   :  { %5382 = shalt.err (!%p5379_p8)
}
0x18f2   :  { %s6582_s10 = sld [smem:[#allocation51_spill]] }
0x18f8   :  { %s5383_s7 = scalar_lea.hbm %s6582_s10, 256 }
0x18f9   :  { %p5384_p9 = scmp.ne.s32.totalorder %s6582_s10, %s5383_s7  ;;  %p5387_p10 = scmp.lt.u32.totalorder %s5383_s7, %s6582_s10 }
0x18fb   :  { %p5389_p11 = pnand %p5387_p10, %p5384_p9 }
0x18fd   :  { %5392 = shalt.err (!%p5389_p11)
}
0x18fe   :  { %3865 = dma.vmem_to_hbm [thread:$0]  %s3860_s24, 256, %s6582_s10, [#allocation5], %s5484_s1, %s5484_s1, %s5485_s28  }
0x18ff   :  { %s5486_s0 = smov [#allocation12]  }
0x1900   :  { %s3884_s27 = sshll.u32 %s5486_s0, 4  ;;  %s3885_s27 = int_to_ptr.vmem [resolvable:$true] %s3884_s27 }
0x1901   :  { %s5393_s6 = scalar_lea.vmem %s3885_s27, 32  ;;  %p5398_p13 = scmp.lt.s32.totalorder %s3885_s27, %s3885_s27 }
0x1902   :  { %p5394_p12 = scmp.ne.s32.totalorder %s3885_s27, %s5393_s6  ;;  %p5399_p0 = scmp.lt.s32.totalorder %s5393_s6, %s5393_s6 }
0x1904   :  { %p5400_p1 = por %p5399_p0, %p5398_p13 }
0x1906   :  { %p5401_p2 = pnand %p5400_p1, %p5394_p12 }
0x1908   :  { %5404 = shalt.err (!%p5401_p2)
}
0x1909   :  { %s5405_s11 = scalar_lea.hbm %s5743_s14, 32 }
0x190a   :  { %p5406_p3 = scmp.ne.s32.totalorder %s5743_s14, %s5405_s11  ;;  %p5409_p4 = scmp.lt.u32.totalorder %s5405_s11, %s5743_s14 }
0x190c   :  { %p5411_p5 = pnand %p5409_p4, %p5406_p3 }
0x190e   :  { %5414 = shalt.err (!%p5411_p5)
}
0x190f   :  { %3887 = dma.vmem_to_hbm [thread:$0]  %s3885_s27, 32, %s5743_s14, [#allocation11]   ;;  %v3779_v61 = vld [vmem:[#allocation2] sm:$0x1] }
0x19b3   :  { %v3849_v37 = vpop.f32.mrb[40].mxu0 }
0x19b4   :  { %v3850_v40 = vadd.f32 %v3849_v37, %v3779_v61  ;;  %v4799_v35 = vpop.f32.mrb[41].mxu0 }
0x19b6   :  { %3853 = vst.msk [vmem:[%s5753_s30 + $0x1] sm:$0x1] %vm2531_vm7, %v3850_v40 }
0x19b7   :  { %5419 = dma.done.wait [#allocation5], 256  }
0x19b8   :  { %5420 = vsyncadd [#allocation5], 4294967040 }
0x19b9   :  { %5421 = dma.done.wait [#allocation11], 288  }
0x19ba   :  { %5422 = vsyncadd [#allocation11], 4294967008 }
0x19bb   :  { %3905 = vsyncpa [#allocation4], 1 }
0x19bc   :  { %3906 = vsyncpa [#allocation7], 1 }
0x19bd   :  { %3907 = vsyncpa [#allocation5], 1 }
0x19be   :  { %3908 = vsyncpa [#allocation11], 1 }

</bundles_post_ra>
